<compile_context>
chip_gen: v7x
topology: tpu7x:2x2x1
jax: 0.10.0
libtpu: 0.0.40
codegen_flags: <defaults>
</compile_context>

<pallas_src>
import functools

import jax
import jax.numpy as jnp
from jax.experimental import pallas as pl
from jax.experimental.pallas import tpu as pltpu


CONFIG = {
    "effects": [0, 1, 2, 3],
    "effect_dim": 8,
    "module_stft": {"n_fft": 16, "hop_length": 8},
    "module_encoder": {"in_channels": 1, "out_channels": 16, "kernel_size": 3},
    "module_bottleneck": {"channels": 16, "kernel_size": 3},
    "module_decoder": {"in_channels": 16, "out_channels": 1, "kernel_size": 3},
    "module_final_conv": {"kernel_size": 1},
}

# Order of the shared (weight / constant) VMEM operands passed to the kernel.
_WEIGHT_KEYS = (
    "wre_a", "wre_b", "wim_a", "wim_b",
    "enc_mm", "enc_ms", "enc_m0", "enc_m2", "enc_b",
    "bot_m", "bot_b",
    "dec_mm", "dec_ms", "dec_m0", "dec_m2", "dec_b",
    "wit_re", "wit_im", "wib_re", "wib_im",
    "p_all", "p_e0n", "p_e2n",
    "m_nf", "m_nk", "m_nl",
    "inv_env",
)


def _choose_bblk(B, J, target_lanes=256):
    """Largest divisor of B such that Bblk*J roughly fills the 128/256 lanes."""
    cap = max(1, target_lanes // max(J, 1))
    for bb in range(min(B, cap), 0, -1):
        if B % bb == 0:
            return bb
    return 1


# ----------------------------------------------------------------------------
# Fused Pallas kernel: one grid step = one batch GROUP, everything in VMEM.
# Lane layout: columns = Bblk blocks of J "frame slots"; slot J-1 of each block
# is a dummy frame (only Tf = J-1 real frames exist) whose garbage never
# propagates into real columns thanks to the edge masks.
# ----------------------------------------------------------------------------
def _vocomorph_kernel(
    x_ref, eff_ref,
    wre_a_ref, wre_b_ref, wim_a_ref, wim_b_ref,
    enc_mm_ref, enc_ms_ref, enc_m0_ref, enc_m2_ref, enc_b_ref,
    bot_m_ref, bot_b_ref,
    dec_mm_ref, dec_ms_ref, dec_m0_ref, dec_m2_ref, dec_b_ref,
    wit_re_ref, wit_im_ref, wib_re_ref, wib_im_ref,
    p_all_ref, p_e0n_ref, p_e2n_ref,
    m_nf_ref, m_nk_ref, m_nl_ref,
    inv_env_ref,
    fin_ref,
    out_ref,
):
    f32, bf16 = jnp.float32, jnp.bfloat16
    dot = functools.partial(jnp.dot, preferred_element_type=f32)

    ncols = x_ref.shape[2]                         # Bblk * J

    # time-edge masks (f32 0/1 rows, broadcast over sublanes)
    not_first = m_nf_ref[...]                      # 0 at frame 0 of each block
    not_klast = m_nk_ref[...]                      # 0 at last REAL frame (J-2)
    not_last = m_nl_ref[...]                       # 0 at the dummy slot (J-1)

    # ---- STFT: frame j = [hop-chunk j ; hop-chunk j+1], windowed real DFT ----
    x2t = x_ref[0]                                               # (hop, ncols) f32
    x_nx = pltpu.roll(x2t, shift=ncols - 1, axis=1)              # col j <- col j+1
    xa, xb = x2t.astype(bf16), x_nx.astype(bf16)
    spec_re = dot(wre_a_ref[...], xa) + dot(wre_b_ref[...], xb)  # (F, ncols) f32
    spec_im = dot(wim_a_ref[...], xa) + dot(wim_b_ref[...], xb)

    # ---- magnitude + unit-phase via ONE rsqrt (EUP slot) ----
    pwr = spec_re * spec_re + spec_im * spec_im
    inv_r = jax.lax.rsqrt(jnp.maximum(pwr, 1e-30))
    mag = pwr * inv_r                                            # == sqrt(pwr)
    pos = pwr > 0.0
    cosph = jnp.where(pos, spec_re * inv_r, 1.0)
    sinph = jnp.where(pos, spec_im * inv_r, 0.0)

    # ---- helpers ----
    def shift3(x):
        """'same' 3-tap time shifts via lane rolls + edge masks (no matmuls)."""
        x_r = pltpu.roll(x, shift=1, axis=1) * not_first          # kw=0: col j <- j-1
        x_l = pltpu.roll(x, shift=ncols - 1, axis=1) * not_klast  # kw=2: col j <- j+1
        return (x_r, x, x_l)

    def conv3(x, m_ref):
        """3x3 'same' conv on (C*F, ncols):  sum_kw  M_kw @ shift_kw(x)."""
        xs = shift3(x)
        acc = dot(m_ref[0], xs[0].astype(bf16))
        acc = acc + dot(m_ref[1], xs[1].astype(bf16))
        acc = acc + dot(m_ref[2], xs[2].astype(bf16))
        return acc

    eff = eff_ref[0]                                             # (E*F, Bblk) bf16

    def eff_bias(ms_ref, m0_ref, m2_ref):
        """Effect branch (constant over time) folded to a per-(row, batch) bias
        plus first / last-frame edge corrections, then broadcast over time."""
        eb = dot(ms_ref[...], eff).astype(bf16)                  # (CF, Bblk)
        e0 = dot(m0_ref[...], eff).astype(bf16)
        e2 = dot(m2_ref[...], eff).astype(bf16)
        return (dot(eb, p_all_ref[...]) + dot(e0, p_e0n_ref[...])
                + dot(e2, p_e2n_ref[...]))                       # (CF, ncols) f32

    # ---- encoder ----
    h = conv3(mag, enc_mm_ref) + eff_bias(enc_ms_ref, enc_m0_ref, enc_m2_ref)
    h = jnp.maximum(h + enc_b_ref[...], 0.0)                     # (Cenc*F, ncols)
    # ---- bottleneck ----
    h = conv3(h, bot_m_ref)
    h = jnp.maximum(h + bot_b_ref[...], 0.0)                     # (Cenc*F, ncols)
    # ---- decoder ----
    h = conv3(h, dec_mm_ref) + eff_bias(dec_ms_ref, dec_m0_ref, dec_m2_ref)
    h = jnp.maximum(h + dec_b_ref[...], 0.0)                     # (F, ncols)

    # ---- final 1x1 conv (single channel) == SMEM scalar scale + bias ----
    mag_new = h * fin_ref[0] + fin_ref[1]

    # ---- polar recombination: mag_new * exp(i * atan2(im, re)) ----
    out_re = (mag_new * cosph).astype(bf16)
    out_im = (mag_new * sinph).astype(bf16)

    # ---- iSTFT: windowed inverse real DFT, first / second half of each frame ----
    fh = dot(wit_re_ref[...], out_re) + dot(wit_im_ref[...], out_im)   # (hop, ncols)
    sh = dot(wib_re_ref[...], out_re) + dot(wib_im_ref[...], out_im)   # (hop, ncols)

    # ---- overlap-add (hop = n_fft/2) as a lane roll + masked add, then NOLA ----
    y = fh * not_last + pltpu.roll(sh, shift=1, axis=1) * not_first
    out_ref[0] = y * inv_env_ref[...]


def _full_spec(arr):
    """BlockSpec covering the whole (shared) constant, same block every step."""
    zeros = (0,) * arr.ndim
    return pl.BlockSpec(arr.shape, lambda g: zeros)


# ----------------------------------------------------------------------------
# Parameter init (raw, PyTorch-like) and packing into kernel operands
# ----------------------------------------------------------------------------
def init_params(config, key):
    e_dim = config["effect_dim"]
    n_eff = len(config["effects"])
    enc_c = config["module_encoder"]["out_channels"]
    dec_c = config["module_decoder"]["out_channels"]
    k = config["module_encoder"]["kernel_size"]
    kf = config["module_final_conv"]["kernel_size"]

    keys = jax.random.split(key, 5)
    return {
        "embed": 0.1 * jax.random.normal(keys[0], (n_eff, e_dim), jnp.float32),
        "enc_w": 0.1 * jax.random.normal(keys[1], (enc_c, 1 + e_dim, k, k), jnp.float32),
        "enc_b": jnp.zeros((enc_c,), jnp.float32),
        "bot_w": 0.1 * jax.random.normal(keys[2], (enc_c, enc_c, k, k), jnp.float32),
        "bot_b": jnp.zeros((enc_c,), jnp.float32),
        "dec_w": 0.1 * jax.random.normal(keys[3], (dec_c, enc_c + e_dim, k, k), jnp.float32),
        "dec_b": jnp.zeros((dec_c,), jnp.float32),
        "fin_w": 0.1 * jax.random.normal(keys[4], (dec_c, dec_c, kf, kf), jnp.float32),
        "fin_b": jnp.zeros((dec_c,), jnp.float32),
    }


def pack_params(params, config, T, B):
    """Build all kernel-ready constant operands once (outside the jitted fwd)."""
    n_fft = config["module_stft"]["n_fft"]
    hop = config["module_stft"]["hop_length"]
    enc_c = config["module_encoder"]["out_channels"]
    F = n_fft // 2 + 1
    J = T // hop
    Tf = (T - n_fft) // hop + 1                    # == J - 1 (hop = n_fft / 2)
    Bblk = _choose_bblk(B, J)
    ncols = Bblk * J
    f32, bf16 = jnp.float32, jnp.bfloat16

    # Hann window (periodic) + real-DFT matrices, split into the two hop-sized
    # halves of each frame (frames are assembled from adjacent chunks in-kernel)
    n = jnp.arange(n_fft, dtype=f32)
    win = 0.5 - 0.5 * jnp.cos(2.0 * jnp.pi * n / n_fft)
    k = jnp.arange(F, dtype=f32)
    ang = 2.0 * jnp.pi * n[:, None] * k[None, :] / n_fft            # (n_fft, F)
    wre = (win[:, None] * jnp.cos(ang)).T                           # (F, n_fft)
    wim = (win[:, None] * (-jnp.sin(ang))).T

    # inverse real DFT (windowed), split into first / second half of each frame
    c = jnp.where((jnp.arange(F) == 0) | (jnp.arange(F) == n_fft // 2), 1.0, 2.0)
    iang = 2.0 * jnp.pi * k[:, None] * n[None, :] / n_fft           # (F, n_fft)
    idft_re = (c[:, None] * jnp.cos(iang)) / n_fft
    idft_im = (-c[:, None] * jnp.sin(iang)) / n_fft
    wit_re = (win[None, :hop] * idft_re[:, :hop]).T                 # (hop, F)
    wit_im = (win[None, :hop] * idft_im[:, :hop]).T
    wib_re = (win[None, hop:] * idft_re[:, hop:]).T
    wib_im = (win[None, hop:] * idft_im[:, hop:]).T

    # 3x3 conv weights as block-banded matrices acting on (C*F, time) activations
    def band(w):                                   # (Co, Ci, 3, 3) -> (3, Co*F, Ci*F)
        Co, Ci, K, _ = w.shape
        mats = []
        for kw in range(K):
            m = jnp.zeros((Co * F, Ci * F), f32)
            for kh in range(K):
                m = m + jnp.kron(w[:, :, kh, kw],
                                 jnp.eye(F, k=kh - 1, dtype=f32))
            mats.append(m)
        return jnp.stack(mats)

    enc_m = band(params["enc_w"])                  # (3, Cenc*F, (1+E)*F)
    bot_m = band(params["bot_w"])                  # (3, Cenc*F, Cenc*F)
    dec_m = band(params["dec_w"])                  # (3, F, (Cenc+E)*F)
    enc_mm, enc_me = enc_m[:, :, :F], enc_m[:, :, F:]
    dec_mm, dec_me = dec_m[:, :, :enc_c * F], dec_m[:, :, enc_c * F:]

    # broadcast matrices for the effect bias: block b covers columns [b*J,(b+1)*J)
    eyeb = jnp.eye(Bblk, dtype=f32)
    p_all = jnp.kron(eyeb, jnp.ones((1, J), f32))                     # (Bblk, ncols)
    p_e0n = -jnp.kron(eyeb, jnp.zeros((1, J), f32).at[0, 0].set(1.0))
    p_e2n = -jnp.kron(eyeb, jnp.zeros((1, J), f32).at[0, J - 2].set(1.0))

    # per-column edge masks (frame slot J-1 of each block is the dummy frame)
    jj = jnp.arange(ncols) % J
    m_nf = (jj != 0).astype(f32)[None, :]
    m_nk = (jj != J - 2).astype(f32)[None, :]
    m_nl = (jj != J - 1).astype(f32)[None, :]

    # inverse NOLA envelope laid out as (hop, Bblk*J)
    env = jnp.zeros((T,), f32)
    win_sq = win * win
    for m in range(Tf):
        env = env.at[m * hop:m * hop + n_fft].add(win_sq)
    inv_env = jnp.where(env > 1e-8, 1.0 / env, 1.0)
    inv_env2t = jnp.tile(inv_env.reshape(J, hop).T, (1, Bblk))        # (hop, ncols)

    def rb(b):                                     # per-channel bias -> (C*F, 1)
        return jnp.repeat(b, F)[:, None]

    return {
        "embed": params["embed"],
        "wre_a": wre[:, :hop].astype(bf16), "wre_b": wre[:, hop:].astype(bf16),
        "wim_a": wim[:, :hop].astype(bf16), "wim_b": wim[:, hop:].astype(bf16),
        "enc_mm": enc_mm.astype(bf16),
        "enc_ms": jnp.sum(enc_me, axis=0).astype(bf16),
        "enc_m0": enc_me[0].astype(bf16), "enc_m2": enc_me[2].astype(bf16),
        "enc_b": rb(params["enc_b"]),
        "bot_m": bot_m.astype(bf16), "bot_b": rb(params["bot_b"]),
        "dec_mm": dec_mm.astype(bf16),
        "dec_ms": jnp.sum(dec_me, axis=0).astype(bf16),
        "dec_m0": dec_me[0].astype(bf16), "dec_m2": dec_me[2].astype(bf16),
        "dec_b": rb(params["dec_b"]),
        "wit_re": wit_re.astype(bf16), "wit_im": wit_im.astype(bf16),
        "wib_re": wib_re.astype(bf16), "wib_im": wib_im.astype(bf16),
        "p_all": p_all.astype(bf16), "p_e0n": p_e0n.astype(bf16),
        "p_e2n": p_e2n.astype(bf16),
        "m_nf": m_nf, "m_nk": m_nk, "m_nl": m_nl,
        "inv_env": inv_env2t,
        "fin": jnp.array([params["fin_w"][0, 0, 0, 0], params["fin_b"][0]], f32),
    }


# ----------------------------------------------------------------------------
# Forward
# ----------------------------------------------------------------------------
def vocomorph_forward(packed, effect_id, x_wave, config=CONFIG):
    """effect_id: (B, 1) int32, x_wave: (B, 1, T) float32 -> (B, 1, T) float32."""
    n_fft = config["module_stft"]["n_fft"]
    hop = config["module_stft"]["hop_length"]
    e_dim = config["effect_dim"]
    B, _, T = x_wave.shape
    F = n_fft // 2 + 1
    J = T // hop
    Bblk = _choose_bblk(B, J)
    G = B // Bblk
    ncols = Bblk * J
    assert packed["inv_env"].shape == (hop, ncols), "pack_params/forward Bblk mismatch"

    # ---- input relayout (no duplicated samples): (B,1,T) -> (G, hop, Bblk*J) ----
    x = x_wave[:, 0, :].reshape(B, J, hop).transpose(0, 2, 1)        # (B, hop, J)
    x = x.reshape(G, Bblk, hop, J).transpose(0, 2, 1, 3).reshape(G, hop, ncols)

    # ---- effect embedding -> channel-major (E*F) rows, one column per batch ----
    embed = packed["embed"][effect_id[:, 0]]                          # (B, E)
    eff_rows = jnp.repeat(embed, F, axis=1)                           # (B, E*F)
    eff = eff_rows.reshape(G, Bblk, e_dim * F).transpose(0, 2, 1)     # (G, E*F, Bblk)
    eff = eff.astype(jnp.bfloat16)

    weights = [packed[name] for name in _WEIGHT_KEYS]

    out = pl.pallas_call(
        _vocomorph_kernel,
        out_shape=jax.ShapeDtypeStruct((G, hop, ncols), jnp.float32),
        grid=(G,),
        in_specs=(
            [pl.BlockSpec((1, hop, ncols), lambda g: (g, 0, 0)),
             pl.BlockSpec((1, e_dim * F, Bblk), lambda g: (g, 0, 0))]
            + [_full_spec(w) for w in weights]
            + [pl.BlockSpec(memory_space=pltpu.MemorySpace.SMEM)]     # fin scalars
        ),
        out_specs=pl.BlockSpec((1, hop, ncols), lambda g: (g, 0, 0)),
        compiler_params=pltpu.CompilerParams(
            dimension_semantics=("parallel",),
            vmem_limit_bytes=32 * 1024 * 1024,     # safe on v5e/v6e/v7x
        ),
    )(x, eff, *weights, packed["fin"])

    # (G, hop, Bblk*J) -> (B, 1, T)
    y = out.reshape(G, hop, Bblk, J).transpose(0, 2, 3, 1).reshape(B, T)
    return y[:, None, :]


# ----------------------------------------------------------------------------
# Main
# ----------------------------------------------------------------------------
if __name__ == "__main__":
    params = init_params(CONFIG, jax.random.PRNGKey(42))

    key = jax.random.PRNGKey(0)
    k_wave, _ = jax.random.split(key)
    B, T = 2, 128
    effect_id = jnp.array([[1], [3]], dtype=jnp.int32)            # (B, 1)
    x_wave = jax.random.normal(k_wave, (B, 1, T), jnp.float32)    # (B, 1, T)

    packed = pack_params(params, CONFIG, T, B)
    fwd = jax.jit(functools.partial(vocomorph_forward, config=CONFIG))
    out = fwd(packed, effect_id, x_wave)
    jax.block_until_ready(out)
    assert out.shape == (B, 1, T), out.shape
    print("KERNEL_OK")
</pallas_src>

<mosaic_0001>
module attributes {stable_mosaic.version = 11 : i64} {
  func.func @_vocomorph_kernel(%arg0: i32, %arg1: memref<1x8x32xf32, #tpu.memory_space<vmem>>, %arg2: memref<1x72x2xbf16, #tpu.memory_space<vmem>>, %arg3: memref<9x8xbf16, #tpu.memory_space<vmem>>, %arg4: memref<9x8xbf16, #tpu.memory_space<vmem>>, %arg5: memref<9x8xbf16, #tpu.memory_space<vmem>>, %arg6: memref<9x8xbf16, #tpu.memory_space<vmem>>, %arg7: memref<3x144x9xbf16, #tpu.memory_space<vmem>>, %arg8: memref<144x72xbf16, #tpu.memory_space<vmem>>, %arg9: memref<144x72xbf16, #tpu.memory_space<vmem>>, %arg10: memref<144x72xbf16, #tpu.memory_space<vmem>>, %arg11: memref<144x1xf32, #tpu.memory_space<vmem>>, %arg12: memref<3x144x144xbf16, #tpu.memory_space<vmem>>, %arg13: memref<144x1xf32, #tpu.memory_space<vmem>>, %arg14: memref<3x9x144xbf16, #tpu.memory_space<vmem>>, %arg15: memref<9x72xbf16, #tpu.memory_space<vmem>>, %arg16: memref<9x72xbf16, #tpu.memory_space<vmem>>, %arg17: memref<9x72xbf16, #tpu.memory_space<vmem>>, %arg18: memref<9x1xf32, #tpu.memory_space<vmem>>, %arg19: memref<8x9xbf16, #tpu.memory_space<vmem>>, %arg20: memref<8x9xbf16, #tpu.memory_space<vmem>>, %arg21: memref<8x9xbf16, #tpu.memory_space<vmem>>, %arg22: memref<8x9xbf16, #tpu.memory_space<vmem>>, %arg23: memref<2x32xbf16, #tpu.memory_space<vmem>>, %arg24: memref<2x32xbf16, #tpu.memory_space<vmem>>, %arg25: memref<2x32xbf16, #tpu.memory_space<vmem>>, %arg26: memref<1x32xf32, #tpu.memory_space<vmem>>, %arg27: memref<1x32xf32, #tpu.memory_space<vmem>>, %arg28: memref<1x32xf32, #tpu.memory_space<vmem>>, %arg29: memref<8x32xf32, #tpu.memory_space<vmem>>, %arg30: memref<2xf32, #tpu.memory_space<smem>>, %arg31: memref<1x8x32xf32, #tpu.memory_space<vmem>>) attributes {dimension_semantics = [#tpu.dimension_semantics<parallel>], iteration_bounds = array<i64: 1>, scalar_prefetch = 0 : i64, scratch_operands = 0 : i64, tpu.core_type = #tpu.core_type<tc>, window_params = [{transform_indices = @transform_0, window_bounds = array<i64: 1, 8, 32>}, {transform_indices = @transform_1, window_bounds = array<i64: 1, 72, 2>}, {pipeline_mode = #tpu.pipeline_mode<synchronous>, transform_indices = @transform_2, window_bounds = array<i64: 9, 8>}, {pipeline_mode = #tpu.pipeline_mode<synchronous>, transform_indices = @transform_3, window_bounds = array<i64: 9, 8>}, {pipeline_mode = #tpu.pipeline_mode<synchronous>, transform_indices = @transform_4, window_bounds = array<i64: 9, 8>}, {pipeline_mode = #tpu.pipeline_mode<synchronous>, transform_indices = @transform_5, window_bounds = array<i64: 9, 8>}, {pipeline_mode = #tpu.pipeline_mode<synchronous>, transform_indices = @transform_6, window_bounds = array<i64: 3, 144, 9>}, {pipeline_mode = #tpu.pipeline_mode<synchronous>, transform_indices = @transform_7, window_bounds = array<i64: 144, 72>}, {pipeline_mode = #tpu.pipeline_mode<synchronous>, transform_indices = @transform_8, window_bounds = array<i64: 144, 72>}, {pipeline_mode = #tpu.pipeline_mode<synchronous>, transform_indices = @transform_9, window_bounds = array<i64: 144, 72>}, {pipeline_mode = #tpu.pipeline_mode<synchronous>, transform_indices = @transform_10, window_bounds = array<i64: 144, 1>}, {pipeline_mode = #tpu.pipeline_mode<synchronous>, transform_indices = @transform_11, window_bounds = array<i64: 3, 144, 144>}, {pipeline_mode = #tpu.pipeline_mode<synchronous>, transform_indices = @transform_12, window_bounds = array<i64: 144, 1>}, {pipeline_mode = #tpu.pipeline_mode<synchronous>, transform_indices = @transform_13, window_bounds = array<i64: 3, 9, 144>}, {pipeline_mode = #tpu.pipeline_mode<synchronous>, transform_indices = @transform_14, window_bounds = array<i64: 9, 72>}, {pipeline_mode = #tpu.pipeline_mode<synchronous>, transform_indices = @transform_15, window_bounds = array<i64: 9, 72>}, {pipeline_mode = #tpu.pipeline_mode<synchronous>, transform_indices = @transform_16, window_bounds = array<i64: 9, 72>}, {pipeline_mode = #tpu.pipeline_mode<synchronous>, transform_indices = @transform_17, window_bounds = array<i64: 9, 1>}, {pipeline_mode = #tpu.pipeline_mode<synchronous>, transform_indices = @transform_18, window_bounds = array<i64: 8, 9>}, {pipeline_mode = #tpu.pipeline_mode<synchronous>, transform_indices = @transform_19, window_bounds = array<i64: 8, 9>}, {pipeline_mode = #tpu.pipeline_mode<synchronous>, transform_indices = @transform_20, window_bounds = array<i64: 8, 9>}, {pipeline_mode = #tpu.pipeline_mode<synchronous>, transform_indices = @transform_21, window_bounds = array<i64: 8, 9>}, {pipeline_mode = #tpu.pipeline_mode<synchronous>, transform_indices = @transform_22, window_bounds = array<i64: 2, 32>}, {pipeline_mode = #tpu.pipeline_mode<synchronous>, transform_indices = @transform_23, window_bounds = array<i64: 2, 32>}, {pipeline_mode = #tpu.pipeline_mode<synchronous>, transform_indices = @transform_24, window_bounds = array<i64: 2, 32>}, {pipeline_mode = #tpu.pipeline_mode<synchronous>, transform_indices = @transform_25, window_bounds = array<i64: 1, 32>}, {pipeline_mode = #tpu.pipeline_mode<synchronous>, transform_indices = @transform_26, window_bounds = array<i64: 1, 32>}, {pipeline_mode = #tpu.pipeline_mode<synchronous>, transform_indices = @transform_27, window_bounds = array<i64: 1, 32>}, {pipeline_mode = #tpu.pipeline_mode<synchronous>, transform_indices = @transform_28, window_bounds = array<i64: 8, 32>}, {transform_indices = @transform_29, window_bounds = array<i64: 2>}, {transform_indices = @transform_30, window_bounds = array<i64: 1, 8, 32>}]} {
    %c0 = arith.constant 0 : index
    %c0_0 = arith.constant 0 : index
    %0 = vector.load %arg26[%c0, %c0_0] : memref<1x32xf32, #tpu.memory_space<vmem>>, vector<1x32xf32>
    %c0_1 = arith.constant 0 : index
    %c0_2 = arith.constant 0 : index
    %1 = vector.load %arg27[%c0_1, %c0_2] : memref<1x32xf32, #tpu.memory_space<vmem>>, vector<1x32xf32>
    %c0_3 = arith.constant 0 : index
    %c0_4 = arith.constant 0 : index
    %2 = vector.load %arg28[%c0_3, %c0_4] : memref<1x32xf32, #tpu.memory_space<vmem>>, vector<1x32xf32>
    %c0_5 = arith.constant 0 : index
    %c0_6 = arith.constant 0 : index
    %c0_7 = arith.constant 0 : index
    %3 = vector.load %arg1[%c0_5, %c0_6, %c0_7] : memref<1x8x32xf32, #tpu.memory_space<vmem>>, vector<1x8x32xf32>
    %4 = vector.shape_cast %3 : vector<1x8x32xf32> to vector<8x32xf32>
    %c31_i32 = arith.constant 31 : i32
    %5 = tpu.dynamic_rotate %4 by %c31_i32 dim 1 : vector<8x32xf32>, i32 -> vector<8x32xf32>
    %6 = arith.truncf %4 : vector<8x32xf32> to vector<8x32xbf16>
    %7 = arith.truncf %5 : vector<8x32xf32> to vector<8x32xbf16>
    %c0_8 = arith.constant 0 : index
    %c0_9 = arith.constant 0 : index
    %8 = vector.load %arg3[%c0_8, %c0_9] : memref<9x8xbf16, #tpu.memory_space<vmem>>, vector<9x8xbf16>
    %cst = arith.constant dense<0.000000e+00> : vector<9x32xf32>
    %9 = tpu.matmul %8, %6, %cst {dimension_numbers = #tpu.dot_dimension_numbers<[1], [0], [0], [1], [0, 0, 1, 1], [], []>} : vector<9x8xbf16>, vector<8x32xbf16>, vector<9x32xf32> -> vector<9x32xf32>
    %c0_10 = arith.constant 0 : index
    %c0_11 = arith.constant 0 : index
    %10 = vector.load %arg4[%c0_10, %c0_11] : memref<9x8xbf16, #tpu.memory_space<vmem>>, vector<9x8xbf16>
    %cst_12 = arith.constant dense<0.000000e+00> : vector<9x32xf32>
    %11 = tpu.matmul %10, %7, %cst_12 {dimension_numbers = #tpu.dot_dimension_numbers<[1], [0], [0], [1], [0, 0, 1, 1], [], []>} : vector<9x8xbf16>, vector<8x32xbf16>, vector<9x32xf32> -> vector<9x32xf32>
    %12 = arith.addf %9, %11 : vector<9x32xf32>
    %c0_13 = arith.constant 0 : index
    %c0_14 = arith.constant 0 : index
    %13 = vector.load %arg5[%c0_13, %c0_14] : memref<9x8xbf16, #tpu.memory_space<vmem>>, vector<9x8xbf16>
    %cst_15 = arith.constant dense<0.000000e+00> : vector<9x32xf32>
    %14 = tpu.matmul %13, %6, %cst_15 {dimension_numbers = #tpu.dot_dimension_numbers<[1], [0], [0], [1], [0, 0, 1, 1], [], []>} : vector<9x8xbf16>, vector<8x32xbf16>, vector<9x32xf32> -> vector<9x32xf32>
    %c0_16 = arith.constant 0 : index
    %c0_17 = arith.constant 0 : index
    %15 = vector.load %arg6[%c0_16, %c0_17] : memref<9x8xbf16, #tpu.memory_space<vmem>>, vector<9x8xbf16>
    %cst_18 = arith.constant dense<0.000000e+00> : vector<9x32xf32>
    %16 = tpu.matmul %15, %7, %cst_18 {dimension_numbers = #tpu.dot_dimension_numbers<[1], [0], [0], [1], [0, 0, 1, 1], [], []>} : vector<9x8xbf16>, vector<8x32xbf16>, vector<9x32xf32> -> vector<9x32xf32>
    %17 = arith.addf %14, %16 : vector<9x32xf32>
    %18 = arith.mulf %12, %12 : vector<9x32xf32>
    %19 = arith.mulf %17, %17 : vector<9x32xf32>
    %20 = arith.addf %18, %19 : vector<9x32xf32>
    %cst_19 = arith.constant 1.000000e-30 : f32
    %21 = vector.broadcast %cst_19 : f32 to vector<9x32xf32>
    %22 = arith.maximumf %20, %21 : vector<9x32xf32>
    %23 = math.rsqrt %22 : vector<9x32xf32>
    %24 = arith.mulf %20, %23 : vector<9x32xf32>
    %cst_20 = arith.constant 0.000000e+00 : f32
    %25 = vector.broadcast %cst_20 : f32 to vector<9x32xf32>
    %26 = arith.cmpf ogt, %20, %25 : vector<9x32xf32>
    %27 = arith.mulf %12, %23 : vector<9x32xf32>
    %cst_21 = arith.constant 1.000000e+00 : f32
    %28 = vector.broadcast %cst_21 : f32 to vector<9x32xf32>
    %29 = arith.select %26, %27, %28 : vector<9x32xi1>, vector<9x32xf32>
    %30 = arith.mulf %17, %23 : vector<9x32xf32>
    %cst_22 = arith.constant 0.000000e+00 : f32
    %31 = vector.broadcast %cst_22 : f32 to vector<9x32xf32>
    %32 = arith.select %26, %30, %31 : vector<9x32xi1>, vector<9x32xf32>
    %c0_23 = arith.constant 0 : index
    %c0_24 = arith.constant 0 : index
    %c0_25 = arith.constant 0 : index
    %33 = vector.load %arg2[%c0_23, %c0_24, %c0_25] : memref<1x72x2xbf16, #tpu.memory_space<vmem>>, vector<1x72x2xbf16>
    %34 = vector.shape_cast %33 : vector<1x72x2xbf16> to vector<72x2xbf16>
    %c1_i32 = arith.constant 1 : i32
    %35 = tpu.dynamic_rotate %24 by %c1_i32 dim 1 : vector<9x32xf32>, i32 -> vector<9x32xf32>
    %36 = vector.broadcast %0 : vector<1x32xf32> to vector<9x32xf32>
    %37 = arith.mulf %35, %36 : vector<9x32xf32>
    %c31_i32_26 = arith.constant 31 : i32
    %38 = tpu.dynamic_rotate %24 by %c31_i32_26 dim 1 : vector<9x32xf32>, i32 -> vector<9x32xf32>
    %39 = vector.broadcast %1 : vector<1x32xf32> to vector<9x32xf32>
    %40 = arith.mulf %38, %39 : vector<9x32xf32>
    %c0_27 = arith.constant 0 : index
    %c0_28 = arith.constant 0 : index
    %c0_29 = arith.constant 0 : index
    %41 = vector.load %arg7[%c0_27, %c0_28, %c0_29] : memref<3x144x9xbf16, #tpu.memory_space<vmem>>, vector<1x144x9xbf16>
    %42 = vector.shape_cast %41 : vector<1x144x9xbf16> to vector<144x9xbf16>
    %43 = arith.truncf %37 : vector<9x32xf32> to vector<9x32xbf16>
    %cst_30 = arith.constant dense<0.000000e+00> : vector<144x32xf32>
    %44 = tpu.matmul %42, %43, %cst_30 {dimension_numbers = #tpu.dot_dimension_numbers<[1], [0], [0], [1], [0, 0, 1, 1], [], []>} : vector<144x9xbf16>, vector<9x32xbf16>, vector<144x32xf32> -> vector<144x32xf32>
    %c1 = arith.constant 1 : index
    %c0_31 = arith.constant 0 : index
    %c0_32 = arith.constant 0 : index
    %45 = vector.load %arg7[%c1, %c0_31, %c0_32] : memref<3x144x9xbf16, #tpu.memory_space<vmem>>, vector<1x144x9xbf16>
    %46 = vector.shape_cast %45 : vector<1x144x9xbf16> to vector<144x9xbf16>
    %47 = arith.truncf %24 : vector<9x32xf32> to vector<9x32xbf16>
    %cst_33 = arith.constant dense<0.000000e+00> : vector<144x32xf32>
    %48 = tpu.matmul %46, %47, %cst_33 {dimension_numbers = #tpu.dot_dimension_numbers<[1], [0], [0], [1], [0, 0, 1, 1], [], []>} : vector<144x9xbf16>, vector<9x32xbf16>, vector<144x32xf32> -> vector<144x32xf32>
    %49 = arith.addf %44, %48 : vector<144x32xf32>
    %c2 = arith.constant 2 : index
    %c0_34 = arith.constant 0 : index
    %c0_35 = arith.constant 0 : index
    %50 = vector.load %arg7[%c2, %c0_34, %c0_35] : memref<3x144x9xbf16, #tpu.memory_space<vmem>>, vector<1x144x9xbf16>
    %51 = vector.shape_cast %50 : vector<1x144x9xbf16> to vector<144x9xbf16>
    %52 = arith.truncf %40 : vector<9x32xf32> to vector<9x32xbf16>
    %cst_36 = arith.constant dense<0.000000e+00> : vector<144x32xf32>
    %53 = tpu.matmul %51, %52, %cst_36 {dimension_numbers = #tpu.dot_dimension_numbers<[1], [0], [0], [1], [0, 0, 1, 1], [], []>} : vector<144x9xbf16>, vector<9x32xbf16>, vector<144x32xf32> -> vector<144x32xf32>
    %54 = arith.addf %49, %53 : vector<144x32xf32>
    %c0_37 = arith.constant 0 : index
    %c0_38 = arith.constant 0 : index
    %55 = vector.load %arg8[%c0_37, %c0_38] : memref<144x72xbf16, #tpu.memory_space<vmem>>, vector<144x72xbf16>
    %cst_39 = arith.constant dense<0.000000e+00> : vector<144x2xf32>
    %56 = tpu.matmul %55, %34, %cst_39 {dimension_numbers = #tpu.dot_dimension_numbers<[1], [0], [0], [1], [0, 0, 1, 1], [], []>} : vector<144x72xbf16>, vector<72x2xbf16>, vector<144x2xf32> -> vector<144x2xf32>
    %57 = arith.truncf %56 : vector<144x2xf32> to vector<144x2xbf16>
    %c0_40 = arith.constant 0 : index
    %c0_41 = arith.constant 0 : index
    %58 = vector.load %arg9[%c0_40, %c0_41] : memref<144x72xbf16, #tpu.memory_space<vmem>>, vector<144x72xbf16>
    %cst_42 = arith.constant dense<0.000000e+00> : vector<144x2xf32>
    %59 = tpu.matmul %58, %34, %cst_42 {dimension_numbers = #tpu.dot_dimension_numbers<[1], [0], [0], [1], [0, 0, 1, 1], [], []>} : vector<144x72xbf16>, vector<72x2xbf16>, vector<144x2xf32> -> vector<144x2xf32>
    %60 = arith.truncf %59 : vector<144x2xf32> to vector<144x2xbf16>
    %c0_43 = arith.constant 0 : index
    %c0_44 = arith.constant 0 : index
    %61 = vector.load %arg10[%c0_43, %c0_44] : memref<144x72xbf16, #tpu.memory_space<vmem>>, vector<144x72xbf16>
    %cst_45 = arith.constant dense<0.000000e+00> : vector<144x2xf32>
    %62 = tpu.matmul %61, %34, %cst_45 {dimension_numbers = #tpu.dot_dimension_numbers<[1], [0], [0], [1], [0, 0, 1, 1], [], []>} : vector<144x72xbf16>, vector<72x2xbf16>, vector<144x2xf32> -> vector<144x2xf32>
    %63 = arith.truncf %62 : vector<144x2xf32> to vector<144x2xbf16>
    %c0_46 = arith.constant 0 : index
    %c0_47 = arith.constant 0 : index
    %64 = vector.load %arg23[%c0_46, %c0_47] : memref<2x32xbf16, #tpu.memory_space<vmem>>, vector<2x32xbf16>
    %cst_48 = arith.constant dense<0.000000e+00> : vector<144x32xf32>
    %65 = tpu.matmul %57, %64, %cst_48 {dimension_numbers = #tpu.dot_dimension_numbers<[1], [0], [0], [1], [0, 0, 1, 1], [], []>} : vector<144x2xbf16>, vector<2x32xbf16>, vector<144x32xf32> -> vector<144x32xf32>
    %c0_49 = arith.constant 0 : index
    %c0_50 = arith.constant 0 : index
    %66 = vector.load %arg24[%c0_49, %c0_50] : memref<2x32xbf16, #tpu.memory_space<vmem>>, vector<2x32xbf16>
    %cst_51 = arith.constant dense<0.000000e+00> : vector<144x32xf32>
    %67 = tpu.matmul %60, %66, %cst_51 {dimension_numbers = #tpu.dot_dimension_numbers<[1], [0], [0], [1], [0, 0, 1, 1], [], []>} : vector<144x2xbf16>, vector<2x32xbf16>, vector<144x32xf32> -> vector<144x32xf32>
    %68 = arith.addf %65, %67 : vector<144x32xf32>
    %c0_52 = arith.constant 0 : index
    %c0_53 = arith.constant 0 : index
    %69 = vector.load %arg25[%c0_52, %c0_53] : memref<2x32xbf16, #tpu.memory_space<vmem>>, vector<2x32xbf16>
    %cst_54 = arith.constant dense<0.000000e+00> : vector<144x32xf32>
    %70 = tpu.matmul %63, %69, %cst_54 {dimension_numbers = #tpu.dot_dimension_numbers<[1], [0], [0], [1], [0, 0, 1, 1], [], []>} : vector<144x2xbf16>, vector<2x32xbf16>, vector<144x32xf32> -> vector<144x32xf32>
    %71 = arith.addf %68, %70 : vector<144x32xf32>
    %72 = arith.addf %54, %71 : vector<144x32xf32>
    %c0_55 = arith.constant 0 : index
    %c0_56 = arith.constant 0 : index
    %73 = vector.load %arg11[%c0_55, %c0_56] : memref<144x1xf32, #tpu.memory_space<vmem>>, vector<144x1xf32>
    %74 = vector.broadcast %73 : vector<144x1xf32> to vector<144x32xf32>
    %75 = arith.addf %72, %74 : vector<144x32xf32>
    %cst_57 = arith.constant 0.000000e+00 : f32
    %76 = vector.broadcast %cst_57 : f32 to vector<144x32xf32>
    %77 = arith.maximumf %75, %76 : vector<144x32xf32>
    %c1_i32_58 = arith.constant 1 : i32
    %78 = tpu.dynamic_rotate %77 by %c1_i32_58 dim 1 : vector<144x32xf32>, i32 -> vector<144x32xf32>
    %79 = vector.broadcast %0 : vector<1x32xf32> to vector<144x32xf32>
    %80 = arith.mulf %78, %79 : vector<144x32xf32>
    %c31_i32_59 = arith.constant 31 : i32
    %81 = tpu.dynamic_rotate %77 by %c31_i32_59 dim 1 : vector<144x32xf32>, i32 -> vector<144x32xf32>
    %82 = vector.broadcast %1 : vector<1x32xf32> to vector<144x32xf32>
    %83 = arith.mulf %81, %82 : vector<144x32xf32>
    %c0_60 = arith.constant 0 : index
    %c0_61 = arith.constant 0 : index
    %c0_62 = arith.constant 0 : index
    %84 = vector.load %arg12[%c0_60, %c0_61, %c0_62] : memref<3x144x144xbf16, #tpu.memory_space<vmem>>, vector<1x144x144xbf16>
    %85 = vector.shape_cast %84 : vector<1x144x144xbf16> to vector<144x144xbf16>
    %86 = arith.truncf %80 : vector<144x32xf32> to vector<144x32xbf16>
    %cst_63 = arith.constant dense<0.000000e+00> : vector<144x32xf32>
    %87 = tpu.matmul %85, %86, %cst_63 {dimension_numbers = #tpu.dot_dimension_numbers<[1], [0], [0], [1], [0, 0, 1, 1], [], []>} : vector<144x144xbf16>, vector<144x32xbf16>, vector<144x32xf32> -> vector<144x32xf32>
    %c1_64 = arith.constant 1 : index
    %c0_65 = arith.constant 0 : index
    %c0_66 = arith.constant 0 : index
    %88 = vector.load %arg12[%c1_64, %c0_65, %c0_66] : memref<3x144x144xbf16, #tpu.memory_space<vmem>>, vector<1x144x144xbf16>
    %89 = vector.shape_cast %88 : vector<1x144x144xbf16> to vector<144x144xbf16>
    %90 = arith.truncf %77 : vector<144x32xf32> to vector<144x32xbf16>
    %cst_67 = arith.constant dense<0.000000e+00> : vector<144x32xf32>
    %91 = tpu.matmul %89, %90, %cst_67 {dimension_numbers = #tpu.dot_dimension_numbers<[1], [0], [0], [1], [0, 0, 1, 1], [], []>} : vector<144x144xbf16>, vector<144x32xbf16>, vector<144x32xf32> -> vector<144x32xf32>
    %92 = arith.addf %87, %91 : vector<144x32xf32>
    %c2_68 = arith.constant 2 : index
    %c0_69 = arith.constant 0 : index
    %c0_70 = arith.constant 0 : index
    %93 = vector.load %arg12[%c2_68, %c0_69, %c0_70] : memref<3x144x144xbf16, #tpu.memory_space<vmem>>, vector<1x144x144xbf16>
    %94 = vector.shape_cast %93 : vector<1x144x144xbf16> to vector<144x144xbf16>
    %95 = arith.truncf %83 : vector<144x32xf32> to vector<144x32xbf16>
    %cst_71 = arith.constant dense<0.000000e+00> : vector<144x32xf32>
    %96 = tpu.matmul %94, %95, %cst_71 {dimension_numbers = #tpu.dot_dimension_numbers<[1], [0], [0], [1], [0, 0, 1, 1], [], []>} : vector<144x144xbf16>, vector<144x32xbf16>, vector<144x32xf32> -> vector<144x32xf32>
    %97 = arith.addf %92, %96 : vector<144x32xf32>
    %c0_72 = arith.constant 0 : index
    %c0_73 = arith.constant 0 : index
    %98 = vector.load %arg13[%c0_72, %c0_73] : memref<144x1xf32, #tpu.memory_space<vmem>>, vector<144x1xf32>
    %99 = vector.broadcast %98 : vector<144x1xf32> to vector<144x32xf32>
    %100 = arith.addf %97, %99 : vector<144x32xf32>
    %cst_74 = arith.constant 0.000000e+00 : f32
    %101 = vector.broadcast %cst_74 : f32 to vector<144x32xf32>
    %102 = arith.maximumf %100, %101 : vector<144x32xf32>
    %c1_i32_75 = arith.constant 1 : i32
    %103 = tpu.dynamic_rotate %102 by %c1_i32_75 dim 1 : vector<144x32xf32>, i32 -> vector<144x32xf32>
    %104 = vector.broadcast %0 : vector<1x32xf32> to vector<144x32xf32>
    %105 = arith.mulf %103, %104 : vector<144x32xf32>
    %c31_i32_76 = arith.constant 31 : i32
    %106 = tpu.dynamic_rotate %102 by %c31_i32_76 dim 1 : vector<144x32xf32>, i32 -> vector<144x32xf32>
    %107 = vector.broadcast %1 : vector<1x32xf32> to vector<144x32xf32>
    %108 = arith.mulf %106, %107 : vector<144x32xf32>
    %c0_77 = arith.constant 0 : index
    %c0_78 = arith.constant 0 : index
    %c0_79 = arith.constant 0 : index
    %109 = vector.load %arg14[%c0_77, %c0_78, %c0_79] : memref<3x9x144xbf16, #tpu.memory_space<vmem>>, vector<1x9x144xbf16>
    %110 = vector.shape_cast %109 : vector<1x9x144xbf16> to vector<9x144xbf16>
    %111 = arith.truncf %105 : vector<144x32xf32> to vector<144x32xbf16>
    %cst_80 = arith.constant dense<0.000000e+00> : vector<9x32xf32>
    %112 = tpu.matmul %110, %111, %cst_80 {dimension_numbers = #tpu.dot_dimension_numbers<[1], [0], [0], [1], [0, 0, 1, 1], [], []>} : vector<9x144xbf16>, vector<144x32xbf16>, vector<9x32xf32> -> vector<9x32xf32>
    %c1_81 = arith.constant 1 : index
    %c0_82 = arith.constant 0 : index
    %c0_83 = arith.constant 0 : index
    %113 = vector.load %arg14[%c1_81, %c0_82, %c0_83] : memref<3x9x144xbf16, #tpu.memory_space<vmem>>, vector<1x9x144xbf16>
    %114 = vector.shape_cast %113 : vector<1x9x144xbf16> to vector<9x144xbf16>
    %115 = arith.truncf %102 : vector<144x32xf32> to vector<144x32xbf16>
    %cst_84 = arith.constant dense<0.000000e+00> : vector<9x32xf32>
    %116 = tpu.matmul %114, %115, %cst_84 {dimension_numbers = #tpu.dot_dimension_numbers<[1], [0], [0], [1], [0, 0, 1, 1], [], []>} : vector<9x144xbf16>, vector<144x32xbf16>, vector<9x32xf32> -> vector<9x32xf32>
    %117 = arith.addf %112, %116 : vector<9x32xf32>
    %c2_85 = arith.constant 2 : index
    %c0_86 = arith.constant 0 : index
    %c0_87 = arith.constant 0 : index
    %118 = vector.load %arg14[%c2_85, %c0_86, %c0_87] : memref<3x9x144xbf16, #tpu.memory_space<vmem>>, vector<1x9x144xbf16>
    %119 = vector.shape_cast %118 : vector<1x9x144xbf16> to vector<9x144xbf16>
    %120 = arith.truncf %108 : vector<144x32xf32> to vector<144x32xbf16>
    %cst_88 = arith.constant dense<0.000000e+00> : vector<9x32xf32>
    %121 = tpu.matmul %119, %120, %cst_88 {dimension_numbers = #tpu.dot_dimension_numbers<[1], [0], [0], [1], [0, 0, 1, 1], [], []>} : vector<9x144xbf16>, vector<144x32xbf16>, vector<9x32xf32> -> vector<9x32xf32>
    %122 = arith.addf %117, %121 : vector<9x32xf32>
    %c0_89 = arith.constant 0 : index
    %c0_90 = arith.constant 0 : index
    %123 = vector.load %arg15[%c0_89, %c0_90] : memref<9x72xbf16, #tpu.memory_space<vmem>>, vector<9x72xbf16>
    %cst_91 = arith.constant dense<0.000000e+00> : vector<9x2xf32>
    %124 = tpu.matmul %123, %34, %cst_91 {dimension_numbers = #tpu.dot_dimension_numbers<[1], [0], [0], [1], [0, 0, 1, 1], [], []>} : vector<9x72xbf16>, vector<72x2xbf16>, vector<9x2xf32> -> vector<9x2xf32>
    %125 = arith.truncf %124 : vector<9x2xf32> to vector<9x2xbf16>
    %c0_92 = arith.constant 0 : index
    %c0_93 = arith.constant 0 : index
    %126 = vector.load %arg16[%c0_92, %c0_93] : memref<9x72xbf16, #tpu.memory_space<vmem>>, vector<9x72xbf16>
    %cst_94 = arith.constant dense<0.000000e+00> : vector<9x2xf32>
    %127 = tpu.matmul %126, %34, %cst_94 {dimension_numbers = #tpu.dot_dimension_numbers<[1], [0], [0], [1], [0, 0, 1, 1], [], []>} : vector<9x72xbf16>, vector<72x2xbf16>, vector<9x2xf32> -> vector<9x2xf32>
    %128 = arith.truncf %127 : vector<9x2xf32> to vector<9x2xbf16>
    %c0_95 = arith.constant 0 : index
    %c0_96 = arith.constant 0 : index
    %129 = vector.load %arg17[%c0_95, %c0_96] : memref<9x72xbf16, #tpu.memory_space<vmem>>, vector<9x72xbf16>
    %cst_97 = arith.constant dense<0.000000e+00> : vector<9x2xf32>
    %130 = tpu.matmul %129, %34, %cst_97 {dimension_numbers = #tpu.dot_dimension_numbers<[1], [0], [0], [1], [0, 0, 1, 1], [], []>} : vector<9x72xbf16>, vector<72x2xbf16>, vector<9x2xf32> -> vector<9x2xf32>
    %131 = arith.truncf %130 : vector<9x2xf32> to vector<9x2xbf16>
    %c0_98 = arith.constant 0 : index
    %c0_99 = arith.constant 0 : index
    %132 = vector.load %arg23[%c0_98, %c0_99] : memref<2x32xbf16, #tpu.memory_space<vmem>>, vector<2x32xbf16>
    %cst_100 = arith.constant dense<0.000000e+00> : vector<9x32xf32>
    %133 = tpu.matmul %125, %132, %cst_100 {dimension_numbers = #tpu.dot_dimension_numbers<[1], [0], [0], [1], [0, 0, 1, 1], [], []>} : vector<9x2xbf16>, vector<2x32xbf16>, vector<9x32xf32> -> vector<9x32xf32>
    %c0_101 = arith.constant 0 : index
    %c0_102 = arith.constant 0 : index
    %134 = vector.load %arg24[%c0_101, %c0_102] : memref<2x32xbf16, #tpu.memory_space<vmem>>, vector<2x32xbf16>
    %cst_103 = arith.constant dense<0.000000e+00> : vector<9x32xf32>
    %135 = tpu.matmul %128, %134, %cst_103 {dimension_numbers = #tpu.dot_dimension_numbers<[1], [0], [0], [1], [0, 0, 1, 1], [], []>} : vector<9x2xbf16>, vector<2x32xbf16>, vector<9x32xf32> -> vector<9x32xf32>
    %136 = arith.addf %133, %135 : vector<9x32xf32>
    %c0_104 = arith.constant 0 : index
    %c0_105 = arith.constant 0 : index
    %137 = vector.load %arg25[%c0_104, %c0_105] : memref<2x32xbf16, #tpu.memory_space<vmem>>, vector<2x32xbf16>
    %cst_106 = arith.constant dense<0.000000e+00> : vector<9x32xf32>
    %138 = tpu.matmul %131, %137, %cst_106 {dimension_numbers = #tpu.dot_dimension_numbers<[1], [0], [0], [1], [0, 0, 1, 1], [], []>} : vector<9x2xbf16>, vector<2x32xbf16>, vector<9x32xf32> -> vector<9x32xf32>
    %139 = arith.addf %136, %138 : vector<9x32xf32>
    %140 = arith.addf %122, %139 : vector<9x32xf32>
    %c0_107 = arith.constant 0 : index
    %c0_108 = arith.constant 0 : index
    %141 = vector.load %arg18[%c0_107, %c0_108] : memref<9x1xf32, #tpu.memory_space<vmem>>, vector<9x1xf32>
    %142 = vector.broadcast %141 : vector<9x1xf32> to vector<9x32xf32>
    %143 = arith.addf %140, %142 : vector<9x32xf32>
    %cst_109 = arith.constant 0.000000e+00 : f32
    %144 = vector.broadcast %cst_109 : f32 to vector<9x32xf32>
    %145 = arith.maximumf %143, %144 : vector<9x32xf32>
    %c0_110 = arith.constant 0 : index
    %146 = memref.load %arg30[%c0_110] : memref<2xf32, #tpu.memory_space<smem>>
    %147 = vector.broadcast %146 : f32 to vector<9x32xf32>
    %148 = arith.mulf %145, %147 : vector<9x32xf32>
    %c1_111 = arith.constant 1 : index
    %149 = memref.load %arg30[%c1_111] : memref<2xf32, #tpu.memory_space<smem>>
    %150 = vector.broadcast %149 : f32 to vector<9x32xf32>
    %151 = arith.addf %148, %150 : vector<9x32xf32>
    %152 = arith.mulf %151, %29 : vector<9x32xf32>
    %153 = arith.truncf %152 : vector<9x32xf32> to vector<9x32xbf16>
    %154 = arith.mulf %151, %32 : vector<9x32xf32>
    %155 = arith.truncf %154 : vector<9x32xf32> to vector<9x32xbf16>
    %c0_112 = arith.constant 0 : index
    %c0_113 = arith.constant 0 : index
    %156 = vector.load %arg19[%c0_112, %c0_113] : memref<8x9xbf16, #tpu.memory_space<vmem>>, vector<8x9xbf16>
    %cst_114 = arith.constant dense<0.000000e+00> : vector<8x32xf32>
    %157 = tpu.matmul %156, %153, %cst_114 {dimension_numbers = #tpu.dot_dimension_numbers<[1], [0], [0], [1], [0, 0, 1, 1], [], []>} : vector<8x9xbf16>, vector<9x32xbf16>, vector<8x32xf32> -> vector<8x32xf32>
    %c0_115 = arith.constant 0 : index
    %c0_116 = arith.constant 0 : index
    %158 = vector.load %arg20[%c0_115, %c0_116] : memref<8x9xbf16, #tpu.memory_space<vmem>>, vector<8x9xbf16>
    %cst_117 = arith.constant dense<0.000000e+00> : vector<8x32xf32>
    %159 = tpu.matmul %158, %155, %cst_117 {dimension_numbers = #tpu.dot_dimension_numbers<[1], [0], [0], [1], [0, 0, 1, 1], [], []>} : vector<8x9xbf16>, vector<9x32xbf16>, vector<8x32xf32> -> vector<8x32xf32>
    %160 = arith.addf %157, %159 : vector<8x32xf32>
    %c0_118 = arith.constant 0 : index
    %c0_119 = arith.constant 0 : index
    %161 = vector.load %arg21[%c0_118, %c0_119] : memref<8x9xbf16, #tpu.memory_space<vmem>>, vector<8x9xbf16>
    %cst_120 = arith.constant dense<0.000000e+00> : vector<8x32xf32>
    %162 = tpu.matmul %161, %153, %cst_120 {dimension_numbers = #tpu.dot_dimension_numbers<[1], [0], [0], [1], [0, 0, 1, 1], [], []>} : vector<8x9xbf16>, vector<9x32xbf16>, vector<8x32xf32> -> vector<8x32xf32>
    %c0_121 = arith.constant 0 : index
    %c0_122 = arith.constant 0 : index
    %163 = vector.load %arg22[%c0_121, %c0_122] : memref<8x9xbf16, #tpu.memory_space<vmem>>, vector<8x9xbf16>
    %cst_123 = arith.constant dense<0.000000e+00> : vector<8x32xf32>
    %164 = tpu.matmul %163, %155, %cst_123 {dimension_numbers = #tpu.dot_dimension_numbers<[1], [0], [0], [1], [0, 0, 1, 1], [], []>} : vector<8x9xbf16>, vector<9x32xbf16>, vector<8x32xf32> -> vector<8x32xf32>
    %165 = arith.addf %162, %164 : vector<8x32xf32>
    %166 = vector.broadcast %2 : vector<1x32xf32> to vector<8x32xf32>
    %167 = arith.mulf %160, %166 : vector<8x32xf32>
    %c1_i32_124 = arith.constant 1 : i32
    %168 = tpu.dynamic_rotate %165 by %c1_i32_124 dim 1 : vector<8x32xf32>, i32 -> vector<8x32xf32>
    %169 = vector.broadcast %0 : vector<1x32xf32> to vector<8x32xf32>
    %170 = arith.mulf %168, %169 : vector<8x32xf32>
    %171 = arith.addf %167, %170 : vector<8x32xf32>
    %c0_125 = arith.constant 0 : index
    %c0_126 = arith.constant 0 : index
    %172 = vector.load %arg29[%c0_125, %c0_126] : memref<8x32xf32, #tpu.memory_space<vmem>>, vector<8x32xf32>
    %173 = arith.mulf %171, %172 : vector<8x32xf32>
    %c0_127 = arith.constant 0 : index
    %c0_128 = arith.constant 0 : index
    %c0_129 = arith.constant 0 : index
    %174 = vector.load %arg31[%c0_127, %c0_128, %c0_129] : memref<1x8x32xf32, #tpu.memory_space<vmem>>, vector<1x8x32xf32>
    %175 = vector.shape_cast %174 : vector<1x8x32xf32> to vector<8x32xf32>
    %176 = vector.shape_cast %173 : vector<8x32xf32> to vector<1x8x32xf32>
    tpu.vector_store %arg31[%c0_127, %c0_128, %c0_129], %176 {strides = array<i32>} : memref<1x8x32xf32, #tpu.memory_space<vmem>>, vector<1x8x32xf32>,
    return
  }
  func.func @transform_0(%arg0: i32) -> (i32, i32, i32) {
    %c0_i32 = arith.constant 0 : i32
    %c0_i32_0 = arith.constant 0 : i32
    %c0_i32_1 = arith.constant 0 : i32
    return %arg0, %c0_i32, %c0_i32_0 : i32, i32, i32
  }
  func.func @transform_1(%arg0: i32) -> (i32, i32, i32) {
    %c0_i32 = arith.constant 0 : i32
    %c0_i32_0 = arith.constant 0 : i32
    %c0_i32_1 = arith.constant 0 : i32
    return %arg0, %c0_i32, %c0_i32_0 : i32, i32, i32
  }
  func.func @transform_2(%arg0: i32) -> (i32, i32) {
    %c0_i32 = arith.constant 0 : i32
    %c0_i32_0 = arith.constant 0 : i32
    %c0_i32_1 = arith.constant 0 : i32
    return %c0_i32, %c0_i32_0 : i32, i32
  }
  func.func @transform_3(%arg0: i32) -> (i32, i32) {
    %c0_i32 = arith.constant 0 : i32
    %c0_i32_0 = arith.constant 0 : i32
    %c0_i32_1 = arith.constant 0 : i32
    return %c0_i32, %c0_i32_0 : i32, i32
  }
  func.func @transform_4(%arg0: i32) -> (i32, i32) {
    %c0_i32 = arith.constant 0 : i32
    %c0_i32_0 = arith.constant 0 : i32
    %c0_i32_1 = arith.constant 0 : i32
    return %c0_i32, %c0_i32_0 : i32, i32
  }
  func.func @transform_5(%arg0: i32) -> (i32, i32) {
    %c0_i32 = arith.constant 0 : i32
    %c0_i32_0 = arith.constant 0 : i32
    %c0_i32_1 = arith.constant 0 : i32
    return %c0_i32, %c0_i32_0 : i32, i32
  }
  func.func @transform_6(%arg0: i32) -> (i32, i32, i32) {
    %c0_i32 = arith.constant 0 : i32
    %c0_i32_0 = arith.constant 0 : i32
    %c0_i32_1 = arith.constant 0 : i32
    %c0_i32_2 = arith.constant 0 : i32
    return %c0_i32, %c0_i32_0, %c0_i32_1 : i32, i32, i32
  }
  func.func @transform_7(%arg0: i32) -> (i32, i32) {
    %c0_i32 = arith.constant 0 : i32
    %c0_i32_0 = arith.constant 0 : i32
    %c0_i32_1 = arith.constant 0 : i32
    return %c0_i32, %c0_i32_0 : i32, i32
  }
  func.func @transform_8(%arg0: i32) -> (i32, i32) {
    %c0_i32 = arith.constant 0 : i32
    %c0_i32_0 = arith.constant 0 : i32
    %c0_i32_1 = arith.constant 0 : i32
    return %c0_i32, %c0_i32_0 : i32, i32
  }
  func.func @transform_9(%arg0: i32) -> (i32, i32) {
    %c0_i32 = arith.constant 0 : i32
    %c0_i32_0 = arith.constant 0 : i32
    %c0_i32_1 = arith.constant 0 : i32
    return %c0_i32, %c0_i32_0 : i32, i32
  }
  func.func @transform_10(%arg0: i32) -> (i32, i32) {
    %c0_i32 = arith.constant 0 : i32
    %c0_i32_0 = arith.constant 0 : i32
    %c0_i32_1 = arith.constant 0 : i32
    return %c0_i32, %c0_i32_0 : i32, i32
  }
  func.func @transform_11(%arg0: i32) -> (i32, i32, i32) {
    %c0_i32 = arith.constant 0 : i32
    %c0_i32_0 = arith.constant 0 : i32
    %c0_i32_1 = arith.constant 0 : i32
    %c0_i32_2 = arith.constant 0 : i32
    return %c0_i32, %c0_i32_0, %c0_i32_1 : i32, i32, i32
  }
  func.func @transform_12(%arg0: i32) -> (i32, i32) {
    %c0_i32 = arith.constant 0 : i32
    %c0_i32_0 = arith.constant 0 : i32
    %c0_i32_1 = arith.constant 0 : i32
    return %c0_i32, %c0_i32_0 : i32, i32
  }
  func.func @transform_13(%arg0: i32) -> (i32, i32, i32) {
    %c0_i32 = arith.constant 0 : i32
    %c0_i32_0 = arith.constant 0 : i32
    %c0_i32_1 = arith.constant 0 : i32
    %c0_i32_2 = arith.constant 0 : i32
    return %c0_i32, %c0_i32_0, %c0_i32_1 : i32, i32, i32
  }
  func.func @transform_14(%arg0: i32) -> (i32, i32) {
    %c0_i32 = arith.constant 0 : i32
    %c0_i32_0 = arith.constant 0 : i32
    %c0_i32_1 = arith.constant 0 : i32
    return %c0_i32, %c0_i32_0 : i32, i32
  }
  func.func @transform_15(%arg0: i32) -> (i32, i32) {
    %c0_i32 = arith.constant 0 : i32
    %c0_i32_0 = arith.constant 0 : i32
    %c0_i32_1 = arith.constant 0 : i32
    return %c0_i32, %c0_i32_0 : i32, i32
  }
  func.func @transform_16(%arg0: i32) -> (i32, i32) {
    %c0_i32 = arith.constant 0 : i32
    %c0_i32_0 = arith.constant 0 : i32
    %c0_i32_1 = arith.constant 0 : i32
    return %c0_i32, %c0_i32_0 : i32, i32
  }
  func.func @transform_17(%arg0: i32) -> (i32, i32) {
    %c0_i32 = arith.constant 0 : i32
    %c0_i32_0 = arith.constant 0 : i32
    %c0_i32_1 = arith.constant 0 : i32
    return %c0_i32, %c0_i32_0 : i32, i32
  }
  func.func @transform_18(%arg0: i32) -> (i32, i32) {
    %c0_i32 = arith.constant 0 : i32
    %c0_i32_0 = arith.constant 0 : i32
    %c0_i32_1 = arith.constant 0 : i32
    return %c0_i32, %c0_i32_0 : i32, i32
  }
  func.func @transform_19(%arg0: i32) -> (i32, i32) {
    %c0_i32 = arith.constant 0 : i32
    %c0_i32_0 = arith.constant 0 : i32
    %c0_i32_1 = arith.constant 0 : i32
    return %c0_i32, %c0_i32_0 : i32, i32
  }
  func.func @transform_20(%arg0: i32) -> (i32, i32) {
    %c0_i32 = arith.constant 0 : i32
    %c0_i32_0 = arith.constant 0 : i32
    %c0_i32_1 = arith.constant 0 : i32
    return %c0_i32, %c0_i32_0 : i32, i32
  }
  func.func @transform_21(%arg0: i32) -> (i32, i32) {
    %c0_i32 = arith.constant 0 : i32
    %c0_i32_0 = arith.constant 0 : i32
    %c0_i32_1 = arith.constant 0 : i32
    return %c0_i32, %c0_i32_0 : i32, i32
  }
  func.func @transform_22(%arg0: i32) -> (i32, i32) {
    %c0_i32 = arith.constant 0 : i32
    %c0_i32_0 = arith.constant 0 : i32
    %c0_i32_1 = arith.constant 0 : i32
    return %c0_i32, %c0_i32_0 : i32, i32
  }
  func.func @transform_23(%arg0: i32) -> (i32, i32) {
    %c0_i32 = arith.constant 0 : i32
    %c0_i32_0 = arith.constant 0 : i32
    %c0_i32_1 = arith.constant 0 : i32
    return %c0_i32, %c0_i32_0 : i32, i32
  }
  func.func @transform_24(%arg0: i32) -> (i32, i32) {
    %c0_i32 = arith.constant 0 : i32
    %c0_i32_0 = arith.constant 0 : i32
    %c0_i32_1 = arith.constant 0 : i32
    return %c0_i32, %c0_i32_0 : i32, i32
  }
  func.func @transform_25(%arg0: i32) -> (i32, i32) {
    %c0_i32 = arith.constant 0 : i32
    %c0_i32_0 = arith.constant 0 : i32
    %c0_i32_1 = arith.constant 0 : i32
    return %c0_i32, %c0_i32_0 : i32, i32
  }
  func.func @transform_26(%arg0: i32) -> (i32, i32) {
    %c0_i32 = arith.constant 0 : i32
    %c0_i32_0 = arith.constant 0 : i32
    %c0_i32_1 = arith.constant 0 : i32
    return %c0_i32, %c0_i32_0 : i32, i32
  }
  func.func @transform_27(%arg0: i32) -> (i32, i32) {
    %c0_i32 = arith.constant 0 : i32
    %c0_i32_0 = arith.constant 0 : i32
    %c0_i32_1 = arith.constant 0 : i32
    return %c0_i32, %c0_i32_0 : i32, i32
  }
  func.func @transform_28(%arg0: i32) -> (i32, i32) {
    %c0_i32 = arith.constant 0 : i32
    %c0_i32_0 = arith.constant 0 : i32
    %c0_i32_1 = arith.constant 0 : i32
    return %c0_i32, %c0_i32_0 : i32, i32
  }
  func.func @transform_29(%arg0: i32) -> i32 {
    %c0_i32 = arith.constant 0 : i32
    %c0_i32_0 = arith.constant 0 : i32
    return %c0_i32 : i32
  }
  func.func @transform_30(%arg0: i32) -> (i32, i32, i32) {
    %c0_i32 = arith.constant 0 : i32
    %c0_i32_0 = arith.constant 0 : i32
    %c0_i32_1 = arith.constant 0 : i32
    return %arg0, %c0_i32, %c0_i32_0 : i32, i32, i32
  }
}

</mosaic_0001>

<bundles_post_ra>
// kernel: squeeze.2
= control target key start
LH: loop header
LB: loop body
LE: loop exit
PB: predicated region body
PF: predicated region fallthrough
CT: control target
= control target key end

     0   :  { %s130_s8 = smov 104   ;;  %s131_s9 = smov 112   ;;  %vm7_vm0 = vcmask 64512   ;;  %s221_s0 = inlined_call_operand.vmem [shape: f32[2,128], index: 0, kind: input, shape index: {}]   ;;  %s222_s1 = inlined_call_operand.vmem [shape: f32[2,16,8], index: 1, kind: output, shape index: {}]  }
   0x1   :  { %v4_v0 = vld [vmem:[%s221_s0] sm:$0x3]  ;;  %s129_s0 = smov 120   ;;  %s132_s10 = smov 96  }
   0x2   :  { %5 = vst [vmem:[#allocation0] sm:$0x3] %v4_v0  ;;  %s133_s11 = smov 88   ;;  %s134_s12 = smov 80  }
   0x3   :  { %s135_s13 = smov 72   ;;  %s136_s14 = smov 64  }
   0x4   :  { %s137_s17 = smov 56   ;;  %s138_s18 = smov 48  }
   0x5   :  { %s139_s19 = smov 40   ;;  %s140_s20 = smov 32  }
   0x6   :  { %s141_s21 = smov 24   ;;  %s142_s22 = smov 16  }
   0x7   :  { %s143_s23 = smov 8  }
   0x9   :  { %v9_v1 = vld [vmem:[#allocation0] sm:$0x3]  }
   0xa   :  { %v21_v2 = vld [vmem:[#allocation0] sm:$0x3]   ;;  %10 = vrot.lane.b32.xlu0 %v9_v1, %s129_s0 }
   0xb   :  { %22 = vrot.lane.b32.xlu1 %v21_v2, %s130_s8  ;;  %v15_v3 = vld [vmem:[#allocation0] sm:$0x3]  }
   0xc   :  { %v27_v4 = vld [vmem:[#allocation0] sm:$0x3]  }
   0xd   :  { %v33_v5 = vld [vmem:[#allocation0] sm:$0x3]  }
   0xe   :  { %16 = vrot.lane.b32.xlu0 %v15_v3, %s131_s9  ;;  %v39_v6 = vld [vmem:[#allocation0] sm:$0x3]  }
   0xf   :  { %28 = vrot.lane.b32.xlu1 %v27_v4, %s132_s10  ;;  %v45_v7 = vld [vmem:[#allocation0] sm:$0x3]  }
  0x10   :  { %v51_v8 = vld [vmem:[#allocation0] sm:$0x3]  }
  0x11   :  { %v57_v9 = vld [vmem:[#allocation0] sm:$0x3]  }
  0x12   :  { %34 = vrot.lane.b32.xlu0 %v33_v5, %s133_s11  ;;  %v63_v10 = vld [vmem:[#allocation0] sm:$0x3]  }
  0x13   :  { %40 = vrot.lane.b32.xlu1 %v39_v6, %s134_s12  ;;  %v6_v11 = vld [vmem:[#allocation0] sm:$0x3]  }
  0x14   :  { %8 = vst.msk [vmem:[%s222_s1] ss:$16 sm:$0x3] %vm7_vm0, %v6_v11   ;;  %v69_v12 = vld [vmem:[#allocation0] sm:$0x3]  }
  0x15   :  { %v75_v13 = vld [vmem:[#allocation0] sm:$0x3]  }
  0x16   :  { %46 = vrot.lane.b32.xlu0 %v45_v7, %s135_s13  ;;  %v81_v14 = vld [vmem:[#allocation0] sm:$0x3]  }
  0x17   :  { %52 = vrot.lane.b32.xlu1 %v51_v8, %s136_s14  ;;  %v87_v15 = vld [vmem:[#allocation0] sm:$0x3]  }
  0x18   :  { %v93_v16 = vld [vmem:[#allocation0] sm:$0x3]  }
  0x1a   :  { %58 = vrot.lane.b32.xlu0 %v57_v9, %s137_s17 }
  0x1b   :  { %64 = vrot.lane.b32.xlu1 %v63_v10, %s138_s18 }
  0x1e   :  { %70 = vrot.lane.b32.xlu0 %v69_v12, %s139_s19 }
  0x1f   :  { %76 = vrot.lane.b32.xlu1 %v75_v13, %s140_s20 }
  0x22   :  { %82 = vrot.lane.b32.xlu0 %v81_v14, %s141_s21 }
  0x23   :  { %88 = vrot.lane.b32.xlu1 %v87_v15, %s142_s22 }
  0x26   :  { %94 = vrot.lane.b32.xlu0 %v93_v16, %s143_s23 }
  0x7c   :  { %v11_v17 = vpop.permute.xlu0 %10  }
  0x7d   :  { %v23_v18 = vpop.permute.xlu1 %22   ;;  %99 = vst.msk [vmem:[%s222_s1 + $0x1] ss:$16 sm:$0x3] %vm7_vm0, %v11_v17  }
  0x7e   :  { %101 = vst.msk [vmem:[%s222_s1 + $0x3] ss:$16 sm:$0x3] %vm7_vm0, %v23_v18  }
  0x80   :  { %v17_v19 = vpop.permute.xlu0 %16  }
  0x81   :  { %v29_v20 = vpop.permute.xlu1 %28   ;;  %100 = vst.msk [vmem:[%s222_s1 + $0x2] ss:$16 sm:$0x3] %vm7_vm0, %v17_v19  }
  0x82   :  { %102 = vst.msk [vmem:[%s222_s1 + $0x4] ss:$16 sm:$0x3] %vm7_vm0, %v29_v20  }
  0x84   :  { %v35_v21 = vpop.permute.xlu0 %34  }
  0x85   :  { %v41_v22 = vpop.permute.xlu1 %40   ;;  %103 = vst.msk [vmem:[%s222_s1 + $0x5] ss:$16 sm:$0x3] %vm7_vm0, %v35_v21  }
  0x86   :  { %104 = vst.msk [vmem:[%s222_s1 + $0x6] ss:$16 sm:$0x3] %vm7_vm0, %v41_v22  }
  0x88   :  { %v47_v23 = vpop.permute.xlu0 %46  }
  0x89   :  { %v53_v24 = vpop.permute.xlu1 %52   ;;  %105 = vst.msk [vmem:[%s222_s1 + $0x7] ss:$16 sm:$0x3] %vm7_vm0, %v47_v23  }
  0x8a   :  { %106 = vst.msk [vmem:[%s222_s1 + $0x8] ss:$16 sm:$0x3] %vm7_vm0, %v53_v24  }
  0x8c   :  { %v59_v25 = vpop.permute.xlu0 %58  }
  0x8d   :  { %v65_v26 = vpop.permute.xlu1 %64   ;;  %107 = vst.msk [vmem:[%s222_s1 + $0x9] ss:$16 sm:$0x3] %vm7_vm0, %v59_v25  }
  0x8e   :  { %108 = vst.msk [vmem:[%s222_s1 + $0xa] ss:$16 sm:$0x3] %vm7_vm0, %v65_v26  }
  0x90   :  { %v71_v27 = vpop.permute.xlu0 %70  }
  0x91   :  { %v77_v28 = vpop.permute.xlu1 %76   ;;  %109 = vst.msk [vmem:[%s222_s1 + $0xb] ss:$16 sm:$0x3] %vm7_vm0, %v71_v27  }
  0x92   :  { %110 = vst.msk [vmem:[%s222_s1 + $0xc] ss:$16 sm:$0x3] %vm7_vm0, %v77_v28  }
  0x94   :  { %v83_v29 = vpop.permute.xlu0 %82  }
  0x95   :  { %v89_v30 = vpop.permute.xlu1 %88   ;;  %111 = vst.msk [vmem:[%s222_s1 + $0xd] ss:$16 sm:$0x3] %vm7_vm0, %v83_v29  }
  0x96   :  { %112 = vst.msk [vmem:[%s222_s1 + $0xe] ss:$16 sm:$0x3] %vm7_vm0, %v89_v30  }
  0x98   :  { %v95_v31 = vpop.permute.xlu0 %94  }
  0x99   :  { %113 = vst.msk [vmem:[%s222_s1 + $0xf] ss:$16 sm:$0x3] %vm7_vm0, %v95_v31  }

// kernel: vocomorph_forward.1
= control target key start
LH: loop header
LB: loop body
LE: loop exit
PB: predicated region body
PF: predicated region fallthrough
CT: control target
= control target key end

     0   :  { %s5549_s6 = smov 1   ;;  %s5550_s10 = smov 2   ;;  %s7143_s0 = inlined_call_operand.smem [shape: u32[31], index: -1, kind: input, shape index: {}] }
   0x1   :  { %s5597_s5 = sld [smem:[%s7143_s0]]   ;;  %s5551_s14 = smov 3  }
   0x2   :  { %s5602_s9 = sld [smem:[%s7143_s0 + %s5549_s6]]   ;;  %s5552_s18 = smov 4  }
   0x3   :  { %s5607_s13 = sld [smem:[%s7143_s0 + %s5550_s10]]   ;;  %s5553_s22 = smov 5  }
   0x4   :  { %s5612_s17 = sld [smem:[%s7143_s0 + %s5551_s14]]   ;;  %s5554_s26 = smov 6  }
   0x5   :  { %s5617_s21 = sld [smem:[%s7143_s0 + %s5552_s18]]   ;;  %s5555_s30 = smov 7  }
   0x6   :  { %s5622_s25 = sld [smem:[%s7143_s0 + %s5553_s22]]   ;;  %s5556_s4 = smov 8  }
   0x7   :  { %s5627_s29 = sld [smem:[%s7143_s0 + %s5554_s26]]   ;;  %s5557_s10 = smov 9  }
   0x8   :  { %s5632_s3 = sld [smem:[%s7143_s0 + %s5555_s30]]   ;;  %s5558_s15 = smov 10  }
   0x9   :  { %s5637_s8 = sld [smem:[%s7143_s0 + %s5556_s4]]   ;;  %s5559_s20 = smov 11  }
   0xa   :  { %s5642_s14 = sld [smem:[%s7143_s0 + %s5557_s10]]   ;;  %s5560_s26 = smov 12  }
   0xb   :  { %s5647_s19 = sld [smem:[%s7143_s0 + %s5558_s15]]   ;;  %s5561_s1 = smov 13  }
   0xc   :  { %s5652_s24 = sld [smem:[%s7143_s0 + %s5559_s20]]   ;;  %s5562_s7 = smov 14  }
   0xd   :  { %s5657_s30 = sld [smem:[%s7143_s0 + %s5560_s26]]   ;;  %s5563_s15 = smov 15  }
   0xe   :  { %s5662_s6 = sld [smem:[%s7143_s0 + %s5561_s1]]   ;;  %s5564_s22 = smov 16  }
   0xf   :  { %s5667_s12 = sld [smem:[%s7143_s0 + %s5562_s7]]   ;;  %s5565_s28 = smov 17  }
  0x10   :  { %s5672_s20 = sld [smem:[%s7143_s0 + %s5563_s15]]   ;;  %s5566_s7 = smov 18  }
  0x11   :  { %7151 = sst [smem:[#allocation5_spill]] %s5647_s19  ;;  %s5567_s15 = smov 19  }
  0x12   :  { %7152 = sst [smem:[#allocation6_spill]] %s5652_s24  ;;  %s5578_s10 = smov 30  }
  0x13   :  { %7153 = sst [smem:[#allocation7_spill]] %s5657_s30 }
  0x14   :  { %7154 = sst [smem:[#allocation8_spill]] %s5662_s6 }
  0x15   :  { %7155 = sst [smem:[#allocation9_spill]] %s5667_s12 }
  0x16   :  { %7156 = sst [smem:[#allocation10_spill]] %s5672_s20 }
  0x17   :  { %s5677_s27 = sld [smem:[%s7143_s0 + %s5564_s22]]   ;;  %s5568_s22 = smov 20  }
  0x18   :  { %s5682_s4 = sld [smem:[%s7143_s0 + %s5565_s28]]   ;;  %s5569_s28 = smov 21  }
  0x19   :  { %s5687_s12 = sld [smem:[%s7143_s0 + %s5566_s7]]   ;;  %s5570_s7 = smov 22  }
  0x1a   :  { %s5692_s20 = sld [smem:[%s7143_s0 + %s5567_s15]]   ;;  %s5571_s15 = smov 23  }
  0x1d   :  { %7157 = sst [smem:[#allocation11_spill]] %s5677_s27 }
  0x1e   :  { %7158 = sst [smem:[#allocation12_spill]] %s5682_s4 }
  0x1f   :  { %7159 = sst [smem:[#allocation13_spill]] %s5687_s12 }
  0x20   :  { %7160 = sst [smem:[#allocation14_spill]] %s5692_s20 }
  0x21   :  { %s5697_s27 = sld [smem:[%s7143_s0 + %s5568_s22]]   ;;  %s5572_s22 = smov 24  }
  0x22   :  { %s5702_s4 = sld [smem:[%s7143_s0 + %s5569_s28]]   ;;  %s5573_s28 = smov 25  }
  0x23   :  { %s5707_s12 = sld [smem:[%s7143_s0 + %s5570_s7]]   ;;  %s5574_s7 = smov 26  }
  0x24   :  { %s5712_s20 = sld [smem:[%s7143_s0 + %s5571_s15]]   ;;  %s5575_s15 = smov 27  }
  0x25   :  { %s5727_s6 = sld [smem:[%s7143_s0 + %s5574_s7]]  }
  0x26   :  { %s5732_s30 = sld [smem:[%s7143_s0 + %s5575_s15]]  }
  0x27   :  { %7161 = sst [smem:[#allocation15_spill]] %s5697_s27 }
  0x28   :  { %7162 = sst [smem:[#allocation16_spill]] %s5702_s4 }
  0x29   :  { %s5717_s27 = sld [smem:[%s7143_s0 + %s5572_s22]]   ;;  %s5576_s22 = smov 28  }
  0x2a   :  { %s5722_s4 = sld [smem:[%s7143_s0 + %s5573_s28]]   ;;  %s5577_s28 = smov 29  }
  0x2b   :  { %s5737_s24 = sld [smem:[%s7143_s0 + %s5576_s22]]  }
  0x2c   :  { %s4364_s19 = sld [smem:[%s7143_s0 + %s5577_s28]]  }
  0x2f   :  { %7163 = sst [smem:[#allocation17_spill]] %s5717_s27 }
  0x30   :  { %s5745_s27 = sld [smem:[%s7143_s0 + %s5578_s10]]  }
  0x31   :  { %66 = vsyncpa [#allocation3], 0 }
  0x32   :  { %s131_s15 = sshll.u32 %s4364_s19, 4  ;;  %s132_s15 = int_to_ptr.vmem [resolvable:$true] %s131_s15 }
  0x33   :  { %s5535_s16 = scalar_lea.vmem %s132_s15, 16  ;;  %p5540_p1 = scmp.lt.s32.totalorder %s132_s15, %s132_s15 }
  0x34   :  { %p5536_p0 = scmp.ne.s32.totalorder %s132_s15, %s5535_s16  ;;  %p5541_p2 = scmp.lt.s32.totalorder %s5535_s16, %s5535_s16 }
  0x36   :  { %p5542_p3 = por %p5541_p2, %p5540_p1 }
  0x38   :  { %p5543_p4 = pnand %p5542_p3, %p5536_p0 }
  0x3a   :  { %5546 = shalt.err (!%p5543_p4)
}
  0x3b   :  { %s5579_s18 = smov [#allocation2]  }
  0x3c   :  { %134 = dma.vmem_to_smem %s132_s15, 16, %s5579_s18, [#allocation3]  }
  0x3d   :  { %5547 = dma.done.wait [#allocation3], 16  }
  0x3e   :  { %5548 = vsyncadd [#allocation3], 4294967280 }
  0x3f   :  { %138 = sfence }
  0x40   :  { %v143_v0 = vld [vmem:[%s5597_s5] sm:$0xff]  ;;  %s5580_s22 = smov 32   ;;  %vm144_vm0 = vcmask 1047808   ;;  %v7149_v3 = vmov 0.0   ;;  %vm5582_vm1 = vmmov 0   ;;  %s5583_s0 = smov 127  }
  0x41   :  { %145 = vrot.lane.b32.xlu0 %v143_v0, %s5580_s22  ;;  %4839 = vmatprep.subr.bf16.mxu0 %v7149_v3  ;;  %vm169_vm2 = vcmask 1043456   ;;  %v151_v7 = vpack.c.bf16 %v143_v0, %v143_v0  ;;  %v5371_v10 = vld [vmem:[%s5612_s17] sm:$0x1f]   ;;  %vm165_vm3 = vcmask 64512   ;;  %vm543_vm4 = vcmask 1044480   ;;  %v5375_v49 = vld [vmem:[%s5627_s29 + $0x48] sm:$0xff]  }
  0x42   :  { %4851 = vmatprep.subr.bf16.mxu1 %v7149_v3  ;;  %4841 = vmatprep.mubr.msk.bf16.mxu0 %vm5582_vm1, %v7149_v3  ;;  %v5372_v11 = vld [vmem:[%s5622_s25] sm:$0x1f]   ;;  %v5584_v36 = vmov 65535   ;;  %vm515_vm7 = vcmask 72704   ;;  %s5585_s5 = smov 31   ;;  %v5376_v55 = vld [vmem:[%s5627_s29 + $0x50] sm:$0xff]  }
  0x43   :  { %4853 = vmatprep.mubr.msk.bf16.mxu1 %vm5582_vm1, %v7149_v3  ;;  %v223_v12 = vsel %vm169_vm2, %v151_v7, 0  ;;  %v5373_v13 = vld [vmem:[%s5607_s13] sm:$0x1f]   ;;  %v544_v37 = vsel %vm169_vm2, 4294967295, %v5584_v36  ;;  %s5586_s13 = smov 1   ;;  %v5377_v56 = vld [vmem:[%s5627_s29 + $0x58] sm:$0xff]  }
  0x44   :  { %v5374_v14 = vld [vmem:[%s5617_s21] sm:$0x1f]   ;;  %v5786_v43 = vsel %vm543_vm4, %v544_v37, 0  ;;  %v5379_v58 = vld [vmem:[%s5627_s29 + $0x68] sm:$0xff]   ;;  %v5380_v59 = vld [vmem:[%s5627_s29 + $0x70] sm:$0xff]   ;;  %s5587_s17 = smov 97  }
  0x45   :  { %v4374_v52 = vld [vmem:[%s5722_s4] ss:$0 sm:$0xff]  ;;  %v5381_v60 = vld [vmem:[%s5627_s29 + $0x78] sm:$0xff]   ;;  %v5383_v62 = vld [vmem:[%s5627_s29 + $0x88] sm:$0xff]   ;;  %vm1148_vm8 = vcmask 588800   ;;  %vm1731_vm9 = vcmask 1040384  }
  0x46   :  { %v4375_v54 = vld [vmem:[%s5727_s6] ss:$0 sm:$0xff]  ;;  %v5391_v37 = vld [vmem:[%s5627_s29 + $0xa8] sm:$0xff]   ;;  %s7164_s21 = sld [smem:[#allocation17_spill]]  ;;  %vm1703_vm10 = vcmask 15360   ;;  %s7165_s25 = sld [smem:[#allocation5_spill]] }
  0x47   :  { %v5378_v57 = vld [vmem:[%s5627_s29 + $0x60] sm:$0xff]   ;;  %vm2571_vm11 = vcmask 130048   ;;  %s7171_s19 = sld [smem:[#allocation9_spill]]  ;;  %s7173_s6 = sld [smem:[#allocation11_spill]]  ;;  %vm4329_vm12 = vcmask 261120  }
  0x48   :  { %v5382_v61 = vld [vmem:[%s5627_s29 + $0x80] sm:$0xff]   ;;  %s7174_s4 = sld [smem:[#allocation16_spill]]  ;;  %s7175_s23 = sld [smem:[#allocation14_spill]] }
  0x49   :  { %s7176_s26 = sld [smem:[#allocation15_spill]]  ;;  %s7177_s28 = sld [smem:[#allocation13_spill]] }
  0xb3   :  { %v146_v1 = vpop.permute.xlu0 %145 }
  0xb4   :  { %v147_v2 = vsel %vm144_vm0, %v146_v1, %v143_v0 }
  0xb5   :  { %148 = vrot.lane.b32.xlu0 %v147_v2, %s5580_s22 }
 0x127   :  { %v149_v4 = vpop.permute.xlu0 %148 }
 0x128   :  { %v150_v5 = vsel %vm144_vm0, %v149_v4, %v143_v0 }
 0x129   :  { %v152_v6 = vpack.c.bf16 %v150_v5, %v150_v5 }
 0x12b   :  { %163 = vrot.lane.b32.xlu1 %v152_v6, %s5583_s0 }
 0x19d   :  { %v164_v8 = vpop.permute.xlu1 %163 }
 0x19e   :  { %v171_v9 = vsel %vm169_vm2, %v164_v8, 0 }
 0x19f   :  { %4840 = vmatpush3.bf16.msra.mxu0 %v171_v9  ;;  %4852 = vmatpush3.bf16.msra.mxu1 %v171_v9 }
 0x1a0   :  { %4845 = vmatprep.subr.bf16.mxu0 %v7149_v3  ;;  %4857 = vmatprep.subr.bf16.mxu1 %v7149_v3 }
 0x1a2   :  { %4842 = vmatmul.mubr.msk.bf16.vlgmr.msra.gmra.mrb[0].mxu0 %vm165_vm3, %v5371_v10  ;;  %4854 = vmatmul.mubr.msk.bf16.vlgmr.msra.gmra.mrb[0].mxu1 %vm165_vm3, %v5372_v11 }
 0x1a3   :  { %4846 = vmatpush3.bf16.msra.mxu0 %v223_v12  ;;  %4858 = vmatpush3.bf16.msra.mxu1 %v223_v12 }
 0x1a4   :  { %4847 = vmatprep.mubr.msk.bf16.mxu0 %vm5582_vm1, %v7149_v3  ;;  %4859 = vmatprep.mubr.msk.bf16.mxu1 %vm5582_vm1, %v7149_v3 }
 0x1a5   :  { %4863 = vmatprep.subr.bf16.mxu0 %v7149_v3  ;;  %4901 = vmatprep.subr.bf16.mxu1 %v7149_v3 }
 0x1ae   :  { %4848 = vmatmul.mubr.msk.bf16.vlgmr.msra.gmra.mrb[0].mxu0 %vm165_vm3, %v5373_v13  ;;  %4860 = vmatmul.mubr.msk.bf16.vlgmr.msra.gmra.mrb[0].mxu1 %vm165_vm3, %v5374_v14  ;;  %v5384_v14 = vld [vmem:[%s5627_s29] sm:$0xff]  }
 0x1af   :  { %4865 = vmatprep.mubr.msk.bf16.mxu0 %vm5582_vm1, %v7149_v3  ;;  %4903 = vmatprep.mubr.msk.bf16.mxu1 %vm5582_vm1, %v7149_v3 }
 0x281   :  { %v259_v15 = vpop.f32.mrb[0].mxu0  ;;  %v361_v16 = vpop.f32.mrb[0].mxu1 }
 0x282   :  { %v368_v17 = vmul.f32 %v259_v15, %v259_v15  ;;  %v370_v18 = vmul.f32 %v361_v16, %v361_v16  ;;  %v4849_v19 = vpop.f32.mrb[1].mxu0  ;;  %v4861_v20 = vpop.f32.mrb[1].mxu1 }
 0x283   :  { %v262_v21 = vpop.f32.mrb[2].mxu0  ;;  %v364_v22 = vpop.f32.mrb[2].mxu1  ;;  %v5866_v19 = vld [vmem:[%s5602_s9 + $0x8] sm:$0xff]  }
 0x284   :  { %v372_v23 = vadd.f32 %v370_v18, %v368_v17  ;;  %v369_v24 = vmul.f32 %v262_v21, %v262_v21  ;;  %v371_v25 = vmul.f32 %v364_v22, %v364_v22  ;;  %v4850_v26 = vpop.f32.mrb[3].mxu0  ;;  %v4862_v27 = vpop.f32.mrb[3].mxu1  ;;  %v5857_v17 = vld [vmem:[%s5602_s9] sm:$0xff]   ;;  %v5385_v18 = vld [vmem:[%s5627_s29 + $0x90] sm:$0xff]   ;;  %v5386_v20 = vld [vmem:[%s5627_s29 + $0x8] sm:$0xff]  }
 0x285   :  { %v5388_v26 = vld [vmem:[%s5627_s29 + $0x10] sm:$0xff]  }
 0x286   :  { %v374_v28 = vmax.f32 %v372_v23, 1e-30  ;;  %v373_v29 = vadd.f32 %v371_v25, %v369_v24  ;;  %vm380_vm5 = vcmp.gt.f32.partialorder %v372_v23, 0.0  ;;  %v5406_v24 = vld [vmem:[%s5602_s9 + $0x20] ss:$0 sps:$4 sm:$0xff]  }
 0x288   :  { %5527 = vrsqrt.f32 %v374_v28  ;;  %v375_v30 = vmax.f32 %v373_v29, 1e-30  ;;  %vm381_vm6 = vcmp.gt.f32.partialorder %v373_v29, 0.0 }
 0x28a   :  { %5529 = vrsqrt.f32 %v375_v30  ;;  %v5389_v30 = vld [vmem:[%s5627_s29 + $0xa0] sm:$0xff]  }
 0x292   :  { %v5528_v31 = vpop.eup %5527 }
 0x293   :  { %v382_v32 = vmul.f32 %v5528_v31, %v259_v15  ;;  %v386_v33 = vmul.f32 %v5528_v31, %v361_v16  ;;  %v5777_v34 = vmul.f32 %v5528_v31, %v372_v23  ;;  %v5888_v23 = vld [vmem:[%s5602_s9 + $0x18] sm:$0xff]   ;;  %v5906_v31 = vsel %vm169_vm2, %v5406_v24, 0  ;;  %v5409_v24 = vld [vmem:[%s5632_s3 + $0x8] sm:$0xff]  }
 0x294   :  { %v5530_v35 = vpop.eup %5529 }
 0x295   :  { %v5780_v38 = vsel %vm380_vm5, %v382_v32, 1.0  ;;  %v5782_v39 = vsel %vm380_vm5, %v386_v33, 0.0  ;;  %v383_v40 = vmul.f32 %v5530_v35, %v262_v21  ;;  %v387_v41 = vmul.f32 %v5530_v35, %v364_v22  ;;  %399 = vrot.lane.b32.xlu1 %v5777_v34, %s5580_s22  ;;  %v5877_v21 = vld [vmem:[%s5602_s9 + $0x10] sm:$0xff]   ;;  %v5387_v22 = vld [vmem:[%s5627_s29 + $0x98] sm:$0xff]  }
 0x296   :  { %v379_v42 = vmul.f32 %v5530_v35, %v373_v29  ;;  %v5390_v33 = vld [vmem:[%s5627_s29 + $0x18] sm:$0xff]  }
 0x297   :  { %v5788_v44 = vsel %vm381_vm6, %v383_v40, 1.0  ;;  %v5790_v45 = vsel %vm381_vm6, %v387_v41, 0.0  ;;  %v5392_v41 = vld [vmem:[%s5627_s29 + $0x20] sm:$0xff]  }
 0x298   :  { %402 = vrot.lane.b32.xlu0 %v379_v42, %s5580_s22  ;;  %v469_v46 = vpack.c.bf16 %v379_v42, %v5777_v34 }
 0x29a   :  { %v547_v47 = vand.u32 %v5786_v43, %v469_v46 }
 0x29c   :  { %4864 = vmatpush3.bf16.msra.mxu0 %v547_v47 }
 0x29d   :  { %4939 = vmatprep.subr.bf16.mxu0 %v7149_v3 }
 0x29f   :  { %4866 = vmatmul.mubr.msk.bf16.vlgmr.msra.gmra.mrb[4].mxu0 %vm515_vm7, %v5375_v49 }
 0x2a0   :  { %4869 = vmatprep.mubr.msk.bf16.mxu0 %vm5582_vm1, %v7149_v3 }
 0x2a7   :  { %4870 = vmatmul.mubr.msk.bf16.gmra.mrb[8].mxu0 %vm515_vm7, %v5376_v55 }
 0x2a8   :  { %4873 = vmatprep.mubr.msk.bf16.mxu0 %vm5582_vm1, %v7149_v3 }
 0x2af   :  { %4874 = vmatmul.mubr.msk.bf16.gmra.mrb[12].mxu0 %vm515_vm7, %v5377_v56  ;;  %v5396_v56 = vld [vmem:[%s5627_s29 + $0x30] sm:$0xff]  }
 0x2b0   :  { %4877 = vmatprep.mubr.msk.bf16.mxu0 %vm5582_vm1, %v7149_v3 }
 0x2b7   :  { %4878 = vmatmul.mubr.msk.bf16.gmra.mrb[16].mxu0 %vm515_vm7, %v5378_v57 }
 0x2b8   :  { %4881 = vmatprep.mubr.msk.bf16.mxu0 %vm5582_vm1, %v7149_v3 }
 0x2bf   :  { %4882 = vmatmul.mubr.msk.bf16.gmra.mrb[20].mxu0 %vm515_vm7, %v5379_v58 }
 0x2c0   :  { %4885 = vmatprep.mubr.msk.bf16.mxu0 %vm5582_vm1, %v7149_v3 }
 0x2c7   :  { %4886 = vmatmul.mubr.msk.bf16.gmra.mrb[24].mxu0 %vm515_vm7, %v5380_v59 }
 0x2c8   :  { %4889 = vmatprep.mubr.msk.bf16.mxu0 %vm5582_vm1, %v7149_v3 }
 0x2cf   :  { %4890 = vmatmul.mubr.msk.bf16.gmra.mrb[28].mxu0 %vm515_vm7, %v5381_v60  ;;  %v5397_v60 = vld [vmem:[%s5627_s29 + $0xc0] sm:$0xff]  }
 0x2d0   :  { %4893 = vmatprep.mubr.msk.bf16.mxu0 %vm5582_vm1, %v7149_v3 }
 0x2d7   :  { %4894 = vmatmul.mubr.msk.bf16.gmra.mrb[32].mxu0 %vm515_vm7, %v5382_v61 }
 0x2d8   :  { %4897 = vmatprep.mubr.msk.bf16.mxu0 %vm5582_vm1, %v7149_v3 }
 0x2df   :  { %4898 = vmatmul.mubr.msk.bf16.gmra.mrb[36].mxu0 %vm515_vm7, %v5383_v62  ;;  %v5399_v62 = vld [vmem:[%s5627_s29 + $0x38] sm:$0xff]  }
 0x2e0   :  { %4941 = vmatprep.mubr.msk.bf16.mxu0 %vm5582_vm1, %v7149_v3 }
 0x307   :  { %v400_v48 = vpop.permute.xlu1 %399 }
 0x308   :  { %v401_v50 = vsel %vm144_vm0, %v400_v48, %v5777_v34  ;;  %v5393_v48 = vld [vmem:[%s5627_s29 + $0xb0] sm:$0xff]  }
 0x309   :  { %405 = vrot.lane.b32.xlu1 %v401_v50, %s5580_s22  ;;  %v5394_v50 = vld [vmem:[%s5627_s29 + $0x28] sm:$0xff]  }
 0x30a   :  { %v403_v51 = vpop.permute.xlu0 %402 }
 0x30b   :  { %v404_v53 = vsel %vm144_vm0, %v403_v51, %v379_v42 }
 0x30c   :  { %407 = vrot.lane.b32.xlu0 %v404_v53, %s5580_s22 }
 0x30d   :  { %416 = vrot.lane.b32.xlu1 %v4374_v52, %s5585_s5 }
 0x310   :  { %426 = vrot.lane.b32.xlu0 %v4375_v54, %s5586_s13  ;;  %v5395_v54 = vld [vmem:[%s5627_s29 + $0xb8] sm:$0xff]  }
 0x372   :  { %v5893_v25 = vpop.f32.mrb[4].mxu0 }
 0x373   :  { %v4867_v27 = vpop.f32.mrb[5].mxu0 }
 0x374   :  { %v5900_v28 = vpop.f32.mrb[6].mxu0 }
 0x375   :  { %v4868_v29 = vpop.f32.mrb[7].mxu0 }
 0x376   :  { %v5410_v29 = vld [vmem:[%s5637_s8 + $0x8] sm:$0xff]  }
 0x37a   :  { %v5916_v32 = vpop.f32.mrb[8].mxu0 }
 0x37b   :  { %v406_v63 = vpop.permute.xlu1 %405 }
 0x37c   :  { %v409_v1 = vsel %vm144_vm0, %v406_v63, %v5777_v34  ;;  %v4871_v34 = vpop.f32.mrb[9].mxu0 }
 0x37d   :  { %v5922_v35 = vpop.f32.mrb[10].mxu0  ;;  %v5417_v34 = vld [vmem:[%s5632_s3 + $0x28] sm:$0xff]  }
 0x37e   :  { %v408_v0 = vpop.permute.xlu0 %407  ;;  %v4872_v36 = vpop.f32.mrb[11].mxu0 }
 0x37f   :  { %v410_v2 = vsel %vm144_vm0, %v408_v0, %v379_v42  ;;  %v5842_v4 = vpop.permute.xlu1 %416  ;;  %v5418_v36 = vld [vmem:[%s5637_s8 + $0x28] sm:$0xff]  }
 0x380   :  { %v419_v5 = vmul.f32 %v5842_v4, %v409_v1  ;;  %v420_v6 = vmul.f32 %v5842_v4, %v410_v2 }
 0x382   :  { %v5846_v7 = vpop.permute.xlu0 %426  ;;  %v449_v8 = vpack.c.bf16 %v420_v6, %v419_v5  ;;  %v5930_v40 = vpop.f32.mrb[12].mxu0  ;;  %v5403_v6 = vld [vmem:[%s5627_s29 + $0x40] sm:$0xff]  }
 0x383   :  { %v429_v9 = vmul.f32 %v5846_v7, %v409_v1  ;;  %v430_v10 = vmul.f32 %v5846_v7, %v410_v2  ;;  %v4875_v42 = vpop.f32.mrb[13].mxu0  ;;  %v5400_v2 = vld [vmem:[%s5627_s29 + $0xc8] sm:$0xff]  }
 0x384   :  { %700 = vrot.lane.b32.xlu1 %v449_v8, %s5587_s17  ;;  %v5935_v46 = vpop.f32.mrb[14].mxu0  ;;  %v5421_v42 = vld [vmem:[%s5632_s3 + $0x38] sm:$0xff]  }
 0x385   :  { %v856_v11 = vpack.c.bf16 %v430_v10, %v429_v9  ;;  %v4876_v47 = vpop.f32.mrb[15].mxu0 }
 0x386   :  { %v5422_v47 = vld [vmem:[%s5637_s8 + $0x38] sm:$0xff]  }
 0x387   :  { %903 = vrot.lane.b32.xlu0 %v856_v11, %s5583_s0  ;;  %v5404_v11 = vld [vmem:[%s5627_s29 + $0xd0] sm:$0xff]   ;;  %s7166_s29 = sld [smem:[#allocation6_spill]] }
 0x38a   :  { %v5942_v49 = vpop.f32.mrb[16].mxu0 }
 0x38b   :  { %v4879_v51 = vpop.f32.mrb[17].mxu0 }
 0x38c   :  { %v5947_v52 = vpop.f32.mrb[18].mxu0  ;;  %v5425_v51 = vld [vmem:[%s5642_s14] sm:$0xff]  }
 0x38d   :  { %v4880_v53 = vpop.f32.mrb[19].mxu0 }
 0x38e   :  { %v5426_v53 = vld [vmem:[%s5642_s14 + $0x8] sm:$0xff]  }
 0x392   :  { %v5954_v55 = vpop.f32.mrb[20].mxu0 }
 0x393   :  { %v4883_v57 = vpop.f32.mrb[21].mxu0 }
 0x394   :  { %v5959_v58 = vpop.f32.mrb[22].mxu0 }
 0x395   :  { %v4884_v59 = vpop.f32.mrb[23].mxu0 }
 0x396   :  { %v1702_v59 = vld [vmem:[%s5712_s20] sm:$0x1]  ;;  %s4691_s20 = sld [smem:[#allocation2 + $0x1]] }
 0x39a   :  { %v5966_v61 = vpop.f32.mrb[24].mxu0 }
 0x39b   :  { %v4887_v63 = vpop.f32.mrb[25].mxu0 }
 0x39c   :  { %v5971_v0 = vpop.f32.mrb[26].mxu0  ;;  %v5429_v63 = vld [vmem:[%s5642_s14 + $0x20] sm:$0xff]  }
 0x39d   :  { %v4888_v1 = vpop.f32.mrb[27].mxu0 }
 0x39e   :  { %v5430_v1 = vld [vmem:[%s5642_s14 + $0x28] sm:$0xff]  }
 0x3a2   :  { %v5978_v5 = vpop.f32.mrb[28].mxu0 }
 0x3a3   :  { %v4891_v8 = vpop.f32.mrb[29].mxu0 }
 0x3a4   :  { %v5983_v9 = vpop.f32.mrb[30].mxu0  ;;  %v5433_v8 = vld [vmem:[%s5642_s14 + $0x40] sm:$0xff]  }
 0x3a5   :  { %v4892_v10 = vpop.f32.mrb[31].mxu0 }
 0x3f6   :  { %v701_v12 = vpop.permute.xlu1 %700 }
 0x3f7   :  { %v730_v13 = vand.u32 %v701_v12, %v5786_v43  ;;  %v5990_v12 = vpop.f32.mrb[32].mxu0 }
 0x3f9   :  { %v904_v15 = vpop.permute.xlu0 %903  ;;  %4902 = vmatpush3.bf16.msra.mxu1 %v730_v13  ;;  %v5407_v13 = vld [vmem:[%s5632_s3] sm:$0xff]  }
 0x3fa   :  { %v933_v16 = vand.u32 %v904_v15, %v5786_v43  ;;  %4977 = vmatprep.subr.bf16.mxu1 %v7149_v3 }
 0x3fc   :  { %4940 = vmatpush3.bf16.msra.mxu0 %v933_v16  ;;  %4904 = vmatmul.mubr.msk.bf16.vlgmr.msra.gmra.mrb[4].mxu1 %vm515_vm7, %v5384_v14  ;;  %v4895_v14 = vpop.f32.mrb[33].mxu0 }
 0x3fd   :  { %4907 = vmatprep.mubr.msk.bf16.mxu1 %vm5582_vm1, %v7149_v3  ;;  %5023 = vmatprep.subr.bf16.mxu0 %v7149_v3  ;;  %v5995_v15 = vpop.f32.mrb[34].mxu0 }
 0x3fe   :  { %4978 = vmatpush3.bf16.msra.mxu1 %v5857_v17  ;;  %v4896_v16 = vpop.f32.mrb[35].mxu0 }
 0x3ff   :  { %4942 = vmatmul.mubr.msk.bf16.vlgmr.msra.gmra.mrb[40].mxu0 %vm515_vm7, %v5385_v18  ;;  %4979 = vmatprep.subr.bf16.mxu1 %v7149_v3  ;;  %v5408_v18 = vld [vmem:[%s5637_s8] sm:$0xff]  }
 0x400   :  { %4945 = vmatprep.mubr.msk.bf16.mxu0 %vm5582_vm1, %v7149_v3  ;;  %5024 = vmatpush3.bf16.msra.mxu0 %v5857_v17 }
 0x401   :  { %5025 = vmatprep.subr.bf16.mxu0 %v7149_v3 }
 0x402   :  { %4980 = vmatpush3.bf16.msra.mxu1 %v5866_v19 }
 0x403   :  { %4981 = vmatprep.subr.bf16.mxu1 %v7149_v3 }
 0x404   :  { %4908 = vmatmul.mubr.msk.bf16.gmra.mrb[8].mxu1 %vm515_vm7, %v5386_v20  ;;  %5026 = vmatpush3.bf16.msra.mxu0 %v5866_v19  ;;  %v5999_v20 = vpop.f32.mrb[36].mxu0 }
 0x405   :  { %4911 = vmatprep.mubr.msk.bf16.mxu1 %vm5582_vm1, %v7149_v3  ;;  %5027 = vmatprep.subr.bf16.mxu0 %v7149_v3 }
 0x406   :  { %4982 = vmatpush3.bf16.msra.mxu1 %v5877_v21 }
 0x407   :  { %4946 = vmatmul.mubr.msk.bf16.gmra.mrb[44].mxu0 %vm515_vm7, %v5387_v22  ;;  %4983 = vmatprep.subr.bf16.mxu1 %v7149_v3  ;;  %v4899_v22 = vpop.f32.mrb[37].mxu0 }
 0x408   :  { %4949 = vmatprep.mubr.msk.bf16.mxu0 %vm5582_vm1, %v7149_v3  ;;  %5028 = vmatpush3.bf16.msra.mxu0 %v5877_v21 }
 0x409   :  { %5029 = vmatprep.subr.bf16.mxu0 %v7149_v3 }
 0x40a   :  { %4984 = vmatpush3.bf16.msra.mxu1 %v5888_v23 }
 0x40b   :  { %4985 = vmatprep.subr.bf16.mxu1 %v7149_v3 }
 0x40c   :  { %4912 = vmatmul.mubr.msk.bf16.gmra.mrb[12].mxu1 %vm515_vm7, %v5388_v26  ;;  %5030 = vmatpush3.bf16.msra.mxu0 %v5888_v23  ;;  %v6010_v26 = vpop.f32.mrb[38].mxu0 }
 0x40d   :  { %4915 = vmatprep.mubr.msk.bf16.mxu1 %vm5582_vm1, %v7149_v3  ;;  %5031 = vmatprep.subr.bf16.mxu0 %v7149_v3  ;;  %v4900_v27 = vpop.f32.mrb[39].mxu0 }
 0x40e   :  { %4986 = vmatpush3.bf16.msra.mxu1 %v5906_v31 }
 0x40f   :  { %4950 = vmatmul.mubr.msk.bf16.gmra.mrb[48].mxu0 %vm515_vm7, %v5389_v30  ;;  %5069 = vmatprep.subr.bf16.mxu1 %v7149_v3  ;;  %v5415_v30 = vld [vmem:[%s5632_s3 + $0x20] sm:$0xff]  }
 0x410   :  { %4953 = vmatprep.mubr.msk.bf16.mxu0 %vm5582_vm1, %v7149_v3  ;;  %5032 = vmatpush3.bf16.msra.mxu0 %v5906_v31 }
 0x411   :  { %5115 = vmatprep.subr.bf16.mxu0 %v7149_v3 }
 0x414   :  { %4916 = vmatmul.mubr.msk.bf16.gmra.mrb[16].mxu1 %vm515_vm7, %v5390_v33  ;;  %v5416_v33 = vld [vmem:[%s5637_s8 + $0x20] sm:$0xff]  }
 0x415   :  { %4919 = vmatprep.mubr.msk.bf16.mxu1 %vm5582_vm1, %v7149_v3 }
 0x417   :  { %4954 = vmatmul.mubr.msk.bf16.gmra.mrb[52].mxu0 %vm515_vm7, %v5391_v37  ;;  %v5419_v37 = vld [vmem:[%s5632_s3 + $0x30] sm:$0xff]  }
 0x418   :  { %4957 = vmatprep.mubr.msk.bf16.mxu0 %vm5582_vm1, %v7149_v3 }
 0x41c   :  { %4920 = vmatmul.mubr.msk.bf16.gmra.mrb[20].mxu1 %vm515_vm7, %v5392_v41  ;;  %v5420_v41 = vld [vmem:[%s5637_s8 + $0x30] sm:$0xff]  }
 0x41d   :  { %4923 = vmatprep.mubr.msk.bf16.mxu1 %vm5582_vm1, %v7149_v3 }
 0x41f   :  { %4958 = vmatmul.mubr.msk.bf16.gmra.mrb[56].mxu0 %vm515_vm7, %v5393_v48  ;;  %v5423_v48 = vld [vmem:[%s5632_s3 + $0x40] sm:$0xff]  }
 0x420   :  { %4961 = vmatprep.mubr.msk.bf16.mxu0 %vm5582_vm1, %v7149_v3 }
 0x424   :  { %4924 = vmatmul.mubr.msk.bf16.gmra.mrb[24].mxu1 %vm515_vm7, %v5394_v50  ;;  %v5424_v50 = vld [vmem:[%s5637_s8 + $0x40] sm:$0xff]  }
 0x425   :  { %4927 = vmatprep.mubr.msk.bf16.mxu1 %vm5582_vm1, %v7149_v3 }
 0x427   :  { %4962 = vmatmul.mubr.msk.bf16.gmra.mrb[60].mxu0 %vm515_vm7, %v5395_v54  ;;  %v5427_v54 = vld [vmem:[%s5642_s14 + $0x10] sm:$0xff]  }
 0x428   :  { %4965 = vmatprep.mubr.msk.bf16.mxu0 %vm5582_vm1, %v7149_v3 }
 0x42c   :  { %4928 = vmatmul.mubr.msk.bf16.gmra.mrb[28].mxu1 %vm515_vm7, %v5396_v56  ;;  %v1701_v56 = vld [vmem:[%s5707_s12] sm:$0x1]  ;;  %s4112_s12 = sld [smem:[#allocation2]] }
 0x42d   :  { %4931 = vmatprep.mubr.msk.bf16.mxu1 %vm5582_vm1, %v7149_v3  ;;  %v6093_v57 = vsel %vm1731_vm9, %v1701_v56, 0 }
 0x42f   :  { %4966 = vmatmul.mubr.msk.bf16.gmra.mrb[64].mxu0 %vm515_vm7, %v5397_v60  ;;  %v6098_v60 = vsel %vm1731_vm9, %v1702_v59, 0 }
 0x430   :  { %4969 = vmatprep.mubr.msk.bf16.mxu0 %vm5582_vm1, %v7149_v3 }
 0x434   :  { %4932 = vmatmul.mubr.msk.bf16.gmra.mrb[32].mxu1 %vm515_vm7, %v5399_v62  ;;  %v5428_v62 = vld [vmem:[%s5642_s14 + $0x18] sm:$0xff]  }
 0x435   :  { %4935 = vmatprep.mubr.msk.bf16.mxu1 %vm5582_vm1, %v7149_v3 }
 0x437   :  { %4970 = vmatmul.mubr.msk.bf16.gmra.mrb[68].mxu0 %vm515_vm7, %v5400_v2  ;;  %v5431_v2 = vld [vmem:[%s5642_s14 + $0x30] sm:$0xff]  }
 0x438   :  { %4973 = vmatprep.mubr.msk.bf16.mxu0 %vm5582_vm1, %v7149_v3 }
 0x43c   :  { %4936 = vmatmul.mubr.msk.bf16.gmra.mrb[36].mxu1 %vm515_vm7, %v5403_v6  ;;  %v5432_v6 = vld [vmem:[%s5642_s14 + $0x38] sm:$0xff]   ;;  %s7169_s14 = sld [smem:[#allocation12_spill]] }
 0x43d   :  { %4987 = vmatprep.mubr.msk.bf16.mxu1 %vm5582_vm1, %v7149_v3 }
 0x43f   :  { %4974 = vmatmul.mubr.msk.bf16.gmra.mrb[72].mxu0 %vm515_vm7, %v5404_v11 }
 0x440   :  { %5033 = vmatprep.mubr.msk.bf16.mxu0 %vm5582_vm1, %v7149_v3 }
 0x444   :  { %4988 = vmatmul.mubr.msk.bf16.vlgmr.msra.gmra.mrb[40].mxu1 %vm1148_vm8, %v5407_v13 }
 0x445   :  { %4991 = vmatprep.mubr.msk.bf16.mxu1 %vm5582_vm1, %v7149_v3  ;;  %5070 = vmatpush3.bf16.msra.mxu1 %v5857_v17  ;;  %v5411_v17 = vld [vmem:[%s5632_s3 + $0x10] sm:$0xff]  }
 0x446   :  { %5071 = vmatprep.subr.bf16.mxu1 %v7149_v3 }
 0x447   :  { %5034 = vmatmul.mubr.msk.bf16.vlgmr.msra.gmra.mrb[76].mxu0 %vm1148_vm8, %v5408_v18 }
 0x448   :  { %5037 = vmatprep.mubr.msk.bf16.mxu0 %vm5582_vm1, %v7149_v3  ;;  %5116 = vmatpush3.bf16.msra.mxu0 %v6098_v60 }
 0x449   :  { %5072 = vmatpush3.bf16.msra.mxu1 %v5866_v19  ;;  %v5412_v19 = vld [vmem:[%s5637_s8 + $0x10] sm:$0xff]   ;;  %5191 = vmatprep.subr.bf16.mxu0 %v7149_v3 }
 0x44a   :  { %5073 = vmatprep.subr.bf16.mxu1 %v7149_v3 }
 0x44c   :  { %4992 = vmatmul.mubr.msk.bf16.gmra.mrb[44].mxu1 %vm1148_vm8, %v5409_v24 }
 0x44d   :  { %4995 = vmatprep.mubr.msk.bf16.mxu1 %vm5582_vm1, %v7149_v3  ;;  %5074 = vmatpush3.bf16.msra.mxu1 %v5877_v21  ;;  %v5413_v21 = vld [vmem:[%s5632_s3 + $0x18] sm:$0xff]   ;;  %s7167_s3 = sld [smem:[#allocation7_spill]] }
 0x44e   :  { %5075 = vmatprep.subr.bf16.mxu1 %v7149_v3 }
 0x44f   :  { %5038 = vmatmul.mubr.msk.bf16.gmra.mrb[80].mxu0 %vm1148_vm8, %v5410_v29 }
 0x450   :  { %5041 = vmatprep.mubr.msk.bf16.mxu0 %vm5582_vm1, %v7149_v3 }
 0x451   :  { %5076 = vmatpush3.bf16.msra.mxu1 %v5888_v23  ;;  %v5414_v23 = vld [vmem:[%s5637_s8 + $0x18] sm:$0xff]   ;;  %s7168_s8 = sld [smem:[#allocation8_spill]] }
 0x452   :  { %5077 = vmatprep.subr.bf16.mxu1 %v7149_v3 }
 0x454   :  { %4996 = vmatmul.mubr.msk.bf16.gmra.mrb[48].mxu1 %vm1148_vm8, %v5411_v17 }
 0x455   :  { %4999 = vmatprep.mubr.msk.bf16.mxu1 %vm5582_vm1, %v7149_v3  ;;  %5078 = vmatpush3.bf16.msra.mxu1 %v5906_v31 }
 0x456   :  { %5153 = vmatprep.subr.bf16.mxu1 %v7149_v3 }
 0x457   :  { %5042 = vmatmul.mubr.msk.bf16.gmra.mrb[84].mxu0 %vm1148_vm8, %v5412_v19 }
 0x458   :  { %5045 = vmatprep.mubr.msk.bf16.mxu0 %vm5582_vm1, %v7149_v3 }
 0x45c   :  { %5000 = vmatmul.mubr.msk.bf16.gmra.mrb[52].mxu1 %vm1148_vm8, %v5413_v21 }
 0x45d   :  { %5003 = vmatprep.mubr.msk.bf16.mxu1 %vm5582_vm1, %v7149_v3 }
 0x45f   :  { %5046 = vmatmul.mubr.msk.bf16.gmra.mrb[88].mxu0 %vm1148_vm8, %v5414_v23 }
 0x460   :  { %5049 = vmatprep.mubr.msk.bf16.mxu0 %vm5582_vm1, %v7149_v3 }
 0x464   :  { %5004 = vmatmul.mubr.msk.bf16.gmra.mrb[56].mxu1 %vm1148_vm8, %v5415_v30 }
 0x465   :  { %5007 = vmatprep.mubr.msk.bf16.mxu1 %vm5582_vm1, %v7149_v3 }
 0x467   :  { %5050 = vmatmul.mubr.msk.bf16.gmra.mrb[92].mxu0 %vm1148_vm8, %v5416_v33 }
 0x468   :  { %5053 = vmatprep.mubr.msk.bf16.mxu0 %vm5582_vm1, %v7149_v3 }
 0x46c   :  { %5008 = vmatmul.mubr.msk.bf16.gmra.mrb[60].mxu1 %vm1148_vm8, %v5417_v34 }
 0x46d   :  { %5011 = vmatprep.mubr.msk.bf16.mxu1 %vm5582_vm1, %v7149_v3 }
 0x46f   :  { %5054 = vmatmul.mubr.msk.bf16.gmra.mrb[96].mxu0 %vm1148_vm8, %v5418_v36 }
 0x470   :  { %5057 = vmatprep.mubr.msk.bf16.mxu0 %vm5582_vm1, %v7149_v3 }
 0x474   :  { %5012 = vmatmul.mubr.msk.bf16.gmra.mrb[64].mxu1 %vm1148_vm8, %v5419_v37 }
 0x475   :  { %5015 = vmatprep.mubr.msk.bf16.mxu1 %vm5582_vm1, %v7149_v3 }
 0x477   :  { %5058 = vmatmul.mubr.msk.bf16.gmra.mrb[100].mxu0 %vm1148_vm8, %v5420_v41 }
 0x478   :  { %5061 = vmatprep.mubr.msk.bf16.mxu0 %vm5582_vm1, %v7149_v3 }
 0x47c   :  { %5016 = vmatmul.mubr.msk.bf16.gmra.mrb[68].mxu1 %vm1148_vm8, %v5421_v42 }
 0x47d   :  { %5019 = vmatprep.mubr.msk.bf16.mxu1 %vm5582_vm1, %v7149_v3 }
 0x47f   :  { %5062 = vmatmul.mubr.msk.bf16.gmra.mrb[104].mxu0 %vm1148_vm8, %v5422_v47 }
 0x480   :  { %5065 = vmatprep.mubr.msk.bf16.mxu0 %vm5582_vm1, %v7149_v3 }
 0x484   :  { %5020 = vmatmul.mubr.msk.bf16.gmra.mrb[72].mxu1 %vm1148_vm8, %v5423_v48 }
 0x485   :  { %5079 = vmatprep.mubr.msk.bf16.mxu1 %vm5582_vm1, %v7149_v3 }
 0x487   :  { %5066 = vmatmul.mubr.msk.bf16.gmra.mrb[108].mxu0 %vm1148_vm8, %v5424_v50 }
 0x488   :  { %5117 = vmatprep.mubr.msk.bf16.mxu0 %vm5582_vm1, %v7149_v3 }
 0x48c   :  { %5080 = vmatmul.mubr.msk.bf16.vlgmr.msra.gmra.mrb[76].mxu1 %vm1148_vm8, %v5425_v51 }
 0x48d   :  { %5083 = vmatprep.mubr.msk.bf16.mxu1 %vm5582_vm1, %v7149_v3  ;;  %5154 = vmatpush3.bf16.msra.mxu1 %v6093_v57 }
 0x494   :  { %5084 = vmatmul.mubr.msk.bf16.gmra.mrb[80].mxu1 %vm1148_vm8, %v5426_v53 }
 0x495   :  { %5087 = vmatprep.mubr.msk.bf16.mxu1 %vm5582_vm1, %v7149_v3 }
 0x49c   :  { %5088 = vmatmul.mubr.msk.bf16.gmra.mrb[84].mxu1 %vm1148_vm8, %v5427_v54 }
 0x49d   :  { %5091 = vmatprep.mubr.msk.bf16.mxu1 %vm5582_vm1, %v7149_v3 }
 0x4a4   :  { %5092 = vmatmul.mubr.msk.bf16.gmra.mrb[88].mxu1 %vm1148_vm8, %v5428_v62 }
 0x4a5   :  { %5095 = vmatprep.mubr.msk.bf16.mxu1 %vm5582_vm1, %v7149_v3 }
 0x4ac   :  { %5096 = vmatmul.mubr.msk.bf16.gmra.mrb[92].mxu1 %vm1148_vm8, %v5429_v63 }
 0x4ad   :  { %5099 = vmatprep.mubr.msk.bf16.mxu1 %vm5582_vm1, %v7149_v3 }
 0x4b4   :  { %5100 = vmatmul.mubr.msk.bf16.gmra.mrb[96].mxu1 %vm1148_vm8, %v5430_v1 }
 0x4b5   :  { %5103 = vmatprep.mubr.msk.bf16.mxu1 %vm5582_vm1, %v7149_v3 }
 0x4bc   :  { %5104 = vmatmul.mubr.msk.bf16.gmra.mrb[100].mxu1 %vm1148_vm8, %v5431_v2 }
 0x4bd   :  { %5107 = vmatprep.mubr.msk.bf16.mxu1 %vm5582_vm1, %v7149_v3 }
 0x4c4   :  { %5108 = vmatmul.mubr.msk.bf16.gmra.mrb[104].mxu1 %vm1148_vm8, %v5432_v6 }
 0x4c5   :  { %5111 = vmatprep.mubr.msk.bf16.mxu1 %vm5582_vm1, %v7149_v3 }
 0x4cc   :  { %5112 = vmatmul.mubr.msk.bf16.gmra.mrb[108].mxu1 %vm1148_vm8, %v5433_v8 }
 0x4cd   :  { %5155 = vmatprep.mubr.msk.bf16.mxu1 %vm5582_vm1, %v7149_v3 }
 0x4cf   :  { %v766_v10 = vpop.f32.mrb[4].mxu1 }
 0x4d0   :  { %v767_v11 = vadd.f32 %v766_v10, %v5893_v25  ;;  %v4905_v13 = vpop.f32.mrb[5].mxu1 }
 0x4d1   :  { %v769_v14 = vpop.f32.mrb[6].mxu1 }
 0x4d2   :  { %v770_v16 = vadd.f32 %v769_v14, %v5900_v28  ;;  %v969_v18 = vpop.f32.mrb[40].mxu0  ;;  %v4906_v22 = vpop.f32.mrb[7].mxu1 }
 0x4d3   :  { %v6131_v24 = vadd.f32 %v969_v18, %v767_v11  ;;  %v4943_v27 = vpop.f32.mrb[41].mxu0 }
 0x4d4   :  { %v972_v29 = vpop.f32.mrb[42].mxu0 }
 0x4d5   :  { %v6133_v17 = vadd.f32 %v972_v29, %v770_v16  ;;  %v4944_v19 = vpop.f32.mrb[43].mxu0 }
 0x4d7   :  { %v774_v21 = vpop.f32.mrb[8].mxu1 }
 0x4d8   :  { %v775_v23 = vadd.f32 %v774_v21, %v5916_v32  ;;  %v4909_v30 = vpop.f32.mrb[9].mxu1 }
 0x4d9   :  { %v777_v33 = vpop.f32.mrb[10].mxu1 }
 0x4da   :  { %v778_v25 = vadd.f32 %v777_v33, %v5922_v35  ;;  %v977_v34 = vpop.f32.mrb[44].mxu0  ;;  %v4910_v36 = vpop.f32.mrb[11].mxu1 }
 0x4db   :  { %v6137_v37 = vadd.f32 %v977_v34, %v775_v23  ;;  %v4947_v28 = vpop.f32.mrb[45].mxu0 }
 0x4dc   :  { %v980_v41 = vpop.f32.mrb[46].mxu0 }
 0x4dd   :  { %v6139_v42 = vadd.f32 %v980_v41, %v778_v25  ;;  %v4948_v47 = vpop.f32.mrb[47].mxu0 }
 0x4df   :  { %v782_v48 = vpop.f32.mrb[12].mxu1 }
 0x4e0   :  { %v783_v50 = vadd.f32 %v782_v48, %v5930_v40  ;;  %v4913_v51 = vpop.f32.mrb[13].mxu1 }
 0x4e1   :  { %v785_v53 = vpop.f32.mrb[14].mxu1 }
 0x4e2   :  { %v786_v32 = vadd.f32 %v785_v53, %v5935_v46  ;;  %v985_v54 = vpop.f32.mrb[48].mxu0  ;;  %v4914_v56 = vpop.f32.mrb[15].mxu1 }
 0x4e3   :  { %v6143_v59 = vadd.f32 %v985_v54, %v783_v50  ;;  %v4951_v35 = vpop.f32.mrb[49].mxu0 }
 0x4e4   :  { %v988_v62 = vpop.f32.mrb[50].mxu0 }
 0x4e5   :  { %v6145_v63 = vadd.f32 %v988_v62, %v786_v32  ;;  %v4952_v1 = vpop.f32.mrb[51].mxu0 }
 0x4e7   :  { %v790_v2 = vpop.f32.mrb[16].mxu1 }
 0x4e8   :  { %v791_v6 = vadd.f32 %v790_v2, %v5942_v49  ;;  %v4917_v8 = vpop.f32.mrb[17].mxu1 }
 0x4e9   :  { %v793_v10 = vpop.f32.mrb[18].mxu1 }
 0x4ea   :  { %v794_v40 = vadd.f32 %v793_v10, %v5947_v52  ;;  %v993_v11 = vpop.f32.mrb[52].mxu0  ;;  %v4918_v13 = vpop.f32.mrb[19].mxu1 }
 0x4eb   :  { %v6149_v14 = vadd.f32 %v993_v11, %v791_v6  ;;  %v4955_v46 = vpop.f32.mrb[53].mxu0 }
 0x4ec   :  { %v996_v16 = vpop.f32.mrb[54].mxu0 }
 0x4ed   :  { %v6151_v18 = vadd.f32 %v996_v16, %v794_v40  ;;  %v4956_v22 = vpop.f32.mrb[55].mxu0 }
 0x4ef   :  { %v798_v27 = vpop.f32.mrb[20].mxu1 }
 0x4f0   :  { %v799_v29 = vadd.f32 %v798_v27, %v5954_v55  ;;  %v4921_v19 = vpop.f32.mrb[21].mxu1 }
 0x4f1   :  { %v801_v21 = vpop.f32.mrb[22].mxu1 }
 0x4f2   :  { %v802_v49 = vadd.f32 %v801_v21, %v5959_v58  ;;  %v1001_v23 = vpop.f32.mrb[56].mxu0  ;;  %v4922_v30 = vpop.f32.mrb[23].mxu1 }
 0x4f3   :  { %v6155_v33 = vadd.f32 %v1001_v23, %v799_v29  ;;  %v4959_v52 = vpop.f32.mrb[57].mxu0 }
 0x4f4   :  { %v1004_v25 = vpop.f32.mrb[58].mxu0 }
 0x4f5   :  { %v6157_v34 = vadd.f32 %v1004_v25, %v802_v49  ;;  %v4960_v36 = vpop.f32.mrb[59].mxu0 }
 0x4f7   :  { %v806_v28 = vpop.f32.mrb[24].mxu1 }
 0x4f8   :  { %v807_v41 = vadd.f32 %v806_v28, %v5966_v61  ;;  %v4925_v47 = vpop.f32.mrb[25].mxu1 }
 0x4f9   :  { %v809_v48 = vpop.f32.mrb[26].mxu1 }
 0x4fa   :  { %v810_v55 = vadd.f32 %v809_v48, %v5971_v0  ;;  %v1009_v50 = vpop.f32.mrb[60].mxu0  ;;  %v4926_v51 = vpop.f32.mrb[27].mxu1 }
 0x4fb   :  { %v6161_v53 = vadd.f32 %v1009_v50, %v807_v41  ;;  %v4963_v58 = vpop.f32.mrb[61].mxu0 }
 0x4fc   :  { %v1012_v32 = vpop.f32.mrb[62].mxu0 }
 0x4fd   :  { %v6163_v54 = vadd.f32 %v1012_v32, %v810_v55  ;;  %v4964_v56 = vpop.f32.mrb[63].mxu0 }
 0x4ff   :  { %v814_v35 = vpop.f32.mrb[28].mxu1 }
 0x500   :  { %v815_v62 = vadd.f32 %v814_v35, %v5978_v5  ;;  %v4929_v1 = vpop.f32.mrb[29].mxu1 }
 0x501   :  { %v817_v2 = vpop.f32.mrb[30].mxu1  ;;  %v1975_v1 = vld [vmem:[%s7164_s21] sm:$0x1] }
 0x502   :  { %v818_v61 = vadd.f32 %v817_v2, %v5983_v9  ;;  %v1017_v6 = vpop.f32.mrb[64].mxu0  ;;  %v4930_v8 = vpop.f32.mrb[31].mxu1 }
 0x503   :  { %v6167_v10 = vadd.f32 %v1017_v6, %v815_v62  ;;  %v4967_v0 = vpop.f32.mrb[65].mxu0  ;;  %v6188_v8 = vsel %vm1731_vm9, %v1975_v1, 0 }
 0x504   :  { %v1020_v40 = vpop.f32.mrb[66].mxu0 }
 0x505   :  { %v6169_v11 = vadd.f32 %v1020_v40, %v818_v61  ;;  %v4968_v13 = vpop.f32.mrb[67].mxu0 }
 0x507   :  { %v822_v46 = vpop.f32.mrb[32].mxu1 }
 0x508   :  { %v823_v16 = vadd.f32 %v822_v46, %v5990_v12  ;;  %v4933_v22 = vpop.f32.mrb[33].mxu1 }
 0x509   :  { %v825_v27 = vpop.f32.mrb[34].mxu1 }
 0x50a   :  { %v826_v5 = vadd.f32 %v825_v27, %v5995_v15  ;;  %v1025_v29 = vpop.f32.mrb[68].mxu0  ;;  %v4934_v19 = vpop.f32.mrb[35].mxu1 }
 0x50b   :  { %v6173_v21 = vadd.f32 %v1025_v29, %v823_v16  ;;  %v4971_v9 = vpop.f32.mrb[69].mxu0 }
 0x50c   :  { %v1028_v49 = vpop.f32.mrb[70].mxu0 }
 0x50d   :  { %v6175_v23 = vadd.f32 %v1028_v49, %v826_v5  ;;  %v4972_v30 = vpop.f32.mrb[71].mxu0  ;;  %v2147_v49 = vld [vmem:[%s7165_s25] sm:$0xff] }
 0x50e   :  { %v2148_v30 = vld [vmem:[%s7165_s25 + $0x8] sm:$0xff] }
 0x50f   :  { %v830_v52 = vpop.f32.mrb[36].mxu1 }
 0x510   :  { %v831_v25 = vadd.f32 %v830_v52, %v5999_v20  ;;  %v4937_v36 = vpop.f32.mrb[37].mxu1 }
 0x511   :  { %v833_v28 = vpop.f32.mrb[38].mxu1 }
 0x512   :  { %v834_v12 = vadd.f32 %v833_v28, %v6010_v26  ;;  %v1033_v41 = vpop.f32.mrb[72].mxu0  ;;  %v4938_v47 = vpop.f32.mrb[39].mxu1 }
 0x513   :  { %v6179_v15 = vadd.f32 %v1033_v41, %v831_v25  ;;  %v4975_v48 = vpop.f32.mrb[73].mxu0  ;;  %v5588_v25 = vmov 0   ;;  %v2149_v47 = vld [vmem:[%s7165_s25 + $0x10] sm:$0xff] }
 0x514   :  { %v1036_v55 = vpop.f32.mrb[74].mxu0  ;;  %5369 = vset.pattern.permute.xlu1 %v5588_v25  ;;  %5370 = vset.pattern.permute.xlu0 %v5588_v25 }
 0x515   :  { %v6181_v50 = vadd.f32 %v1036_v55, %v834_v12  ;;  %v4976_v51 = vpop.f32.mrb[75].mxu0  ;;  %2167 = vperm.xlu1 %5369, %v2147_v49   ;;  %2172 = vperm.xlu0 %5370, %v2148_v30   ;;  %v2151_v55 = vld [vmem:[%s7165_s25 + $0x20] sm:$0xff] }
 0x516   :  { %2599 = vmatprep.subr.bf16.mxu1 %v5588_v25 }
 0x517   :  { %v1213_v58 = vpop.f32.mrb[40].mxu1 }
 0x518   :  { %v4989_v32 = vpop.f32.mrb[41].mxu1 }
 0x519   :  { %v1216_v56 = vpop.f32.mrb[42].mxu1  ;;  %2177 = vperm.xlu1 %5369, %v2149_v47   ;;  %2187 = vperm.xlu0 %5370, %v2151_v55  }
 0x51a   :  { %v1417_v35 = vpop.f32.mrb[76].mxu0  ;;  %v1284_v20 = vpack.c.bf16 %v1216_v56, %v1213_v58  ;;  %v4990_v62 = vpop.f32.mrb[43].mxu1  ;;  %v2150_v56 = vld [vmem:[%s7165_s25 + $0x18] sm:$0xff] }
 0x51b   :  { %v5035_v2 = vpop.f32.mrb[77].mxu0 }
 0x51c   :  { %v1420_v61 = vpop.f32.mrb[78].mxu0  ;;  %5156 = vmatmul.mubr.msk.bf16.vlgmr.msra.gmra.mrb[112].mxu1 %vm1703_vm10, %v1284_v20  ;;  %v2153_v20 = vld [vmem:[%s7165_s25 + $0x30] sm:$0xff] }
 0x51d   :  { %v1488_v26 = vpack.c.bf16 %v1420_v61, %v1417_v35  ;;  %v5036_v6 = vpop.f32.mrb[79].mxu0  ;;  %5159 = vmatprep.mubr.msk.bf16.mxu1 %vm5582_vm1, %v7149_v3  ;;  %2182 = vperm.xlu1 %5369, %v2150_v56  }
 0x51e   :  { %v2152_v6 = vld [vmem:[%s7165_s25 + $0x28] sm:$0xff]  ;;  %2197 = vperm.xlu0 %5370, %v2153_v20  }
 0x51f   :  { %5118 = vmatmul.mubr.msk.bf16.vlgmr.msra.gmra.mrb[112].mxu0 %vm1703_vm10, %v1488_v26  ;;  %v1221_v0 = vpop.f32.mrb[44].mxu1 }
 0x520   :  { %5121 = vmatprep.mubr.msk.bf16.mxu0 %vm5582_vm1, %v7149_v3  ;;  %v4993_v40 = vpop.f32.mrb[45].mxu1  ;;  %5192 = vmatpush3.bf16.msra.mxu0 %v6188_v8 }
 0x521   :  { %v1224_v13 = vpop.f32.mrb[46].mxu1  ;;  %2848 = vmatprep.subr.bf16.mxu0 %v5588_v25  ;;  %v2155_v40 = vld [vmem:[%s7165_s25 + $0x40] sm:$0xff]  ;;  %2192 = vperm.xlu1 %5369, %v2152_v6  }
 0x522   :  { %v1425_v46 = vpop.f32.mrb[80].mxu0  ;;  %v1285_v16 = vpack.c.bf16 %v1224_v13, %v1221_v0  ;;  %v4994_v22 = vpop.f32.mrb[47].mxu1  ;;  %2207 = vperm.xlu0 %5370, %v2155_v40  }
 0x523   :  { %v5039_v27 = vpop.f32.mrb[81].mxu0  ;;  %v2154_v22 = vld [vmem:[%s7165_s25 + $0x38] sm:$0xff] }
 0x524   :  { %v1428_v5 = vpop.f32.mrb[82].mxu0  ;;  %5160 = vmatmul.mubr.msk.bf16.gmra.mrb[116].mxu1 %vm1703_vm10, %v1285_v16 }
 0x525   :  { %v1489_v29 = vpack.c.bf16 %v1428_v5, %v1425_v46  ;;  %v5040_v19 = vpop.f32.mrb[83].mxu0  ;;  %5163 = vmatprep.mubr.msk.bf16.mxu1 %vm5582_vm1, %v7149_v3  ;;  %v2157_v5 = vld [vmem:[%s7165_s25 + $0x50] sm:$0xff]  ;;  %2202 = vperm.xlu1 %5369, %v2154_v22  }
 0x526   :  { %2217 = vperm.xlu0 %5370, %v2157_v5   ;;  %v2164_v5 = vld [vmem:[%s7165_s25 + $0x88] sm:$0xff] }
 0x527   :  { %5122 = vmatmul.mubr.msk.bf16.gmra.mrb[116].mxu0 %vm1703_vm10, %v1489_v29  ;;  %v1229_v9 = vpop.f32.mrb[48].mxu1 }
 0x528   :  { %5125 = vmatprep.mubr.msk.bf16.mxu0 %vm5582_vm1, %v7149_v3  ;;  %v4997_v52 = vpop.f32.mrb[49].mxu1 }
 0x529   :  { %v1232_v36 = vpop.f32.mrb[50].mxu1  ;;  %v2156_v52 = vld [vmem:[%s7165_s25 + $0x48] sm:$0xff] }
 0x52a   :  { %v1433_v28 = vpop.f32.mrb[84].mxu0  ;;  %v1286_v12 = vpack.c.bf16 %v1232_v36, %v1229_v9  ;;  %v4998_v41 = vpop.f32.mrb[51].mxu1  ;;  %2212 = vperm.xlu1 %5369, %v2156_v52  }
 0x52b   :  { %v5043_v48 = vpop.f32.mrb[85].mxu0 }
 0x52c   :  { %v1436_v51 = vpop.f32.mrb[86].mxu0  ;;  %5164 = vmatmul.mubr.msk.bf16.gmra.mrb[120].mxu1 %vm1703_vm10, %v1286_v12  ;;  %v2158_v48 = vld [vmem:[%s7165_s25 + $0x58] sm:$0xff] }
 0x52d   :  { %v1490_v58 = vpack.c.bf16 %v1436_v51, %v1433_v28  ;;  %v5044_v32 = vpop.f32.mrb[87].mxu0  ;;  %5167 = vmatprep.mubr.msk.bf16.mxu1 %vm5582_vm1, %v7149_v3  ;;  %v2159_v28 = vld [vmem:[%s7165_s25 + $0x60] sm:$0xff]  ;;  %v2161_v51 = vld [vmem:[%s7165_s25 + $0x70] sm:$0xff] }
 0x52e   :  { %2227 = vperm.xlu0 %5370, %v2159_v28   ;;  %2222 = vperm.xlu1 %5369, %v2158_v48  }
 0x52f   :  { %5126 = vmatmul.mubr.msk.bf16.gmra.mrb[120].mxu0 %vm1703_vm10, %v1490_v58  ;;  %v1237_v35 = vpop.f32.mrb[52].mxu1 }
 0x530   :  { %5129 = vmatprep.mubr.msk.bf16.mxu0 %vm5582_vm1, %v7149_v3  ;;  %v5001_v62 = vpop.f32.mrb[53].mxu1 }
 0x531   :  { %v1240_v1 = vpop.f32.mrb[54].mxu1  ;;  %v2160_v62 = vld [vmem:[%s7165_s25 + $0x68] sm:$0xff] }
 0x532   :  { %v1441_v2 = vpop.f32.mrb[88].mxu0  ;;  %v1287_v61 = vpack.c.bf16 %v1240_v1, %v1237_v35  ;;  %v5002_v26 = vpop.f32.mrb[55].mxu1  ;;  %2237 = vperm.xlu0 %5370, %v2161_v51   ;;  %2232 = vperm.xlu1 %5369, %v2160_v62  }
 0x533   :  { %v5047_v0 = vpop.f32.mrb[89].mxu0 }
 0x534   :  { %v1444_v13 = vpop.f32.mrb[90].mxu0  ;;  %5168 = vmatmul.mubr.msk.bf16.gmra.mrb[124].mxu1 %vm1703_vm10, %v1287_v61  ;;  %v2162_v0 = vld [vmem:[%s7165_s25 + $0x78] sm:$0xff] }
 0x535   :  { %v1491_v46 = vpack.c.bf16 %v1444_v13, %v1441_v2  ;;  %v5048_v16 = vpop.f32.mrb[91].mxu0  ;;  %5171 = vmatprep.mubr.msk.bf16.mxu1 %vm5582_vm1, %v7149_v3  ;;  %v2163_v2 = vld [vmem:[%s7165_s25 + $0x80] sm:$0xff] }
 0x536   :  { %2247 = vperm.xlu0 %5370, %v2163_v2   ;;  %2242 = vperm.xlu1 %5369, %v2162_v0  }
 0x537   :  { %5130 = vmatmul.mubr.msk.bf16.gmra.mrb[124].mxu0 %vm1703_vm10, %v1491_v46  ;;  %v1245_v27 = vpop.f32.mrb[56].mxu1 }
 0x538   :  { %5133 = vmatprep.mubr.msk.bf16.mxu0 %vm5582_vm1, %v7149_v3  ;;  %v5005_v29 = vpop.f32.mrb[57].mxu1 }
 0x539   :  { %v1248_v19 = vpop.f32.mrb[58].mxu1 }
 0x53a   :  { %v1449_v9 = vpop.f32.mrb[92].mxu0  ;;  %v1288_v49 = vpack.c.bf16 %v1248_v19, %v1245_v27  ;;  %v5006_v30 = vpop.f32.mrb[59].mxu1  ;;  %2252 = vperm.xlu1 %5369, %v2164_v5  }
 0x53b   :  { %v5051_v36 = vpop.f32.mrb[93].mxu0 }
 0x53c   :  { %v1452_v12 = vpop.f32.mrb[94].mxu0  ;;  %5172 = vmatmul.mubr.msk.bf16.gmra.mrb[128].mxu1 %vm1703_vm10, %v1288_v49 }
 0x53d   :  { %v1492_v41 = vpack.c.bf16 %v1452_v12, %v1449_v9  ;;  %v5052_v47 = vpop.f32.mrb[95].mxu0  ;;  %5175 = vmatprep.mubr.msk.bf16.mxu1 %vm5582_vm1, %v7149_v3 }
 0x53f   :  { %5134 = vmatmul.mubr.msk.bf16.gmra.mrb[128].mxu0 %vm1703_vm10, %v1492_v41  ;;  %v1253_v55 = vpop.f32.mrb[60].mxu1 }
 0x540   :  { %5137 = vmatprep.mubr.msk.bf16.mxu0 %vm5582_vm1, %v7149_v3  ;;  %v5009_v58 = vpop.f32.mrb[61].mxu1 }
 0x541   :  { %v1256_v32 = vpop.f32.mrb[62].mxu1 }
 0x542   :  { %v1457_v56 = vpop.f32.mrb[96].mxu0  ;;  %v1289_v35 = vpack.c.bf16 %v1256_v32, %v1253_v55  ;;  %v5010_v20 = vpop.f32.mrb[63].mxu1 }
 0x543   :  { %v5055_v1 = vpop.f32.mrb[97].mxu0 }
 0x544   :  { %v1460_v61 = vpop.f32.mrb[98].mxu0  ;;  %5176 = vmatmul.mubr.msk.bf16.gmra.mrb[132].mxu1 %vm1703_vm10, %v1289_v35 }
 0x545   :  { %v1493_v26 = vpack.c.bf16 %v1460_v61, %v1457_v56  ;;  %v5056_v6 = vpop.f32.mrb[99].mxu0  ;;  %5179 = vmatprep.mubr.msk.bf16.mxu1 %vm5582_vm1, %v7149_v3 }
 0x547   :  { %5138 = vmatmul.mubr.msk.bf16.gmra.mrb[132].mxu0 %vm1703_vm10, %v1493_v26  ;;  %v1261_v40 = vpop.f32.mrb[64].mxu1 }
 0x548   :  { %5141 = vmatprep.mubr.msk.bf16.mxu0 %vm5582_vm1, %v7149_v3  ;;  %v5013_v13 = vpop.f32.mrb[65].mxu1 }
 0x549   :  { %v1264_v46 = vpop.f32.mrb[66].mxu1 }
 0x54a   :  { %v1465_v16 = vpop.f32.mrb[100].mxu0  ;;  %v1290_v22 = vpack.c.bf16 %v1264_v46, %v1261_v40  ;;  %v5014_v27 = vpop.f32.mrb[67].mxu1 }
 0x54b   :  { %v5059_v29 = vpop.f32.mrb[101].mxu0 }
 0x54c   :  { %v1468_v19 = vpop.f32.mrb[102].mxu0  ;;  %5180 = vmatmul.mubr.msk.bf16.gmra.mrb[136].mxu1 %vm1703_vm10, %v1290_v22 }
 0x54d   :  { %v1494_v9 = vpack.c.bf16 %v1468_v19, %v1465_v16  ;;  %v5060_v49 = vpop.f32.mrb[103].mxu0  ;;  %5183 = vmatprep.mubr.msk.bf16.mxu1 %vm5582_vm1, %v7149_v3 }
 0x54f   :  { %5142 = vmatmul.mubr.msk.bf16.gmra.mrb[136].mxu0 %vm1703_vm10, %v1494_v9  ;;  %v1269_v30 = vpop.f32.mrb[68].mxu1 }
 0x550   :  { %5145 = vmatprep.mubr.msk.bf16.mxu0 %vm5582_vm1, %v7149_v3  ;;  %v5017_v52 = vpop.f32.mrb[69].mxu1 }
 0x551   :  { %v1272_v36 = vpop.f32.mrb[70].mxu1 }
 0x552   :  { %v1473_v28 = vpop.f32.mrb[104].mxu0  ;;  %v1291_v12 = vpack.c.bf16 %v1272_v36, %v1269_v30  ;;  %v5018_v41 = vpop.f32.mrb[71].mxu1 }
 0x553   :  { %v5063_v47 = vpop.f32.mrb[105].mxu0 }
 0x554   :  { %v1476_v48 = vpop.f32.mrb[106].mxu0  ;;  %5184 = vmatmul.mubr.msk.bf16.gmra.mrb[140].mxu1 %vm1703_vm10, %v1291_v12 }
 0x555   :  { %v1495_v55 = vpack.c.bf16 %v1476_v48, %v1473_v28  ;;  %v5064_v51 = vpop.f32.mrb[107].mxu0  ;;  %5187 = vmatprep.mubr.msk.bf16.mxu1 %vm5582_vm1, %v7149_v3 }
 0x557   :  { %5146 = vmatmul.mubr.msk.bf16.gmra.mrb[140].mxu0 %vm1703_vm10, %v1495_v55  ;;  %v1277_v58 = vpop.f32.mrb[72].mxu1 }
 0x558   :  { %5149 = vmatprep.mubr.msk.bf16.mxu0 %vm5582_vm1, %v7149_v3  ;;  %v5021_v32 = vpop.f32.mrb[73].mxu1 }
 0x559   :  { %v1280_v56 = vpop.f32.mrb[74].mxu1 }
 0x55a   :  { %v1481_v35 = vpop.f32.mrb[108].mxu0  ;;  %v1292_v20 = vpack.c.bf16 %v1280_v56, %v1277_v58  ;;  %v5022_v62 = vpop.f32.mrb[75].mxu1 }
 0x55b   :  { %v5067_v1 = vpop.f32.mrb[109].mxu0 }
 0x55c   :  { %v1484_v2 = vpop.f32.mrb[110].mxu0  ;;  %5188 = vmatmul.mubr.msk.bf16.gmra.mrb[144].mxu1 %vm1703_vm10, %v1292_v20 }
 0x55d   :  { %v1496_v61 = vpack.c.bf16 %v1484_v2, %v1481_v35  ;;  %v5068_v26 = vpop.f32.mrb[111].mxu0 }
 0x55f   :  { %5150 = vmatmul.mubr.msk.bf16.gmra.mrb[144].mxu0 %vm1703_vm10, %v1496_v61  ;;  %v1621_v6 = vpop.f32.mrb[76].mxu1 }
 0x560   :  { %v5081_v0 = vpop.f32.mrb[77].mxu1  ;;  %5193 = vmatprep.mubr.msk.bf16.mxu0 %vm5582_vm1, %v7149_v3 }
 0x561   :  { %v1624_v40 = vpop.f32.mrb[78].mxu1 }
 0x562   :  { %v1692_v13 = vpack.c.bf16 %v1624_v40, %v1621_v6  ;;  %v5082_v46 = vpop.f32.mrb[79].mxu1 }
 0x567   :  { %5194 = vmatmul.mubr.msk.bf16.vlgmr.msra.gmra.mrb[148].mxu0 %vm1703_vm10, %v1692_v13  ;;  %v1629_v16 = vpop.f32.mrb[80].mxu1 }
 0x568   :  { %v5085_v22 = vpop.f32.mrb[81].mxu1  ;;  %5197 = vmatprep.mubr.msk.bf16.mxu0 %vm5582_vm1, %v7149_v3 }
 0x569   :  { %v1632_v27 = vpop.f32.mrb[82].mxu1 }
 0x56a   :  { %v1693_v5 = vpack.c.bf16 %v1632_v27, %v1629_v16  ;;  %v5086_v29 = vpop.f32.mrb[83].mxu1 }
 0x56f   :  { %5198 = vmatmul.mubr.msk.bf16.gmra.mrb[152].mxu0 %vm1703_vm10, %v1693_v5  ;;  %v1637_v19 = vpop.f32.mrb[84].mxu1 }
 0x570   :  { %v5089_v9 = vpop.f32.mrb[85].mxu1  ;;  %5201 = vmatprep.mubr.msk.bf16.mxu0 %vm5582_vm1, %v7149_v3 }
 0x571   :  { %v1640_v49 = vpop.f32.mrb[86].mxu1 }
 0x572   :  { %v1694_v30 = vpack.c.bf16 %v1640_v49, %v1637_v19  ;;  %v5090_v52 = vpop.f32.mrb[87].mxu1 }
 0x577   :  { %5202 = vmatmul.mubr.msk.bf16.gmra.mrb[156].mxu0 %vm1703_vm10, %v1694_v30  ;;  %v1645_v36 = vpop.f32.mrb[88].mxu1 }
 0x578   :  { %v5093_v28 = vpop.f32.mrb[89].mxu1  ;;  %5205 = vmatprep.mubr.msk.bf16.mxu0 %vm5582_vm1, %v7149_v3 }
 0x579   :  { %v1648_v12 = vpop.f32.mrb[90].mxu1 }
 0x57a   :  { %v1695_v41 = vpack.c.bf16 %v1648_v12, %v1645_v36  ;;  %v5094_v47 = vpop.f32.mrb[91].mxu1 }
 0x57f   :  { %5206 = vmatmul.mubr.msk.bf16.gmra.mrb[160].mxu0 %vm1703_vm10, %v1695_v41  ;;  %v1653_v48 = vpop.f32.mrb[92].mxu1 }
 0x580   :  { %v5097_v55 = vpop.f32.mrb[93].mxu1  ;;  %5209 = vmatprep.mubr.msk.bf16.mxu0 %vm5582_vm1, %v7149_v3 }
 0x581   :  { %v1656_v51 = vpop.f32.mrb[94].mxu1 }
 0x582   :  { %v1696_v58 = vpack.c.bf16 %v1656_v51, %v1653_v48  ;;  %v5098_v32 = vpop.f32.mrb[95].mxu1 }
 0x587   :  { %5210 = vmatmul.mubr.msk.bf16.gmra.mrb[164].mxu0 %vm1703_vm10, %v1696_v58  ;;  %v1661_v56 = vpop.f32.mrb[96].mxu1 }
 0x588   :  { %v5101_v35 = vpop.f32.mrb[97].mxu1  ;;  %5213 = vmatprep.mubr.msk.bf16.mxu0 %vm5582_vm1, %v7149_v3 }
 0x589   :  { %v1664_v20 = vpop.f32.mrb[98].mxu1 }
 0x58a   :  { %v1697_v62 = vpack.c.bf16 %v1664_v20, %v1661_v56  ;;  %v5102_v1 = vpop.f32.mrb[99].mxu1 }
 0x58f   :  { %5214 = vmatmul.mubr.msk.bf16.gmra.mrb[168].mxu0 %vm1703_vm10, %v1697_v62  ;;  %v1669_v2 = vpop.f32.mrb[100].mxu1 }
 0x590   :  { %v5105_v61 = vpop.f32.mrb[101].mxu1  ;;  %5217 = vmatprep.mubr.msk.bf16.mxu0 %vm5582_vm1, %v7149_v3 }
 0x591   :  { %v1672_v26 = vpop.f32.mrb[102].mxu1 }
 0x592   :  { %v1698_v6 = vpack.c.bf16 %v1672_v26, %v1669_v2  ;;  %v5106_v0 = vpop.f32.mrb[103].mxu1 }
 0x597   :  { %5218 = vmatmul.mubr.msk.bf16.gmra.mrb[172].mxu0 %vm1703_vm10, %v1698_v6  ;;  %v1677_v40 = vpop.f32.mrb[104].mxu1 }
 0x598   :  { %v5109_v13 = vpop.f32.mrb[105].mxu1  ;;  %5221 = vmatprep.mubr.msk.bf16.mxu0 %vm5582_vm1, %v7149_v3 }
 0x599   :  { %v1680_v46 = vpop.f32.mrb[106].mxu1 }
 0x59a   :  { %v1699_v16 = vpack.c.bf16 %v1680_v46, %v1677_v40  ;;  %v5110_v22 = vpop.f32.mrb[107].mxu1 }
 0x59f   :  { %5222 = vmatmul.mubr.msk.bf16.gmra.mrb[176].mxu0 %vm1703_vm10, %v1699_v16  ;;  %v1685_v27 = vpop.f32.mrb[108].mxu1 }
 0x5a0   :  { %v5113_v5 = vpop.f32.mrb[109].mxu1  ;;  %5225 = vmatprep.mubr.msk.bf16.mxu0 %vm5582_vm1, %v7149_v3  ;;  %v2173_v3 = vpop.permute.xlu0 %2172 }
 0x5a1   :  { %v1688_v29 = vpop.f32.mrb[110].mxu1 }
 0x5a2   :  { %v1700_v19 = vpack.c.bf16 %v1688_v29, %v1685_v27  ;;  %v5114_v9 = vpop.f32.mrb[111].mxu1 }
 0x5a7   :  { %5226 = vmatmul.mubr.msk.bf16.gmra.mrb[180].mxu0 %vm1703_vm10, %v1700_v19 }
 0x5ef   :  { %v1904_v49 = vpop.f32.mrb[112].mxu1 }
 0x5f0   :  { %v5157_v30 = vpop.f32.mrb[113].mxu1 }
 0x5f1   :  { %v1907_v52 = vpop.f32.mrb[114].mxu1 }
 0x5f2   :  { %v1769_v36 = vpop.f32.mrb[112].mxu0  ;;  %v5158_v28 = vpop.f32.mrb[115].mxu1 }
 0x5f3   :  { %v5119_v12 = vpop.f32.mrb[113].mxu0  ;;  %v6287_v41 = vadd.f32 %v1904_v49, %v1769_v36 }
 0x5f4   :  { %v1772_v47 = vpop.f32.mrb[114].mxu0 }
 0x5f5   :  { %v5120_v48 = vpop.f32.mrb[115].mxu0  ;;  %v6289_v55 = vadd.f32 %v1907_v52, %v1772_v47 }
 0x5f7   :  { %v1912_v51 = vpop.f32.mrb[116].mxu1 }
 0x5f8   :  { %v5161_v58 = vpop.f32.mrb[117].mxu1 }
 0x5f9   :  { %v1915_v32 = vpop.f32.mrb[118].mxu1 }
 0x5fa   :  { %v1777_v56 = vpop.f32.mrb[116].mxu0  ;;  %v5162_v35 = vpop.f32.mrb[119].mxu1 }
 0x5fb   :  { %v5123_v20 = vpop.f32.mrb[117].mxu0  ;;  %v6291_v62 = vadd.f32 %v1912_v51, %v1777_v56 }
 0x5fc   :  { %v1780_v1 = vpop.f32.mrb[118].mxu0 }
 0x5fd   :  { %v5124_v2 = vpop.f32.mrb[119].mxu0  ;;  %v6293_v61 = vadd.f32 %v1915_v32, %v1780_v1 }
 0x5ff   :  { %v1920_v26 = vpop.f32.mrb[120].mxu1 }
 0x600   :  { %v5165_v6 = vpop.f32.mrb[121].mxu1 }
 0x601   :  { %v1923_v0 = vpop.f32.mrb[122].mxu1 }
 0x602   :  { %v1785_v40 = vpop.f32.mrb[120].mxu0  ;;  %v5166_v13 = vpop.f32.mrb[123].mxu1 }
 0x603   :  { %v5127_v46 = vpop.f32.mrb[121].mxu0  ;;  %v6295_v16 = vadd.f32 %v1920_v26, %v1785_v40 }
 0x604   :  { %v1788_v22 = vpop.f32.mrb[122].mxu0 }
 0x605   :  { %v5128_v27 = vpop.f32.mrb[123].mxu0  ;;  %v6297_v5 = vadd.f32 %v1923_v0, %v1788_v22 }
 0x607   :  { %v1928_v29 = vpop.f32.mrb[124].mxu1 }
 0x608   :  { %v5169_v19 = vpop.f32.mrb[125].mxu1 }
 0x609   :  { %v1931_v9 = vpop.f32.mrb[126].mxu1 }
 0x60a   :  { %v1793_v49 = vpop.f32.mrb[124].mxu0  ;;  %v5170_v30 = vpop.f32.mrb[127].mxu1 }
 0x60b   :  { %v5131_v52 = vpop.f32.mrb[125].mxu0  ;;  %v6299_v36 = vadd.f32 %v1928_v29, %v1793_v49 }
 0x60c   :  { %v1796_v28 = vpop.f32.mrb[126].mxu0 }
 0x60d   :  { %v5132_v12 = vpop.f32.mrb[127].mxu0  ;;  %v6301_v47 = vadd.f32 %v1931_v9, %v1796_v28 }
 0x60f   :  { %v1936_v48 = vpop.f32.mrb[128].mxu1 }
 0x610   :  { %v5173_v51 = vpop.f32.mrb[129].mxu1 }
 0x611   :  { %v1939_v58 = vpop.f32.mrb[130].mxu1 }
 0x612   :  { %v1801_v32 = vpop.f32.mrb[128].mxu0  ;;  %v5174_v56 = vpop.f32.mrb[131].mxu1 }
 0x613   :  { %v5135_v35 = vpop.f32.mrb[129].mxu0  ;;  %v6303_v20 = vadd.f32 %v1936_v48, %v1801_v32 }
 0x614   :  { %v1804_v1 = vpop.f32.mrb[130].mxu0 }
 0x615   :  { %v5136_v2 = vpop.f32.mrb[131].mxu0  ;;  %v6305_v26 = vadd.f32 %v1939_v58, %v1804_v1 }
 0x617   :  { %v1944_v6 = vpop.f32.mrb[132].mxu1 }
 0x618   :  { %v5177_v0 = vpop.f32.mrb[133].mxu1 }
 0x619   :  { %v1947_v40 = vpop.f32.mrb[134].mxu1 }
 0x61a   :  { %v1809_v13 = vpop.f32.mrb[132].mxu0  ;;  %v5178_v46 = vpop.f32.mrb[135].mxu1 }
 0x61b   :  { %v5139_v22 = vpop.f32.mrb[133].mxu0  ;;  %v6307_v27 = vadd.f32 %v1944_v6, %v1809_v13 }
 0x61c   :  { %v1812_v29 = vpop.f32.mrb[134].mxu0 }
 0x61d   :  { %v5140_v19 = vpop.f32.mrb[135].mxu0  ;;  %v6309_v9 = vadd.f32 %v1947_v40, %v1812_v29 }
 0x61f   :  { %v1952_v49 = vpop.f32.mrb[136].mxu1 }
 0x620   :  { %v5181_v30 = vpop.f32.mrb[137].mxu1 }
 0x621   :  { %v1955_v52 = vpop.f32.mrb[138].mxu1 }
 0x622   :  { %v1817_v28 = vpop.f32.mrb[136].mxu0  ;;  %v5182_v12 = vpop.f32.mrb[139].mxu1 }
 0x623   :  { %v5143_v48 = vpop.f32.mrb[137].mxu0  ;;  %v6311_v51 = vadd.f32 %v1952_v49, %v1817_v28 }
 0x624   :  { %v1820_v58 = vpop.f32.mrb[138].mxu0 }
 0x625   :  { %v5144_v32 = vpop.f32.mrb[139].mxu0  ;;  %v6313_v56 = vadd.f32 %v1955_v52, %v1820_v58 }
 0x627   :  { %v1960_v35 = vpop.f32.mrb[140].mxu1 }
 0x628   :  { %v5185_v1 = vpop.f32.mrb[141].mxu1 }
 0x629   :  { %v1963_v2 = vpop.f32.mrb[142].mxu1 }
 0x62a   :  { %v1825_v6 = vpop.f32.mrb[140].mxu0  ;;  %v5186_v0 = vpop.f32.mrb[143].mxu1 }
 0x62b   :  { %v5147_v13 = vpop.f32.mrb[141].mxu0  ;;  %v6315_v40 = vadd.f32 %v1960_v35, %v1825_v6 }
 0x62c   :  { %v1828_v46 = vpop.f32.mrb[142].mxu0 }
 0x62d   :  { %v5148_v22 = vpop.f32.mrb[143].mxu0  ;;  %v6317_v29 = vadd.f32 %v1963_v2, %v1828_v46 }
 0x62e   :  { %v2168_v22 = vpop.permute.xlu1 %2167 }
 0x62f   :  { %v1968_v19 = vpop.f32.mrb[144].mxu1 }
 0x630   :  { %v5189_v30 = vpop.f32.mrb[145].mxu1 }
 0x631   :  { %v1971_v49 = vpop.f32.mrb[146].mxu1 }
 0x632   :  { %v1833_v28 = vpop.f32.mrb[144].mxu0  ;;  %v5190_v12 = vpop.f32.mrb[147].mxu1 }
 0x633   :  { %v5151_v48 = vpop.f32.mrb[145].mxu0  ;;  %v6319_v52 = vadd.f32 %v1968_v19, %v1833_v28 }
 0x634   :  { %v1836_v58 = vpop.f32.mrb[146].mxu0 }
 0x635   :  { %v5152_v32 = vpop.f32.mrb[147].mxu0  ;;  %v6321_v1 = vadd.f32 %v1971_v49, %v1836_v58  ;;  %v2178_v58 = vpop.permute.xlu1 %2177 }
 0x63a   :  { %v2040_v0 = vpop.f32.mrb[148].mxu0 }
 0x63b   :  { %v2111_v35 = vadd.f32 %v2040_v0, %v6287_v41  ;;  %v5195_v6 = vpop.f32.mrb[149].mxu0 }
 0x63c   :  { %v2043_v13 = vpop.f32.mrb[150].mxu0 }
 0x63d   :  { %v2129_v2 = vadd.f32 %v2111_v35, %v6131_v24  ;;  %v2112_v46 = vadd.f32 %v2043_v13, %v6289_v55  ;;  %v5196_v30 = vpop.f32.mrb[151].mxu0 }
 0x63f   :  { %v2130_v12 = vadd.f32 %v2112_v46, %v6133_v17  ;;  %v2255_v19 = vadd.f32 %v2168_v22, %v2129_v2 }
 0x641   :  { %v6327_v28 = vmax.f32 %v2255_v19, 0.0  ;;  %v2256_v48 = vadd.f32 %v2173_v3, %v2130_v12 }
 0x642   :  { %v2048_v49 = vpop.f32.mrb[152].mxu0 }
 0x643   :  { %v6329_v32 = vmax.f32 %v2256_v48, 0.0  ;;  %v2113_v41 = vadd.f32 %v2048_v49, %v6291_v62  ;;  %v5199_v0 = vpop.f32.mrb[153].mxu0  ;;  %2291 = vrot.lane.b32.xlu0 %v6327_v28, %s5580_s22  ;;  %v2183_v62 = vpop.permute.xlu1 %2182 }
 0x644   :  { %v2051_v24 = vpop.f32.mrb[154].mxu0 }
 0x645   :  { %v2131_v55 = vadd.f32 %v2113_v41, %v6137_v37  ;;  %v2114_v35 = vadd.f32 %v2051_v24, %v6293_v61  ;;  %2294 = vrot.lane.b32.xlu1 %v6329_v32, %s5580_s22  ;;  %v2481_v3 = vpack.c.bf16 %v6329_v32, %v6327_v28  ;;  %v5200_v17 = vpop.f32.mrb[155].mxu0 }
 0x647   :  { %v2132_v6 = vadd.f32 %v2114_v35, %v6139_v42  ;;  %v2257_v13 = vadd.f32 %v2178_v58, %v2131_v55  ;;  %2600 = vmatpush1.bf16.msra.mxu1 %v2481_v3  ;;  %v2188_v58 = vpop.permute.xlu0 %2187  ;;  %v2193_v0 = vpop.permute.xlu1 %2192 }
 0x648   :  { %2601 = vmatprep.subr.bf16.mxu1 %v5588_v25 }
 0x649   :  { %v6342_v22 = vmax.f32 %v2257_v13, 0.0  ;;  %v2258_v2 = vadd.f32 %v2183_v62, %v2132_v6 }
 0x64a   :  { %v2056_v37 = vpop.f32.mrb[156].mxu0 }
 0x64b   :  { %v6344_v46 = vmax.f32 %v2258_v2, 0.0  ;;  %v2115_v61 = vadd.f32 %v2056_v37, %v6295_v16  ;;  %v5203_v30 = vpop.f32.mrb[157].mxu0  ;;  %2297 = vrot.lane.b32.xlu0 %v6342_v22, %s5580_s22  ;;  %v2198_v2 = vpop.permute.xlu0 %2197 }
 0x64c   :  { %v2059_v12 = vpop.f32.mrb[158].mxu0 }
 0x64d   :  { %v2133_v42 = vadd.f32 %v2115_v61, %v6143_v59  ;;  %v2116_v19 = vadd.f32 %v2059_v12, %v6297_v5  ;;  %2300 = vrot.lane.b32.xlu1 %v6344_v46, %s5580_s22  ;;  %v2482_v48 = vpack.c.bf16 %v6344_v46, %v6342_v22  ;;  %v5204_v49 = vpop.f32.mrb[159].mxu0  ;;  %v2203_v61 = vpop.permute.xlu1 %2202 }
 0x64f   :  { %v2134_v41 = vadd.f32 %v2116_v19, %v6145_v63  ;;  %v2259_v16 = vadd.f32 %v2188_v58, %v2133_v42  ;;  %2602 = vmatpush1.bf16.msra.mxu1 %v2482_v48 }
 0x650   :  { %2603 = vmatprep.subr.bf16.mxu1 %v5588_v25 }
 0x651   :  { %v6357_v24 = vmax.f32 %v2259_v16, 0.0  ;;  %v2260_v59 = vadd.f32 %v2193_v0, %v2134_v41  ;;  %v2208_v16 = vpop.permute.xlu0 %2207 }
 0x652   :  { %v2064_v55 = vpop.f32.mrb[160].mxu0 }
 0x653   :  { %v6359_v5 = vmax.f32 %v2260_v59, 0.0  ;;  %v2117_v35 = vadd.f32 %v2064_v55, %v6299_v36  ;;  %v5207_v3 = vpop.f32.mrb[161].mxu0  ;;  %2303 = vrot.lane.b32.xlu0 %v6357_v24, %s5580_s22  ;;  %v2213_v59 = vpop.permute.xlu1 %2212 }
 0x654   :  { %v2067_v17 = vpop.f32.mrb[162].mxu0 }
 0x655   :  { %v2135_v63 = vadd.f32 %v2117_v35, %v6149_v14  ;;  %v2118_v6 = vadd.f32 %v2067_v17, %v6301_v47  ;;  %2306 = vrot.lane.b32.xlu1 %v6359_v5, %s5580_s22  ;;  %v2483_v13 = vpack.c.bf16 %v6359_v5, %v6357_v24  ;;  %v5208_v62 = vpop.f32.mrb[163].mxu0 }
 0x657   :  { %v2136_v37 = vadd.f32 %v2118_v6, %v6151_v18  ;;  %v2261_v36 = vadd.f32 %v2198_v2, %v2135_v63  ;;  %2604 = vmatpush1.bf16.msra.mxu1 %v2483_v13  ;;  %v2218_v2 = vpop.permute.xlu0 %2217 }
 0x658   :  { %2605 = vmatprep.subr.bf16.mxu1 %v5588_v25 }
 0x659   :  { %v6372_v30 = vmax.f32 %v2261_v36, 0.0  ;;  %v2262_v14 = vadd.f32 %v2203_v61, %v2136_v37  ;;  %v2223_v36 = vpop.permute.xlu1 %2222 }
 0x65a   :  { %v2072_v12 = vpop.f32.mrb[164].mxu0 }
 0x65b   :  { %v6374_v47 = vmax.f32 %v2262_v14, 0.0  ;;  %v2119_v42 = vadd.f32 %v2072_v12, %v6303_v20  ;;  %v5211_v19 = vpop.f32.mrb[165].mxu0  ;;  %2309 = vrot.lane.b32.xlu0 %v6372_v30, %s5580_s22 }
 0x65c   :  { %v2075_v48 = vpop.f32.mrb[166].mxu0 }
 0x65d   :  { %v2137_v18 = vadd.f32 %v2119_v42, %v6155_v33  ;;  %v2120_v49 = vadd.f32 %v2075_v48, %v6305_v26  ;;  %2312 = vrot.lane.b32.xlu1 %v6374_v47, %s5580_s22  ;;  %v2484_v58 = vpack.c.bf16 %v6374_v47, %v6372_v30  ;;  %v5212_v41 = vpop.f32.mrb[167].mxu0 }
 0x65f   :  { %v2138_v0 = vadd.f32 %v2120_v49, %v6157_v34  ;;  %v2263_v20 = vadd.f32 %v2208_v16, %v2137_v18  ;;  %2606 = vmatpush1.bf16.msra.mxu1 %v2484_v58  ;;  %v2228_v58 = vpop.permute.xlu0 %2227  ;;  %v2233_v16 = vpop.permute.xlu1 %2232 }
 0x660   :  { %2607 = vmatprep.subr.bf16.mxu1 %v5588_v25 }
 0x661   :  { %v6387_v55 = vmax.f32 %v2263_v20, 0.0  ;;  %v2264_v33 = vadd.f32 %v2213_v59, %v2138_v0 }
 0x662   :  { %v2080_v35 = vpop.f32.mrb[168].mxu0 }
 0x663   :  { %v6389_v26 = vmax.f32 %v2264_v33, 0.0  ;;  %v2121_v3 = vadd.f32 %v2080_v35, %v6307_v27  ;;  %v5215_v17 = vpop.f32.mrb[169].mxu0  ;;  %2315 = vrot.lane.b32.xlu0 %v6387_v55, %s5580_s22 }
 0x664   :  { %v2083_v63 = vpop.f32.mrb[170].mxu0 }
 0x665   :  { %v2139_v34 = vadd.f32 %v2121_v3, %v6161_v53  ;;  %v2122_v6 = vadd.f32 %v2083_v63, %v6309_v9  ;;  %2318 = vrot.lane.b32.xlu1 %v6389_v26, %s5580_s22  ;;  %v2485_v13 = vpack.c.bf16 %v6389_v26, %v6387_v55  ;;  %v5216_v62 = vpop.f32.mrb[171].mxu0 }
 0x667   :  { %v2140_v37 = vadd.f32 %v2122_v6, %v6163_v54  ;;  %v2265_v27 = vadd.f32 %v2218_v2, %v2139_v34  ;;  %2608 = vmatpush1.bf16.msra.mxu1 %v2485_v13  ;;  %v2238_v34 = vpop.permute.xlu0 %2237  ;;  %v2243_v13 = vpop.permute.xlu1 %2242 }
 0x668   :  { %2609 = vmatprep.subr.bf16.mxu1 %v5588_v25 }
 0x669   :  { %v6402_v61 = vmax.f32 %v2265_v27, 0.0  ;;  %v2266_v53 = vadd.f32 %v2223_v36, %v2140_v37 }
 0x66a   :  { %v2088_v14 = vpop.f32.mrb[172].mxu0 }
 0x66b   :  { %v6404_v9 = vmax.f32 %v2266_v53, 0.0  ;;  %v2123_v12 = vadd.f32 %v2088_v14, %v6311_v51  ;;  %v5219_v42 = vpop.f32.mrb[173].mxu0  ;;  %2321 = vrot.lane.b32.xlu0 %v6402_v61, %s5580_s22 }
 0x66c   :  { %v2091_v19 = vpop.f32.mrb[174].mxu0  ;;  %v2248_v42 = vpop.permute.xlu0 %2247 }
 0x66d   :  { %v2141_v54 = vadd.f32 %v2123_v12, %v6167_v10  ;;  %v2124_v48 = vadd.f32 %v2091_v19, %v6313_v56  ;;  %2324 = vrot.lane.b32.xlu1 %v6404_v9, %s5580_s22  ;;  %v2486_v18 = vpack.c.bf16 %v6404_v9, %v6402_v61  ;;  %v5220_v49 = vpop.f32.mrb[175].mxu0 }
 0x66f   :  { %v2142_v41 = vadd.f32 %v2124_v48, %v6169_v11  ;;  %v2267_v51 = vadd.f32 %v2228_v58, %v2141_v54  ;;  %2610 = vmatpush1.bf16.msra.mxu1 %v2486_v18  ;;  %v2253_v54 = vpop.permute.xlu1 %2252 }
 0x670   :  { %2611 = vmatprep.subr.bf16.mxu1 %v5588_v25 }
 0x671   :  { %v6417_v0 = vmax.f32 %v2267_v51, 0.0  ;;  %v2268_v10 = vadd.f32 %v2233_v16, %v2142_v41 }
 0x672   :  { %v2096_v20 = vpop.f32.mrb[176].mxu0 }
 0x673   :  { %v6419_v56 = vmax.f32 %v2268_v10, 0.0  ;;  %v2125_v59 = vadd.f32 %v2096_v20, %v6315_v40  ;;  %v5223_v33 = vpop.f32.mrb[177].mxu0  ;;  %2327 = vrot.lane.b32.xlu0 %v6417_v0, %s5580_s22 }
 0x674   :  { %v2099_v35 = vpop.f32.mrb[178].mxu0 }
 0x675   :  { %v2143_v11 = vadd.f32 %v2125_v59, %v6173_v21  ;;  %v2126_v3 = vadd.f32 %v2099_v35, %v6317_v29  ;;  %2330 = vrot.lane.b32.xlu1 %v6419_v56, %s5580_s22  ;;  %v2487_v17 = vpack.c.bf16 %v6419_v56, %v6417_v0  ;;  %v5224_v63 = vpop.f32.mrb[179].mxu0 }
 0x677   :  { %v2144_v6 = vadd.f32 %v2126_v3, %v6175_v23  ;;  %v2269_v40 = vadd.f32 %v2238_v34, %v2143_v11  ;;  %2612 = vmatpush1.bf16.msra.mxu1 %v2487_v17 }
 0x678   :  { %2613 = vmatprep.subr.bf16.mxu1 %v5588_v25 }
 0x679   :  { %v6432_v62 = vmax.f32 %v2269_v40, 0.0  ;;  %v2270_v21 = vadd.f32 %v2243_v13, %v2144_v6 }
 0x67a   :  { %v2104_v2 = vpop.f32.mrb[180].mxu0 }
 0x67b   :  { %v6434_v29 = vmax.f32 %v2270_v21, 0.0  ;;  %v2127_v37 = vadd.f32 %v2104_v2, %v6319_v52  ;;  %v5227_v27 = vpop.f32.mrb[181].mxu0  ;;  %2333 = vrot.lane.b32.xlu0 %v6432_v62, %s5580_s22 }
 0x67c   :  { %v2107_v36 = vpop.f32.mrb[182].mxu0 }
 0x67d   :  { %v2145_v23 = vadd.f32 %v2127_v37, %v6179_v15  ;;  %v2128_v53 = vadd.f32 %v2107_v36, %v6321_v1  ;;  %2336 = vrot.lane.b32.xlu1 %v6434_v29, %s5580_s22  ;;  %v2488_v14 = vpack.c.bf16 %v6434_v29, %v6432_v62  ;;  %v5228_v12 = vpop.f32.mrb[183].mxu0 }
 0x67f   :  { %v2146_v19 = vadd.f32 %v2128_v53, %v6181_v50  ;;  %v2271_v52 = vadd.f32 %v2248_v42, %v2145_v23  ;;  %2614 = vmatpush1.bf16.msra.mxu1 %v2488_v14 }
 0x680   :  { %2615 = vmatprep.subr.bf16.mxu1 %v5588_v25 }
 0x681   :  { %v6447_v48 = vmax.f32 %v2271_v52, 0.0  ;;  %v2272_v15 = vadd.f32 %v2253_v54, %v2146_v19 }
 0x683   :  { %v6449_v18 = vmax.f32 %v2272_v15, 0.0  ;;  %2339 = vrot.lane.b32.xlu0 %v6447_v48, %s5580_s22 }
 0x685   :  { %2342 = vrot.lane.b32.xlu1 %v6449_v18, %s5580_s22  ;;  %v2489_v1 = vpack.c.bf16 %v6449_v18, %v6447_v48 }
 0x687   :  { %2616 = vmatpush1.bf16.msra.mxu1 %v2489_v1 }
 0x688   :  { %3125 = vmatprep.subr.bf16.mxu1 %v5588_v25 }
 0x6b5   :  { %v2292_v50 = vpop.permute.xlu0 %2291 }
 0x6b6   :  { %v2293_v49 = vsel %vm144_vm0, %v2292_v50, %v6327_v28 }
 0x6b7   :  { %2345 = vrot.lane.b32.xlu0 %v2293_v49, %s5580_s22  ;;  %v2295_v58 = vpop.permute.xlu1 %2294 }
 0x6b8   :  { %v2296_v41 = vsel %vm144_vm0, %v2295_v58, %v6329_v32  ;;  %v5434_v58 = vld [vmem:[%s7166_s29 + $0x90] ss:$8 sps:$4 sm:$0xff]  }
 0x6b9   :  { %2347 = vrot.lane.b32.xlu1 %v2296_v41, %s5580_s22  ;;  %v5436_v41 = vld [vmem:[%s7166_s29 + $0x94] ss:$8 sps:$4 sm:$0xff]  }
 0x6ba   :  { %4588 = vmatprep.mubr.msk.bf16.mxu1 %vm2571_vm11, %v5436_v41 }
 0x6bb   :  { %2632 = vmatmul.mubr.bf16.vlgmr.msra.gmra.mrb[148].mxu1 %v5434_v58 }
 0x6bd   :  { %v2298_v51 = vpop.permute.xlu0 %2297 }
 0x6be   :  { %v2299_v16 = vsel %vm144_vm0, %v2298_v51, %v6342_v22  ;;  %v5437_v51 = vld [vmem:[%s7166_s29 + $0xa4] ss:$8 sps:$4 sm:$0xff]  }
 0x6bf   :  { %2349 = vrot.lane.b32.xlu0 %v2299_v16, %s5580_s22  ;;  %v2301_v10 = vpop.permute.xlu1 %2300  ;;  %v5439_v16 = vld [vmem:[%s7166_s29 + $0xa0] ss:$8 sps:$4 sm:$0xff]   ;;  %4589 = vmatprep.mubr.msk.bf16.mxu1 %vm2571_vm11, %v5437_v51 }
 0x6c0   :  { %v2302_v20 = vsel %vm144_vm0, %v2301_v10, %v6344_v46 }
 0x6c1   :  { %2351 = vrot.lane.b32.xlu1 %v2302_v20, %s5580_s22 }
 0x6c3   :  { %2640 = vmatmul.mubr.bf16.gmra.mrb[152].mxu1 %v5439_v16  ;;  %v5449_v16 = vld [vmem:[%s7166_s29 + $0xe4] ss:$8 sps:$4 sm:$0xff]  }
 0x6c5   :  { %v2304_v59 = vpop.permute.xlu0 %2303 }
 0x6c6   :  { %v2305_v33 = vsel %vm144_vm0, %v2304_v59, %v6357_v24 }
 0x6c7   :  { %2353 = vrot.lane.b32.xlu0 %v2305_v33, %s5580_s22  ;;  %v2307_v35 = vpop.permute.xlu1 %2306  ;;  %v5440_v33 = vld [vmem:[%s7166_s29 + $0xb4] ss:$8 sps:$4 sm:$0xff]  }
 0x6c8   :  { %v2308_v11 = vsel %vm144_vm0, %v2307_v35, %v6359_v5  ;;  %4590 = vmatprep.mubr.msk.bf16.mxu1 %vm2571_vm11, %v5440_v33 }
 0x6c9   :  { %2355 = vrot.lane.b32.xlu1 %v2308_v11, %s5580_s22  ;;  %v5442_v11 = vld [vmem:[%s7166_s29 + $0xb0] ss:$8 sps:$4 sm:$0xff]  }
 0x6cb   :  { %2648 = vmatmul.mubr.bf16.gmra.mrb[156].mxu1 %v5442_v11 }
 0x6cd   :  { %v2310_v3 = vpop.permute.xlu0 %2309 }
 0x6ce   :  { %v2311_v17 = vsel %vm144_vm0, %v2310_v3, %v6372_v30 }
 0x6cf   :  { %2357 = vrot.lane.b32.xlu0 %v2311_v17, %s5580_s22  ;;  %v2313_v63 = vpop.permute.xlu1 %2312 }
 0x6d0   :  { %v2314_v34 = vsel %vm144_vm0, %v2313_v63, %v6374_v47 }
 0x6d1   :  { %2359 = vrot.lane.b32.xlu1 %v2314_v34, %s5580_s22 }
 0x6d5   :  { %v2316_v6 = vpop.permute.xlu0 %2315 }
 0x6d6   :  { %v2317_v40 = vsel %vm144_vm0, %v2316_v6, %v6387_v55 }
 0x6d7   :  { %2361 = vrot.lane.b32.xlu0 %v2317_v40, %s5580_s22  ;;  %v2319_v13 = vpop.permute.xlu1 %2318 }
 0x6d8   :  { %v2320_v21 = vsel %vm144_vm0, %v2319_v13, %v6389_v26 }
 0x6d9   :  { %2363 = vrot.lane.b32.xlu1 %v2320_v21, %s5580_s22  ;;  %v5443_v21 = vld [vmem:[%s7166_s29 + $0xc4] ss:$8 sps:$4 sm:$0xff]  }
 0x6da   :  { %4591 = vmatprep.mubr.msk.bf16.mxu1 %vm2571_vm11, %v5443_v21 }
 0x6dd   :  { %v2322_v2 = vpop.permute.xlu0 %2321 }
 0x6de   :  { %v2323_v37 = vsel %vm144_vm0, %v2322_v2, %v6402_v61 }
 0x6df   :  { %2365 = vrot.lane.b32.xlu0 %v2323_v37, %s5580_s22  ;;  %v2325_v27 = vpop.permute.xlu1 %2324  ;;  %v5445_v37 = vld [vmem:[%s7166_s29 + $0xc0] ss:$8 sps:$4 sm:$0xff]  }
 0x6e0   :  { %v2326_v36 = vsel %vm144_vm0, %v2325_v27, %v6404_v9  ;;  %2656 = vmatmul.mubr.bf16.gmra.mrb[160].mxu1 %v5445_v37 }
 0x6e1   :  { %2367 = vrot.lane.b32.xlu1 %v2326_v36, %s5580_s22 }
 0x6e5   :  { %v2328_v23 = vpop.permute.xlu0 %2327 }
 0x6e6   :  { %v2329_v53 = vsel %vm144_vm0, %v2328_v23, %v6417_v0 }
 0x6e7   :  { %2369 = vrot.lane.b32.xlu0 %v2329_v53, %s5580_s22  ;;  %v2331_v14 = vpop.permute.xlu1 %2330 }
 0x6e8   :  { %v2332_v12 = vsel %vm144_vm0, %v2331_v14, %v6419_v56 }
 0x6e9   :  { %2371 = vrot.lane.b32.xlu1 %v2332_v12, %s5580_s22 }
 0x6ed   :  { %v2334_v42 = vpop.permute.xlu0 %2333 }
 0x6ee   :  { %v2335_v19 = vsel %vm144_vm0, %v2334_v42, %v6432_v62 }
 0x6ef   :  { %2373 = vrot.lane.b32.xlu0 %v2335_v19, %s5580_s22  ;;  %v2337_v52 = vpop.permute.xlu1 %2336  ;;  %v5446_v19 = vld [vmem:[%s7166_s29 + $0xd4] ss:$8 sps:$4 sm:$0xff]  }
 0x6f0   :  { %v2338_v54 = vsel %vm144_vm0, %v2337_v52, %v6434_v29  ;;  %4592 = vmatprep.mubr.msk.bf16.mxu1 %vm2571_vm11, %v5446_v19 }
 0x6f1   :  { %2375 = vrot.lane.b32.xlu1 %v2338_v54, %s5580_s22  ;;  %v5448_v54 = vld [vmem:[%s7166_s29 + $0xd0] ss:$8 sps:$4 sm:$0xff]  }
 0x6f2   :  { %2664 = vmatmul.mubr.bf16.gmra.mrb[164].mxu1 %v5448_v54  ;;  %v5458_v54 = vld [vmem:[%s7166_s29 + $0x114] ss:$8 sps:$4 sm:$0xff]  }
 0x6f3   :  { %4593 = vmatprep.mubr.msk.bf16.mxu1 %vm2571_vm11, %v5449_v16 }
 0x6f5   :  { %v2340_v15 = vpop.permute.xlu0 %2339 }
 0x6f6   :  { %v2341_v1 = vsel %vm144_vm0, %v2340_v15, %v6447_v48 }
 0x6f7   :  { %2377 = vrot.lane.b32.xlu0 %v2341_v1, %s5580_s22  ;;  %v2343_v50 = vpop.permute.xlu1 %2342 }
 0x6f8   :  { %v2344_v49 = vsel %vm144_vm0, %v2343_v50, %v6449_v18 }
 0x6f9   :  { %2379 = vrot.lane.b32.xlu1 %v2344_v49, %s5580_s22 }
 0x729   :  { %v2346_v10 = vpop.permute.xlu0 %2345 }
 0x72a   :  { %v2381_v20 = vsel %vm144_vm0, %v2346_v10, %v6327_v28 }
 0x72b   :  { %v2348_v59 = vpop.permute.xlu1 %2347  ;;  %v2399_v3 = vmul.f32 %v2381_v20, %v5842_v4  ;;  %v2417_v17 = vmul.f32 %v2381_v20, %v5846_v7  ;;  %v5451_v20 = vld [vmem:[%s7166_s29 + $0xe0] ss:$8 sps:$4 sm:$0xff]  }
 0x72c   :  { %v2382_v35 = vsel %vm144_vm0, %v2348_v59, %v6329_v32  ;;  %2672 = vmatmul.mubr.bf16.gmra.mrb[168].mxu1 %v5451_v20  ;;  %v5466_v20 = vld [vmem:[%s7166_s29 + $0x124] ss:$8 sps:$4 sm:$0xff]  }
 0x72d   :  { %v2400_v63 = vmul.f32 %v2382_v35, %v5842_v4  ;;  %v2418_v34 = vmul.f32 %v2382_v35, %v5846_v7 }
 0x72f   :  { %v2972_v28 = vpack.c.bf16 %v2418_v34, %v2417_v17  ;;  %v2453_v6 = vpack.c.bf16 %v2400_v63, %v2399_v3  ;;  %v5452_v34 = vld [vmem:[%s7166_s29 + $0xf4] ss:$8 sps:$4 sm:$0xff]  }
 0x730   :  { %4594 = vmatprep.mubr.msk.bf16.mxu1 %vm2571_vm11, %v5452_v34 }
 0x731   :  { %v2350_v40 = vpop.permute.xlu0 %2349  ;;  %3071 = vrot.lane.b32.xlu1 %v2972_v28, %s5583_s0  ;;  %2794 = vrot.lane.b32.xlu0 %v2453_v6, %s5587_s17  ;;  %v5454_v6 = vld [vmem:[%s7166_s29 + $0xf0] ss:$8 sps:$4 sm:$0xff]  }
 0x732   :  { %v2383_v32 = vsel %vm144_vm0, %v2350_v40, %v6342_v22 }
 0x733   :  { %v2352_v13 = vpop.permute.xlu1 %2351  ;;  %v2401_v27 = vmul.f32 %v2383_v32, %v5842_v4  ;;  %v2419_v36 = vmul.f32 %v2383_v32, %v5846_v7 }
 0x734   :  { %v2384_v2 = vsel %vm144_vm0, %v2352_v13, %v6344_v46  ;;  %2680 = vmatmul.mubr.bf16.gmra.mrb[172].mxu1 %v5454_v6 }
 0x735   :  { %v2402_v23 = vmul.f32 %v2384_v2, %v5842_v4  ;;  %v2420_v53 = vmul.f32 %v2384_v2, %v5846_v7 }
 0x737   :  { %v2973_v22 = vpack.c.bf16 %v2420_v53, %v2419_v36  ;;  %v2454_v14 = vpack.c.bf16 %v2402_v23, %v2401_v27  ;;  %v5455_v36 = vld [vmem:[%s7166_s29 + $0x104] ss:$8 sps:$4 sm:$0xff]   ;;  %v5457_v53 = vld [vmem:[%s7166_s29 + $0x100] ss:$8 sps:$4 sm:$0xff]  }
 0x738   :  { %4595 = vmatprep.mubr.msk.bf16.mxu1 %vm2571_vm11, %v5455_v36  ;;  %v3256_v36 = vld [vmem:[%s7167_s3 + $0x40] sm:$0xff] }
 0x739   :  { %v2354_v12 = vpop.permute.xlu0 %2353  ;;  %3073 = vrot.lane.b32.xlu1 %v2973_v22, %s5583_s0  ;;  %2796 = vrot.lane.b32.xlu0 %v2454_v14, %s5587_s17 }
 0x73a   :  { %v2385_v46 = vsel %vm144_vm0, %v2354_v12, %v6357_v24 }
 0x73b   :  { %v2356_v42 = vpop.permute.xlu1 %2355  ;;  %v2403_v15 = vmul.f32 %v2385_v46, %v5842_v4  ;;  %v2421_v1 = vmul.f32 %v2385_v46, %v5846_v7 }
 0x73c   :  { %v2386_v52 = vsel %vm144_vm0, %v2356_v42, %v6359_v5  ;;  %2688 = vmatmul.mubr.bf16.gmra.mrb[176].mxu1 %v5457_v53  ;;  %v3258_v53 = vld [vmem:[%s7167_s3 + $0x50] sm:$0xff] }
 0x73d   :  { %v2404_v50 = vmul.f32 %v2386_v52, %v5842_v4  ;;  %v2422_v49 = vmul.f32 %v2386_v52, %v5846_v7  ;;  %4596 = vmatprep.mubr.msk.bf16.mxu1 %vm2571_vm11, %v5458_v54 }
 0x73f   :  { %v2974_v24 = vpack.c.bf16 %v2422_v49, %v2421_v1  ;;  %v2455_v58 = vpack.c.bf16 %v2404_v50, %v2403_v15  ;;  %v5460_v1 = vld [vmem:[%s7166_s29 + $0x110] ss:$8 sps:$4 sm:$0xff]  }
 0x741   :  { %v2358_v41 = vpop.permute.xlu0 %2357  ;;  %3075 = vrot.lane.b32.xlu1 %v2974_v24, %s5583_s0  ;;  %2798 = vrot.lane.b32.xlu0 %v2455_v58, %s5587_s17 }
 0x742   :  { %v2387_v5 = vsel %vm144_vm0, %v2358_v41, %v6372_v30 }
 0x743   :  { %v2360_v51 = vpop.permute.xlu1 %2359  ;;  %v2405_v59 = vmul.f32 %v2387_v5, %v5842_v4  ;;  %v2423_v33 = vmul.f32 %v2387_v5, %v5846_v7 }
 0x744   :  { %v2388_v10 = vsel %vm144_vm0, %v2360_v51, %v6374_v47  ;;  %2696 = vmatmul.mubr.bf16.gmra.mrb[180].mxu1 %v5460_v1 }
 0x745   :  { %v2406_v35 = vmul.f32 %v2388_v10, %v5842_v4  ;;  %v2424_v11 = vmul.f32 %v2388_v10, %v5846_v7  ;;  %v5463_v10 = vld [vmem:[%s7166_s29 + $0x4] ss:$8 sps:$4 sm:$0xff]   ;;  %4660 = vmatprep.mubr.msk.bf16.mxu1 %vm2571_vm11, %v5466_v20 }
 0x746   :  { %4615 = vmatprep.mubr.msk.bf16.mxu0 %vm2571_vm11, %v5463_v10 }
 0x747   :  { %v2975_v30 = vpack.c.bf16 %v2424_v11, %v2423_v33  ;;  %v2456_v3 = vpack.c.bf16 %v2406_v35, %v2405_v59 }
 0x749   :  { %v2362_v17 = vpop.permute.xlu0 %2361  ;;  %3077 = vrot.lane.b32.xlu1 %v2975_v30, %s5583_s0  ;;  %2800 = vrot.lane.b32.xlu0 %v2456_v3, %s5587_s17 }
 0x74a   :  { %v2389_v47 = vsel %vm144_vm0, %v2362_v17, %v6387_v55 }
 0x74b   :  { %v2364_v63 = vpop.permute.xlu1 %2363  ;;  %v2407_v40 = vmul.f32 %v2389_v47, %v5842_v4  ;;  %v2425_v32 = vmul.f32 %v2389_v47, %v5846_v7 }
 0x74c   :  { %v2390_v28 = vsel %vm144_vm0, %v2364_v63, %v6389_v26 }
 0x74d   :  { %v2408_v13 = vmul.f32 %v2390_v28, %v5842_v4  ;;  %v2426_v21 = vmul.f32 %v2390_v28, %v5846_v7 }
 0x74f   :  { %v2976_v55 = vpack.c.bf16 %v2426_v21, %v2425_v32  ;;  %v2457_v2 = vpack.c.bf16 %v2408_v13, %v2407_v40  ;;  %v3251_v13 = vld [vmem:[%s7167_s3 + $0x18] sm:$0xff]  ;;  %v3250_v21 = vld [vmem:[%s7167_s3 + $0x10] sm:$0xff] }
 0x751   :  { %v2366_v37 = vpop.permute.xlu0 %2365  ;;  %3079 = vrot.lane.b32.xlu1 %v2976_v55, %s5583_s0  ;;  %2802 = vrot.lane.b32.xlu0 %v2457_v2, %s5587_s17  ;;  %v3253_v55 = vld [vmem:[%s7167_s3 + $0x28] sm:$0xff]  ;;  %v3252_v2 = vld [vmem:[%s7167_s3 + $0x20] sm:$0xff] }
 0x752   :  { %v2391_v26 = vsel %vm144_vm0, %v2366_v37, %v6402_v61  ;;  %v3255_v37 = vld [vmem:[%s7167_s3 + $0x38] sm:$0xff] }
 0x753   :  { %v2368_v27 = vpop.permute.xlu1 %2367  ;;  %v2409_v22 = vmul.f32 %v2391_v26, %v5842_v4  ;;  %v2427_v14 = vmul.f32 %v2391_v26, %v5846_v7  ;;  %v3254_v26 = vld [vmem:[%s7167_s3 + $0x30] sm:$0xff] }
 0x754   :  { %v2392_v23 = vsel %vm144_vm0, %v2368_v27, %v6404_v9  ;;  %v3257_v27 = vld [vmem:[%s7167_s3 + $0x48] sm:$0xff] }
 0x755   :  { %v2410_v12 = vmul.f32 %v2392_v23, %v5842_v4  ;;  %v2428_v46 = vmul.f32 %v2392_v23, %v5846_v7  ;;  %v3259_v23 = vld [vmem:[%s7167_s3 + $0x58] sm:$0xff] }
 0x757   :  { %v2977_v61 = vpack.c.bf16 %v2428_v46, %v2427_v14  ;;  %v2458_v42 = vpack.c.bf16 %v2410_v12, %v2409_v22  ;;  %v3261_v22 = vld [vmem:[%s7167_s3 + $0x68] sm:$0xff]  ;;  %v3260_v14 = vld [vmem:[%s7167_s3 + $0x60] sm:$0xff]  ;;  %v3263_v12 = vld [vmem:[%s7167_s3 + $0x78] sm:$0xff] }
 0x758   :  { %v3262_v46 = vld [vmem:[%s7167_s3 + $0x70] sm:$0xff] }
 0x759   :  { %v2370_v19 = vpop.permute.xlu0 %2369  ;;  %3081 = vrot.lane.b32.xlu1 %v2977_v61, %s5583_s0  ;;  %2804 = vrot.lane.b32.xlu0 %v2458_v42, %s5587_s17  ;;  %v3265_v61 = vld [vmem:[%s7167_s3 + $0x88] sm:$0xff]  ;;  %v3264_v42 = vld [vmem:[%s7167_s3 + $0x80] sm:$0xff] }
 0x75a   :  { %v2393_v9 = vsel %vm144_vm0, %v2370_v19, %v6417_v0 }
 0x75b   :  { %v2372_v52 = vpop.permute.xlu1 %2371  ;;  %v2411_v50 = vmul.f32 %v2393_v9, %v5842_v4  ;;  %v2429_v49 = vmul.f32 %v2393_v9, %v5846_v7 }
 0x75c   :  { %v2394_v15 = vsel %vm144_vm0, %v2372_v52, %v6419_v56 }
 0x75d   :  { %v2412_v24 = vmul.f32 %v2394_v15, %v5842_v4  ;;  %v2430_v58 = vmul.f32 %v2394_v15, %v5846_v7 }
 0x75f   :  { %v2978_v0 = vpack.c.bf16 %v2430_v58, %v2429_v49  ;;  %v2459_v41 = vpack.c.bf16 %v2412_v24, %v2411_v50 }
 0x761   :  { %v2374_v5 = vpop.permute.xlu0 %2373  ;;  %3083 = vrot.lane.b32.xlu1 %v2978_v0, %s5583_s0  ;;  %2806 = vrot.lane.b32.xlu0 %v2459_v41, %s5587_s17 }
 0x762   :  { %v2395_v56 = vsel %vm144_vm0, %v2374_v5, %v6432_v62 }
 0x763   :  { %v2376_v51 = vpop.permute.xlu1 %2375  ;;  %v2413_v59 = vmul.f32 %v2395_v56, %v5842_v4  ;;  %v2431_v33 = vmul.f32 %v2395_v56, %v5846_v7 }
 0x764   :  { %v2396_v16 = vsel %vm144_vm0, %v2376_v51, %v6434_v29 }
 0x765   :  { %v2414_v35 = vmul.f32 %v2396_v16, %v5842_v4  ;;  %v2432_v11 = vmul.f32 %v2396_v16, %v5846_v7 }
 0x767   :  { %v2979_v30 = vpack.c.bf16 %v2432_v11, %v2431_v33  ;;  %v2460_v62 = vpack.c.bf16 %v2414_v35, %v2413_v59  ;;  %v5461_v59 = vld [vmem:[%s7166_s29] ss:$8 sps:$4 sm:$0xff]   ;;  %v5467_v35 = vld [vmem:[%s7166_s29 + $0x14] ss:$8 sps:$4 sm:$0xff]  }
 0x768   :  { %v5464_v33 = vld [vmem:[%s7166_s29 + $0x120] ss:$8 sps:$4 sm:$0xff]   ;;  %v5470_v11 = vld [vmem:[%s7166_s29 + $0x134] ss:$8 sps:$4 sm:$0xff]  }
 0x769   :  { %v2378_v3 = vpop.permute.xlu0 %2377  ;;  %3085 = vrot.lane.b32.xlu1 %v2979_v30, %s5583_s0  ;;  %2808 = vrot.lane.b32.xlu0 %v2460_v62, %s5587_s17  ;;  %v5469_v30 = vld [vmem:[%s7166_s29 + $0x10] ss:$8 sps:$4 sm:$0xff]  }
 0x76a   :  { %v2397_v29 = vsel %vm144_vm0, %v2378_v3, %v6447_v48  ;;  %v3249_v48 = vld [vmem:[%s7167_s3 + $0x8] sm:$0xff]  ;;  %v5472_v62 = vld [vmem:[%s7166_s29 + $0x130] ss:$8 sps:$4 sm:$0xff]  }
 0x76b   :  { %v2380_v17 = vpop.permute.xlu1 %2379  ;;  %v2415_v63 = vmul.f32 %v2397_v29, %v5842_v4  ;;  %v2433_v34 = vmul.f32 %v2397_v29, %v5846_v7  ;;  %v5473_v29 = vld [vmem:[%s7166_s29 + $0x24] ss:$8 sps:$4 sm:$0xff]  }
 0x76c   :  { %v2398_v47 = vsel %vm144_vm0, %v2380_v17, %v6449_v18  ;;  %v3248_v18 = vld [vmem:[%s7167_s3] sm:$0xff] }
 0x76d   :  { %v2416_v28 = vmul.f32 %v2398_v47, %v5842_v4  ;;  %v2434_v6 = vmul.f32 %v2398_v47, %v5846_v7  ;;  %v5476_v17 = vld [vmem:[%s7166_s29 + $0x144] ss:$8 sps:$4 sm:$0xff]  }
 0x76f   :  { %v2980_v40 = vpack.c.bf16 %v2434_v6, %v2433_v34  ;;  %v2461_v32 = vpack.c.bf16 %v2416_v28, %v2415_v63  ;;  %v5475_v28 = vld [vmem:[%s7166_s29 + $0x20] ss:$8 sps:$4 sm:$0xff]  }
 0x770   :  { %v5478_v6 = vld [vmem:[%s7166_s29 + $0x140] ss:$8 sps:$4 sm:$0xff]  }
 0x771   :  { %3087 = vrot.lane.b32.xlu1 %v2980_v40, %s5583_s0  ;;  %2810 = vrot.lane.b32.xlu0 %v2461_v32, %s5587_s17  ;;  %v5479_v40 = vld [vmem:[%s7166_s29 + $0x34] ss:$8 sps:$4 sm:$0xff]  }
 0x772   :  { %v5482_v32 = vld [vmem:[%s7166_s29 + $0x154] ss:$8 sps:$4 sm:$0xff]  }
 0x775   :  { %3273 = vperm.xlu1 %5369, %v3249_v48   ;;  %3268 = vperm.xlu0 %5370, %v3248_v18  }
 0x779   :  { %3283 = vperm.xlu1 %5369, %v3251_v13   ;;  %3278 = vperm.xlu0 %5370, %v3250_v21   ;;  %v5481_v13 = vld [vmem:[%s7166_s29 + $0x30] ss:$8 sps:$4 sm:$0xff]  }
 0x77a   :  { %v5484_v21 = vld [vmem:[%s7166_s29 + $0x150] ss:$8 sps:$4 sm:$0xff]  }
 0x77d   :  { %3293 = vperm.xlu1 %5369, %v3253_v55   ;;  %3288 = vperm.xlu0 %5370, %v3252_v2   ;;  %v5485_v2 = vld [vmem:[%s7166_s29 + $0x44] ss:$8 sps:$4 sm:$0xff]  }
 0x781   :  { %3303 = vperm.xlu1 %5369, %v3255_v37   ;;  %3298 = vperm.xlu0 %5370, %v3254_v26   ;;  %v5488_v37 = vld [vmem:[%s7166_s29 + $0x164] ss:$8 sps:$4 sm:$0xff]  }
 0x785   :  { %3313 = vperm.xlu1 %5369, %v3257_v27   ;;  %3308 = vperm.xlu0 %5370, %v3256_v36  }
 0x789   :  { %3323 = vperm.xlu1 %5369, %v3259_v23   ;;  %3318 = vperm.xlu0 %5370, %v3258_v53   ;;  %v5487_v23 = vld [vmem:[%s7166_s29 + $0x40] ss:$8 sps:$4 sm:$0xff]  }
 0x78a   :  { %v5490_v53 = vld [vmem:[%s7166_s29 + $0x160] ss:$8 sps:$4 sm:$0xff]  }
 0x78d   :  { %3333 = vperm.xlu1 %5369, %v3261_v22   ;;  %3328 = vperm.xlu0 %5370, %v3260_v14   ;;  %v5491_v14 = vld [vmem:[%s7166_s29 + $0x54] ss:$8 sps:$4 sm:$0xff]  }
 0x78e   :  { %v6677_v3 = vpop.f32.mrb[148].mxu1 }
 0x78f   :  { %v2635_v47 = vpop.f32.mrb[149].mxu1 }
 0x790   :  { %v6681_v63 = vpop.f32.mrb[150].mxu1 }
 0x791   :  { %3343 = vperm.xlu1 %5369, %v3263_v12   ;;  %3338 = vperm.xlu0 %5370, %v3262_v46   ;;  %v2638_v34 = vpop.f32.mrb[151].mxu1  ;;  %v5494_v12 = vld [vmem:[%s7166_s29 + $0x174] ss:$8 sps:$4 sm:$0xff]  }
 0x795   :  { %3353 = vperm.xlu1 %5369, %v3265_v61   ;;  %3348 = vperm.xlu0 %5370, %v3264_v42  }
 0x796   :  { %v6691_v48 = vpop.f32.mrb[152].mxu1 }
 0x797   :  { %v2643_v18 = vpop.f32.mrb[153].mxu1 }
 0x798   :  { %v6695_v55 = vpop.f32.mrb[154].mxu1 }
 0x799   :  { %v2646_v26 = vpop.f32.mrb[155].mxu1 }
 0x79e   :  { %v6701_v27 = vpop.f32.mrb[156].mxu1 }
 0x79f   :  { %v2651_v36 = vpop.f32.mrb[157].mxu1 }
 0x7a0   :  { %v6705_v22 = vpop.f32.mrb[158].mxu1 }
 0x7a1   :  { %v2654_v46 = vpop.f32.mrb[159].mxu1 }
 0x7a3   :  { %v2795_v19 = vpop.permute.xlu0 %2794  ;;  %v3072_v9 = vpop.permute.xlu1 %3071 }
 0x7a4   :  { %2849 = vmatpush1.bf16.msra.mxu0 %v2795_v19  ;;  %3126 = vmatpush1.bf16.msra.mxu1 %v3072_v9  ;;  %v5493_v19 = vld [vmem:[%s7166_s29 + $0x50] ss:$8 sps:$4 sm:$0xff]  }
 0x7a5   :  { %2850 = vmatprep.subr.bf16.mxu0 %v5588_v25  ;;  %3127 = vmatprep.subr.bf16.mxu1 %v5588_v25  ;;  %v5496_v9 = vld [vmem:[%s7166_s29 + $0x170] ss:$8 sps:$4 sm:$0xff]  }
 0x7ab   :  { %v2797_v52 = vpop.permute.xlu0 %2796  ;;  %v3074_v54 = vpop.permute.xlu1 %3073 }
 0x7ac   :  { %2851 = vmatpush1.bf16.msra.mxu0 %v2797_v52  ;;  %3128 = vmatpush1.bf16.msra.mxu1 %v3074_v54  ;;  %v5497_v54 = vld [vmem:[%s7166_s29 + $0x64] ss:$8 sps:$4 sm:$0xff]  }
 0x7ad   :  { %2852 = vmatprep.subr.bf16.mxu0 %v5588_v25  ;;  %3129 = vmatprep.subr.bf16.mxu1 %v5588_v25 }
 0x7b3   :  { %v2799_v15 = vpop.permute.xlu0 %2798  ;;  %v3076_v1 = vpop.permute.xlu1 %3075 }
 0x7b4   :  { %2853 = vmatpush1.bf16.msra.mxu0 %v2799_v15  ;;  %3130 = vmatpush1.bf16.msra.mxu1 %v3076_v1  ;;  %v6711_v61 = vpop.f32.mrb[160].mxu1  ;;  %v5500_v15 = vld [vmem:[%s7166_s29 + $0x184] ss:$8 sps:$4 sm:$0xff]  }
 0x7b5   :  { %2854 = vmatprep.subr.bf16.mxu0 %v5588_v25  ;;  %3131 = vmatprep.subr.bf16.mxu1 %v5588_v25  ;;  %v2659_v42 = vpop.f32.mrb[161].mxu1 }
 0x7b6   :  { %v6715_v52 = vpop.f32.mrb[162].mxu1 }
 0x7b7   :  { %v2662_v1 = vpop.f32.mrb[163].mxu1 }
 0x7bb   :  { %v2801_v50 = vpop.permute.xlu0 %2800  ;;  %v3078_v49 = vpop.permute.xlu1 %3077 }
 0x7bc   :  { %2855 = vmatpush1.bf16.msra.mxu0 %v2801_v50  ;;  %3132 = vmatpush1.bf16.msra.mxu1 %v3078_v49 }
 0x7bd   :  { %2856 = vmatprep.subr.bf16.mxu0 %v5588_v25  ;;  %3133 = vmatprep.subr.bf16.mxu1 %v5588_v25 }
 0x7c3   :  { %v2803_v24 = vpop.permute.xlu0 %2802  ;;  %v3080_v58 = vpop.permute.xlu1 %3079 }
 0x7c4   :  { %2857 = vmatpush1.bf16.msra.mxu0 %v2803_v24  ;;  %3134 = vmatpush1.bf16.msra.mxu1 %v3080_v58  ;;  %v5499_v24 = vld [vmem:[%s7166_s29 + $0x60] ss:$8 sps:$4 sm:$0xff]  }
 0x7c5   :  { %2858 = vmatprep.subr.bf16.mxu0 %v5588_v25  ;;  %3135 = vmatprep.subr.bf16.mxu1 %v5588_v25  ;;  %v6721_v50 = vpop.f32.mrb[164].mxu1  ;;  %v5502_v58 = vld [vmem:[%s7166_s29 + $0x180] ss:$8 sps:$4 sm:$0xff]  }
 0x7c6   :  { %v2667_v49 = vpop.f32.mrb[165].mxu1 }
 0x7cb   :  { %v2805_v0 = vpop.permute.xlu0 %2804  ;;  %v3082_v41 = vpop.permute.xlu1 %3081 }
 0x7cc   :  { %2859 = vmatpush1.bf16.msra.mxu0 %v2805_v0  ;;  %3136 = vmatpush1.bf16.msra.mxu1 %v3082_v41  ;;  %v6725_v0 = vpop.f32.mrb[166].mxu1  ;;  %v5503_v41 = vld [vmem:[%s7166_s29 + $0x74] ss:$8 sps:$4 sm:$0xff]  }
 0x7cd   :  { %2860 = vmatprep.subr.bf16.mxu0 %v5588_v25  ;;  %3137 = vmatprep.subr.bf16.mxu1 %v5588_v25 }
 0x7d3   :  { %v2807_v5 = vpop.permute.xlu0 %2806  ;;  %v3084_v56 = vpop.permute.xlu1 %3083 }
 0x7d4   :  { %2861 = vmatpush1.bf16.msra.mxu0 %v2807_v5  ;;  %3138 = vmatpush1.bf16.msra.mxu1 %v3084_v56  ;;  %v5506_v5 = vld [vmem:[%s7166_s29 + $0x194] ss:$8 sps:$4 sm:$0xff]   ;;  %v2670_v56 = vpop.f32.mrb[167].mxu1 }
 0x7d5   :  { %2862 = vmatprep.subr.bf16.mxu0 %v5588_v25  ;;  %3139 = vmatprep.subr.bf16.mxu1 %v5588_v25 }
 0x7db   :  { %v2809_v51 = vpop.permute.xlu0 %2808  ;;  %v3086_v16 = vpop.permute.xlu1 %3085 }
 0x7dc   :  { %2863 = vmatpush1.bf16.msra.mxu0 %v2809_v51  ;;  %3140 = vmatpush1.bf16.msra.mxu1 %v3086_v16 }
 0x7dd   :  { %2864 = vmatprep.subr.bf16.mxu0 %v5588_v25  ;;  %3141 = vmatprep.subr.bf16.mxu1 %v5588_v25 }
 0x7e3   :  { %v2811_v10 = vpop.permute.xlu0 %2810  ;;  %v3088_v20 = vpop.permute.xlu1 %3087 }
 0x7e4   :  { %2865 = vmatpush1.bf16.msra.mxu0 %v2811_v10  ;;  %3142 = vmatpush1.bf16.msra.mxu1 %v3088_v20  ;;  %v5505_v10 = vld [vmem:[%s7166_s29 + $0x70] ss:$8 sps:$4 sm:$0xff]  }
 0x7e5   :  { %3571 = vmatprep.subr.bf16.mxu0 %v5588_v25  ;;  %3660 = vmatprep.subr.bf16.mxu1 %v5588_v25  ;;  %v5508_v20 = vld [vmem:[%s7166_s29 + $0x190] ss:$8 sps:$4 sm:$0xff]  }
 0x7e7   :  { %2881 = vmatmul.mubr.bf16.vlgmr.msra.gmra.mrb[184].mxu0 %v5461_v59  ;;  %3158 = vmatmul.mubr.bf16.vlgmr.msra.gmra.mrb[184].mxu1 %v5464_v33  ;;  %v5509_v33 = vld [vmem:[%s7166_s29 + $0x84] ss:$8 sps:$4 sm:$0xff]  }
 0x7e8   :  { %4616 = vmatprep.mubr.msk.bf16.mxu0 %vm2571_vm11, %v5467_v35  ;;  %4661 = vmatprep.mubr.msk.bf16.mxu1 %vm2571_vm11, %v5470_v11  ;;  %v5512_v35 = vld [vmem:[%s7166_s29 + $0x1a4] ss:$8 sps:$4 sm:$0xff]  }
 0x7ef   :  { %2889 = vmatmul.mubr.bf16.gmra.mrb[188].mxu0 %v5469_v30  ;;  %3166 = vmatmul.mubr.bf16.gmra.mrb[188].mxu1 %v5472_v62 }
 0x7f0   :  { %4617 = vmatprep.mubr.msk.bf16.mxu0 %vm2571_vm11, %v5473_v29  ;;  %4662 = vmatprep.mubr.msk.bf16.mxu1 %vm2571_vm11, %v5476_v17  ;;  %v5511_v29 = vld [vmem:[%s7166_s29 + $0x80] ss:$8 sps:$4 sm:$0xff]  }
 0x7f1   :  { %v5514_v17 = vld [vmem:[%s7166_s29 + $0x1a0] ss:$8 sps:$4 sm:$0xff]  }
 0x7f4   :  { %v3274_v49 = vpop.permute.xlu1 %3273 }
 0x7f7   :  { %2897 = vmatmul.mubr.bf16.gmra.mrb[192].mxu0 %v5475_v28  ;;  %3174 = vmatmul.mubr.bf16.gmra.mrb[192].mxu1 %v5478_v6 }
 0x7f8   :  { %4618 = vmatprep.mubr.msk.bf16.mxu0 %vm2571_vm11, %v5479_v40  ;;  %4663 = vmatprep.mubr.msk.bf16.mxu1 %vm2571_vm11, %v5482_v32 }
 0x7ff   :  { %2905 = vmatmul.mubr.bf16.gmra.mrb[196].mxu0 %v5481_v13  ;;  %3182 = vmatmul.mubr.bf16.gmra.mrb[196].mxu1 %v5484_v21  ;;  %v6731_v51 = vpop.f32.mrb[168].mxu1 }
 0x800   :  { %4619 = vmatprep.mubr.msk.bf16.mxu0 %vm2571_vm11, %v5485_v2  ;;  %4664 = vmatprep.mubr.msk.bf16.mxu1 %vm2571_vm11, %v5488_v37  ;;  %v2675_v16 = vpop.f32.mrb[169].mxu1 }
 0x801   :  { %v6735_v59 = vpop.f32.mrb[170].mxu1 }
 0x802   :  { %v2678_v11 = vpop.f32.mrb[171].mxu1 }
 0x807   :  { %2913 = vmatmul.mubr.bf16.gmra.mrb[200].mxu0 %v5487_v23  ;;  %3190 = vmatmul.mubr.bf16.gmra.mrb[200].mxu1 %v5490_v53  ;;  %v6741_v30 = vpop.f32.mrb[172].mxu1 }
 0x808   :  { %4620 = vmatprep.mubr.msk.bf16.mxu0 %vm2571_vm11, %v5491_v14  ;;  %4665 = vmatprep.mubr.msk.bf16.mxu1 %vm2571_vm11, %v5494_v12  ;;  %v2683_v62 = vpop.f32.mrb[173].mxu1 }
 0x809   :  { %v6745_v47 = vpop.f32.mrb[174].mxu1 }
 0x80a   :  { %v2686_v34 = vpop.f32.mrb[175].mxu1 }
 0x80f   :  { %2921 = vmatmul.mubr.bf16.gmra.mrb[204].mxu0 %v5493_v19  ;;  %3198 = vmatmul.mubr.bf16.gmra.mrb[204].mxu1 %v5496_v9  ;;  %v6747_v28 = vpop.f32.mrb[176].mxu1 }
 0x810   :  { %4621 = vmatprep.mubr.msk.bf16.mxu0 %vm2571_vm11, %v5497_v54  ;;  %4666 = vmatprep.mubr.msk.bf16.mxu1 %vm2571_vm11, %v5500_v15  ;;  %v2691_v6 = vpop.f32.mrb[177].mxu1  ;;  %v3269_v54 = vpop.permute.xlu0 %3268 }
 0x811   :  { %v6749_v40 = vpop.f32.mrb[178].mxu1  ;;  %v3284_v6 = vpop.permute.xlu1 %3283 }
 0x812   :  { %v2694_v32 = vpop.f32.mrb[179].mxu1 }
 0x817   :  { %2929 = vmatmul.mubr.bf16.gmra.mrb[208].mxu0 %v5499_v24  ;;  %3206 = vmatmul.mubr.bf16.gmra.mrb[208].mxu1 %v5502_v58  ;;  %v6751_v18 = vpop.f32.mrb[180].mxu1 }
 0x818   :  { %4622 = vmatprep.mubr.msk.bf16.mxu0 %vm2571_vm11, %v5503_v41  ;;  %4667 = vmatprep.mubr.msk.bf16.mxu1 %vm2571_vm11, %v5506_v5  ;;  %v2699_v13 = vpop.f32.mrb[181].mxu1 }
 0x819   :  { %v6753_v21 = vpop.f32.mrb[182].mxu1 }
 0x81a   :  { %v2702_v2 = vpop.f32.mrb[183].mxu1 }
 0x81f   :  { %2937 = vmatmul.mubr.bf16.gmra.mrb[212].mxu0 %v5505_v10  ;;  %3214 = vmatmul.mubr.bf16.gmra.mrb[212].mxu1 %v5508_v20 }
 0x820   :  { %4623 = vmatprep.mubr.msk.bf16.mxu0 %vm2571_vm11, %v5509_v33  ;;  %4668 = vmatprep.mubr.msk.bf16.mxu1 %vm2571_vm11, %v5512_v35 }
 0x827   :  { %2945 = vmatmul.mubr.bf16.gmra.mrb[216].mxu0 %v5511_v29  ;;  %3222 = vmatmul.mubr.bf16.gmra.mrb[216].mxu1 %v5514_v17  ;;  %v3279_v17 = vpop.permute.xlu0 %3278 }
 0x8ba   :  { %v2882_v37 = vpop.f32.mrb[184].mxu0  ;;  %v3159_v26 = vpop.f32.mrb[184].mxu1 }
 0x8bb   :  { %v2883_v36 = vadd.f32 %v2882_v37, %v6677_v3  ;;  %v2884_v23 = vpop.f32.mrb[185].mxu0  ;;  %v3161_v53 = vpop.f32.mrb[185].mxu1 }
 0x8bc   :  { %v2885_v14 = vpop.f32.mrb[186].mxu0  ;;  %v3162_v12 = vpop.f32.mrb[186].mxu1 }
 0x8bd   :  { %v2886_v46 = vadd.f32 %v2885_v14, %v6681_v63  ;;  %v3230_v42 = vadd.f32 %v3159_v26, %v2883_v36  ;;  %v2887_v19 = vpop.f32.mrb[187].mxu0  ;;  %v3164_v9 = vpop.f32.mrb[187].mxu1 }
 0x8bf   :  { %v3356_v15 = vadd.f32 %v3269_v54, %v3230_v42  ;;  %v3231_v1 = vadd.f32 %v3162_v12, %v2886_v46  ;;  %v3289_v54 = vpop.permute.xlu0 %3288 }
 0x8c1   :  { %v6757_v24 = vmax.f32 %v3356_v15, 0.0  ;;  %v3357_v58 = vadd.f32 %v3274_v49, %v3231_v1  ;;  %v3294_v1 = vpop.permute.xlu1 %3293 }
 0x8c2   :  { %v2890_v41 = vpop.f32.mrb[188].mxu0  ;;  %v3167_v5 = vpop.f32.mrb[188].mxu1 }
 0x8c3   :  { %v6759_v56 = vmax.f32 %v3357_v58, 0.0  ;;  %v2891_v3 = vadd.f32 %v2890_v41, %v6691_v48  ;;  %v2892_v16 = vpop.f32.mrb[189].mxu0  ;;  %3392 = vrot.lane.b32.xlu0 %v6757_v24, %s5580_s22  ;;  %v3169_v63 = vpop.f32.mrb[189].mxu1 }
 0x8c4   :  { %v2893_v10 = vpop.f32.mrb[190].mxu0  ;;  %v3170_v20 = vpop.f32.mrb[190].mxu1 }
 0x8c5   :  { %v2894_v33 = vadd.f32 %v2893_v10, %v6695_v55  ;;  %v3232_v35 = vadd.f32 %v3167_v5, %v2891_v3  ;;  %3395 = vrot.lane.b32.xlu1 %v6759_v56, %s5580_s22  ;;  %v3550_v11 = vpack.c.bf16 %v6759_v56, %v6757_v24  ;;  %v2895_v62 = vpop.f32.mrb[191].mxu0  ;;  %v3172_v29 = vpop.f32.mrb[191].mxu1 }
 0x8c7   :  { %v3358_v48 = vadd.f32 %v3279_v17, %v3232_v35  ;;  %v3233_v34 = vadd.f32 %v3170_v20, %v2894_v33  ;;  %3572 = vmatpush1.bf16.msra.mxu0 %v3550_v11  ;;  %v3299_v17 = vpop.permute.xlu0 %3298 }
 0x8c8   :  { %3573 = vmatprep.subr.bf16.mxu0 %v5588_v25 }
 0x8c9   :  { %v6770_v32 = vmax.f32 %v3358_v48, 0.0  ;;  %v3359_v13 = vadd.f32 %v3284_v6, %v3233_v34  ;;  %v3304_v34 = vpop.permute.xlu1 %3303 }
 0x8ca   :  { %v2898_v55 = vpop.f32.mrb[192].mxu0  ;;  %v3175_v2 = vpop.f32.mrb[192].mxu1 }
 0x8cb   :  { %v6772_v37 = vmax.f32 %v3359_v13, 0.0  ;;  %v2899_v26 = vadd.f32 %v2898_v55, %v6701_v27  ;;  %v2900_v36 = vpop.f32.mrb[193].mxu0  ;;  %3398 = vrot.lane.b32.xlu0 %v6770_v32, %s5580_s22  ;;  %v3177_v23 = vpop.f32.mrb[193].mxu1 }
 0x8cc   :  { %v2901_v53 = vpop.f32.mrb[194].mxu0  ;;  %v3178_v14 = vpop.f32.mrb[194].mxu1 }
 0x8cd   :  { %v2902_v12 = vadd.f32 %v2901_v53, %v6705_v22  ;;  %v3234_v46 = vadd.f32 %v3175_v2, %v2899_v26  ;;  %3401 = vrot.lane.b32.xlu1 %v6772_v37, %s5580_s22  ;;  %v3551_v42 = vpack.c.bf16 %v6772_v37, %v6770_v32  ;;  %v2903_v19 = vpop.f32.mrb[195].mxu0  ;;  %v3180_v9 = vpop.f32.mrb[195].mxu1 }
 0x8cf   :  { %v3360_v27 = vadd.f32 %v3289_v54, %v3234_v46  ;;  %v3235_v15 = vadd.f32 %v3178_v14, %v2902_v12  ;;  %3574 = vmatpush1.bf16.msra.mxu0 %v3551_v42  ;;  %v3309_v54 = vpop.permute.xlu0 %3308 }
 0x8d0   :  { %3575 = vmatprep.subr.bf16.mxu0 %v5588_v25 }
 0x8d1   :  { %v6783_v49 = vmax.f32 %v3360_v27, 0.0  ;;  %v3361_v58 = vadd.f32 %v3294_v1, %v3235_v15  ;;  %v3314_v15 = vpop.permute.xlu1 %3313 }
 0x8d2   :  { %v2906_v22 = vpop.f32.mrb[196].mxu0  ;;  %v3183_v41 = vpop.f32.mrb[196].mxu1 }
 0x8d3   :  { %v6785_v5 = vmax.f32 %v3361_v58, 0.0  ;;  %v2907_v3 = vadd.f32 %v2906_v22, %v6711_v61  ;;  %v2908_v16 = vpop.f32.mrb[197].mxu0  ;;  %3404 = vrot.lane.b32.xlu0 %v6783_v49, %s5580_s22  ;;  %v3185_v63 = vpop.f32.mrb[197].mxu1 }
 0x8d4   :  { %v2909_v10 = vpop.f32.mrb[198].mxu0  ;;  %v3186_v20 = vpop.f32.mrb[198].mxu1 }
 0x8d5   :  { %v2910_v33 = vadd.f32 %v2909_v10, %v6715_v52  ;;  %v3236_v35 = vadd.f32 %v3183_v41, %v2907_v3  ;;  %3407 = vrot.lane.b32.xlu1 %v6785_v5, %s5580_s22  ;;  %v3552_v11 = vpack.c.bf16 %v6785_v5, %v6783_v49  ;;  %v2911_v62 = vpop.f32.mrb[199].mxu0  ;;  %v3188_v29 = vpop.f32.mrb[199].mxu1 }
 0x8d7   :  { %v3362_v61 = vadd.f32 %v3299_v17, %v3236_v35  ;;  %v3237_v48 = vadd.f32 %v3186_v20, %v2910_v33  ;;  %3576 = vmatpush1.bf16.msra.mxu0 %v3552_v11  ;;  %v3319_v17 = vpop.permute.xlu0 %3318 }
 0x8d8   :  { %3577 = vmatprep.subr.bf16.mxu0 %v5588_v25 }
 0x8d9   :  { %v6796_v6 = vmax.f32 %v3362_v61, 0.0  ;;  %v3363_v13 = vadd.f32 %v3304_v34, %v3237_v48  ;;  %v3324_v48 = vpop.permute.xlu1 %3323 }
 0x8da   :  { %v2914_v52 = vpop.f32.mrb[200].mxu0  ;;  %v3191_v55 = vpop.f32.mrb[200].mxu1 }
 0x8db   :  { %v6798_v2 = vmax.f32 %v3363_v13, 0.0  ;;  %v2915_v26 = vadd.f32 %v2914_v52, %v6721_v50  ;;  %v2916_v36 = vpop.f32.mrb[201].mxu0  ;;  %3410 = vrot.lane.b32.xlu0 %v6796_v6, %s5580_s22  ;;  %v3193_v23 = vpop.f32.mrb[201].mxu1 }
 0x8dc   :  { %v2917_v53 = vpop.f32.mrb[202].mxu0  ;;  %v3194_v14 = vpop.f32.mrb[202].mxu1 }
 0x8dd   :  { %v2918_v12 = vadd.f32 %v2917_v53, %v6725_v0  ;;  %v3238_v46 = vadd.f32 %v3191_v55, %v2915_v26  ;;  %3413 = vrot.lane.b32.xlu1 %v6798_v2, %s5580_s22  ;;  %v3553_v42 = vpack.c.bf16 %v6798_v2, %v6796_v6  ;;  %v2919_v19 = vpop.f32.mrb[203].mxu0  ;;  %v3196_v9 = vpop.f32.mrb[203].mxu1 }
 0x8df   :  { %v3364_v50 = vadd.f32 %v3309_v54, %v3238_v46  ;;  %v3239_v27 = vadd.f32 %v3194_v14, %v2918_v12  ;;  %3578 = vmatpush1.bf16.msra.mxu0 %v3553_v42  ;;  %v3329_v54 = vpop.permute.xlu0 %3328 }
 0x8e0   :  { %3579 = vmatprep.subr.bf16.mxu0 %v5588_v25 }
 0x8e1   :  { %v6809_v1 = vmax.f32 %v3364_v50, 0.0  ;;  %v3365_v58 = vadd.f32 %v3314_v15, %v3239_v27  ;;  %v3334_v27 = vpop.permute.xlu1 %3333 }
 0x8e2   :  { %v2922_v0 = vpop.f32.mrb[204].mxu0  ;;  %v3199_v22 = vpop.f32.mrb[204].mxu1 }
 0x8e3   :  { %v6811_v41 = vmax.f32 %v3365_v58, 0.0  ;;  %v2923_v3 = vadd.f32 %v2922_v0, %v6731_v51  ;;  %v2924_v16 = vpop.f32.mrb[205].mxu0  ;;  %3416 = vrot.lane.b32.xlu0 %v6809_v1, %s5580_s22  ;;  %v3201_v63 = vpop.f32.mrb[205].mxu1 }
 0x8e4   :  { %v2925_v10 = vpop.f32.mrb[206].mxu0  ;;  %v3202_v20 = vpop.f32.mrb[206].mxu1 }
 0x8e5   :  { %v2926_v33 = vadd.f32 %v2925_v10, %v6735_v59  ;;  %v3240_v35 = vadd.f32 %v3199_v22, %v2923_v3  ;;  %3419 = vrot.lane.b32.xlu1 %v6811_v41, %s5580_s22  ;;  %v3554_v11 = vpack.c.bf16 %v6811_v41, %v6809_v1  ;;  %v2927_v62 = vpop.f32.mrb[207].mxu0  ;;  %v3204_v29 = vpop.f32.mrb[207].mxu1 }
 0x8e7   :  { %v3366_v51 = vadd.f32 %v3319_v17, %v3240_v35  ;;  %v3241_v61 = vadd.f32 %v3202_v20, %v2926_v33  ;;  %3580 = vmatpush1.bf16.msra.mxu0 %v3554_v11  ;;  %v3339_v17 = vpop.permute.xlu0 %3338 }
 0x8e8   :  { %3581 = vmatprep.subr.bf16.mxu0 %v5588_v25 }
 0x8e9   :  { %v6822_v34 = vmax.f32 %v3366_v51, 0.0  ;;  %v3367_v13 = vadd.f32 %v3324_v48, %v3241_v61  ;;  %v3344_v61 = vpop.permute.xlu1 %3343 }
 0x8ea   :  { %v2930_v59 = vpop.f32.mrb[208].mxu0  ;;  %v3207_v52 = vpop.f32.mrb[208].mxu1 }
 0x8eb   :  { %v6824_v55 = vmax.f32 %v3367_v13, 0.0  ;;  %v2931_v26 = vadd.f32 %v2930_v59, %v6741_v30  ;;  %v2932_v36 = vpop.f32.mrb[209].mxu0  ;;  %3422 = vrot.lane.b32.xlu0 %v6822_v34, %s5580_s22  ;;  %v3209_v23 = vpop.f32.mrb[209].mxu1 }
 0x8ec   :  { %v2933_v53 = vpop.f32.mrb[210].mxu0  ;;  %v3210_v14 = vpop.f32.mrb[210].mxu1 }
 0x8ed   :  { %v2934_v12 = vadd.f32 %v2933_v53, %v6745_v47  ;;  %v3242_v46 = vadd.f32 %v3207_v52, %v2931_v26  ;;  %3425 = vrot.lane.b32.xlu1 %v6824_v55, %s5580_s22  ;;  %v3555_v42 = vpack.c.bf16 %v6824_v55, %v6822_v34  ;;  %v2935_v19 = vpop.f32.mrb[211].mxu0  ;;  %v3212_v9 = vpop.f32.mrb[211].mxu1 }
 0x8ef   :  { %v3368_v30 = vadd.f32 %v3329_v54, %v3242_v46  ;;  %v3243_v50 = vadd.f32 %v3210_v14, %v2934_v12  ;;  %3582 = vmatpush1.bf16.msra.mxu0 %v3555_v42  ;;  %v3349_v54 = vpop.permute.xlu0 %3348 }
 0x8f0   :  { %3583 = vmatprep.subr.bf16.mxu0 %v5588_v25 }
 0x8f1   :  { %v6835_v15 = vmax.f32 %v3368_v30, 0.0  ;;  %v3369_v58 = vadd.f32 %v3334_v27, %v3243_v50  ;;  %v3354_v50 = vpop.permute.xlu1 %3353 }
 0x8f2   :  { %v2938_v47 = vpop.f32.mrb[212].mxu0  ;;  %v3215_v0 = vpop.f32.mrb[212].mxu1 }
 0x8f3   :  { %v6837_v22 = vmax.f32 %v3369_v58, 0.0  ;;  %v2939_v3 = vadd.f32 %v2938_v47, %v6747_v28  ;;  %v2940_v16 = vpop.f32.mrb[213].mxu0  ;;  %3428 = vrot.lane.b32.xlu0 %v6835_v15, %s5580_s22  ;;  %v3217_v63 = vpop.f32.mrb[213].mxu1 }
 0x8f4   :  { %v2941_v10 = vpop.f32.mrb[214].mxu0  ;;  %v3218_v20 = vpop.f32.mrb[214].mxu1 }
 0x8f5   :  { %v2942_v33 = vadd.f32 %v2941_v10, %v6749_v40  ;;  %v3244_v35 = vadd.f32 %v3215_v0, %v2939_v3  ;;  %3431 = vrot.lane.b32.xlu1 %v6837_v22, %s5580_s22  ;;  %v3556_v11 = vpack.c.bf16 %v6837_v22, %v6835_v15  ;;  %v2943_v62 = vpop.f32.mrb[215].mxu0  ;;  %v3220_v29 = vpop.f32.mrb[215].mxu1 }
 0x8f7   :  { %v3370_v28 = vadd.f32 %v3339_v17, %v3244_v35  ;;  %v3245_v51 = vadd.f32 %v3218_v20, %v2942_v33  ;;  %3584 = vmatpush1.bf16.msra.mxu0 %v3556_v11 }
 0x8f8   :  { %3585 = vmatprep.subr.bf16.mxu0 %v5588_v25 }
 0x8f9   :  { %v6848_v48 = vmax.f32 %v3370_v28, 0.0  ;;  %v3371_v13 = vadd.f32 %v3344_v61, %v3245_v51 }
 0x8fa   :  { %v2946_v40 = vpop.f32.mrb[216].mxu0  ;;  %v3223_v59 = vpop.f32.mrb[216].mxu1 }
 0x8fb   :  { %v6850_v52 = vmax.f32 %v3371_v13, 0.0  ;;  %v2947_v26 = vadd.f32 %v2946_v40, %v6751_v18  ;;  %v2948_v36 = vpop.f32.mrb[217].mxu0  ;;  %3434 = vrot.lane.b32.xlu0 %v6848_v48, %s5580_s22  ;;  %v3225_v23 = vpop.f32.mrb[217].mxu1 }
 0x8fc   :  { %v2949_v53 = vpop.f32.mrb[218].mxu0  ;;  %v3226_v14 = vpop.f32.mrb[218].mxu1 }
 0x8fd   :  { %v2950_v12 = vadd.f32 %v2949_v53, %v6753_v21  ;;  %v3246_v46 = vadd.f32 %v3223_v59, %v2947_v26  ;;  %3437 = vrot.lane.b32.xlu1 %v6850_v52, %s5580_s22  ;;  %v3557_v42 = vpack.c.bf16 %v6850_v52, %v6848_v48  ;;  %v2951_v19 = vpop.f32.mrb[219].mxu0  ;;  %v3228_v9 = vpop.f32.mrb[219].mxu1 }
 0x8ff   :  { %v3372_v18 = vadd.f32 %v3349_v54, %v3246_v46  ;;  %v3247_v30 = vadd.f32 %v3226_v14, %v2950_v12  ;;  %3586 = vmatpush1.bf16.msra.mxu0 %v3557_v42 }
 0x900   :  { %3587 = vmatprep.subr.bf16.mxu0 %v5588_v25 }
 0x901   :  { %v6861_v27 = vmax.f32 %v3372_v18, 0.0  ;;  %v3373_v58 = vadd.f32 %v3354_v50, %v3247_v30 }
 0x903   :  { %v6863_v21 = vmax.f32 %v3373_v58, 0.0  ;;  %3440 = vrot.lane.b32.xlu0 %v6861_v27, %s5580_s22 }
 0x905   :  { %3443 = vrot.lane.b32.xlu1 %v6863_v21, %s5580_s22  ;;  %v3558_v47 = vpack.c.bf16 %v6863_v21, %v6861_v27 }
 0x907   :  { %3588 = vmatpush1.bf16.msra.mxu0 %v3558_v47 }
 0x908   :  { %3761 = vmatprep.subr.bf16.mxu0 %v5588_v25 }
 0x935   :  { %v3393_v0 = vpop.permute.xlu0 %3392 }
 0x936   :  { %v3394_v3 = vsel %vm144_vm0, %v3393_v0, %v6757_v24 }
 0x937   :  { %3446 = vrot.lane.b32.xlu0 %v3394_v3, %s5580_s22  ;;  %v3396_v16 = vpop.permute.xlu1 %3395 }
 0x938   :  { %v3397_v63 = vsel %vm144_vm0, %v3396_v16, %v6759_v56 }
 0x939   :  { %3448 = vrot.lane.b32.xlu1 %v3397_v63, %s5580_s22 }
 0x93d   :  { %v3399_v10 = vpop.permute.xlu0 %3398 }
 0x93e   :  { %v3400_v20 = vsel %vm144_vm0, %v3399_v10, %v6770_v32 }
 0x93f   :  { %3450 = vrot.lane.b32.xlu0 %v3400_v20, %s5580_s22  ;;  %v3402_v33 = vpop.permute.xlu1 %3401 }
 0x940   :  { %v3403_v35 = vsel %vm144_vm0, %v3402_v33, %v6772_v37 }
 0x941   :  { %3452 = vrot.lane.b32.xlu1 %v3403_v35, %s5580_s22 }
 0x945   :  { %v3405_v11 = vpop.permute.xlu0 %3404 }
 0x946   :  { %v3406_v62 = vsel %vm144_vm0, %v3405_v11, %v6783_v49 }
 0x947   :  { %3454 = vrot.lane.b32.xlu0 %v3406_v62, %s5580_s22  ;;  %v3408_v29 = vpop.permute.xlu1 %3407 }
 0x948   :  { %v3409_v17 = vsel %vm144_vm0, %v3408_v29, %v6785_v5 }
 0x949   :  { %3456 = vrot.lane.b32.xlu1 %v3409_v17, %s5580_s22 }
 0x94d   :  { %v3411_v28 = vpop.permute.xlu0 %3410 }
 0x94e   :  { %v3412_v51 = vsel %vm144_vm0, %v3411_v28, %v6796_v6 }
 0x94f   :  { %3458 = vrot.lane.b32.xlu0 %v3412_v51, %s5580_s22  ;;  %v3414_v61 = vpop.permute.xlu1 %3413 }
 0x950   :  { %v3415_v13 = vsel %vm144_vm0, %v3414_v61, %v6798_v2 }
 0x951   :  { %3460 = vrot.lane.b32.xlu1 %v3415_v13, %s5580_s22 }
 0x955   :  { %v3417_v40 = vpop.permute.xlu0 %3416 }
 0x956   :  { %v3418_v59 = vsel %vm144_vm0, %v3417_v40, %v6809_v1 }
 0x957   :  { %3462 = vrot.lane.b32.xlu0 %v3418_v59, %s5580_s22  ;;  %v3420_v26 = vpop.permute.xlu1 %3419 }
 0x958   :  { %v3421_v36 = vsel %vm144_vm0, %v3420_v26, %v6811_v41 }
 0x959   :  { %3464 = vrot.lane.b32.xlu1 %v3421_v36, %s5580_s22 }
 0x95d   :  { %v3423_v23 = vpop.permute.xlu0 %3422 }
 0x95e   :  { %v3424_v53 = vsel %vm144_vm0, %v3423_v23, %v6822_v34 }
 0x95f   :  { %3466 = vrot.lane.b32.xlu0 %v3424_v53, %s5580_s22  ;;  %v3426_v14 = vpop.permute.xlu1 %3425 }
 0x960   :  { %v3427_v12 = vsel %vm144_vm0, %v3426_v14, %v6824_v55 }
 0x961   :  { %3468 = vrot.lane.b32.xlu1 %v3427_v12, %s5580_s22 }
 0x965   :  { %v3429_v46 = vpop.permute.xlu0 %3428 }
 0x966   :  { %v3430_v42 = vsel %vm144_vm0, %v3429_v46, %v6835_v15 }
 0x967   :  { %3470 = vrot.lane.b32.xlu0 %v3430_v42, %s5580_s22  ;;  %v3432_v19 = vpop.permute.xlu1 %3431 }
 0x968   :  { %v3433_v9 = vsel %vm144_vm0, %v3432_v19, %v6837_v22 }
 0x969   :  { %3472 = vrot.lane.b32.xlu1 %v3433_v9, %s5580_s22 }
 0x96d   :  { %v3435_v54 = vpop.permute.xlu0 %3434 }
 0x96e   :  { %v3436_v18 = vsel %vm144_vm0, %v3435_v54, %v6848_v48 }
 0x96f   :  { %3474 = vrot.lane.b32.xlu0 %v3436_v18, %s5580_s22  ;;  %v3438_v30 = vpop.permute.xlu1 %3437 }
 0x970   :  { %v3439_v50 = vsel %vm144_vm0, %v3438_v30, %v6850_v52 }
 0x971   :  { %3476 = vrot.lane.b32.xlu1 %v3439_v50, %s5580_s22 }
 0x975   :  { %v3441_v58 = vpop.permute.xlu0 %3440 }
 0x976   :  { %v3442_v47 = vsel %vm144_vm0, %v3441_v58, %v6861_v27  ;;  %v5515_v58 = vld [vmem:[%s7168_s8 + $0x10] ss:$8 sps:$4 sm:$0x1f]  }
 0x977   :  { %3478 = vrot.lane.b32.xlu0 %v3442_v47, %s5580_s22  ;;  %v3444_v0 = vpop.permute.xlu1 %3443 }
 0x978   :  { %v3445_v3 = vsel %vm144_vm0, %v3444_v0, %v6863_v21 }
 0x979   :  { %3480 = vrot.lane.b32.xlu1 %v3445_v3, %s5580_s22 }
 0x9a9   :  { %v3447_v16 = vpop.permute.xlu0 %3446 }
 0x9aa   :  { %v3482_v63 = vsel %vm144_vm0, %v3447_v16, %v6757_v24 }
 0x9ab   :  { %v3449_v10 = vpop.permute.xlu1 %3448  ;;  %v3500_v33 = vmul.f32 %v3482_v63, %v5842_v4 }
 0x9ac   :  { %v3483_v20 = vsel %vm144_vm0, %v3449_v10, %v6759_v56 }
 0x9ad   :  { %v3501_v35 = vmul.f32 %v3483_v20, %v5842_v4 }
 0x9af   :  { %v3538_v11 = vpack.c.bf16 %v3501_v35, %v3500_v33 }
 0x9b1   :  { %v3451_v62 = vpop.permute.xlu0 %3450  ;;  %3630 = vrot.lane.b32.xlu0 %v3538_v11, %s5587_s17  ;;  %v3519_v11 = vmul.f32 %v3483_v20, %v5846_v7 }
 0x9b2   :  { %v3484_v29 = vsel %vm144_vm0, %v3451_v62, %v6770_v32 }
 0x9b3   :  { %v3453_v17 = vpop.permute.xlu1 %3452  ;;  %v3502_v24 = vmul.f32 %v3484_v29, %v5842_v4 }
 0x9b4   :  { %v3485_v28 = vsel %vm144_vm0, %v3453_v17, %v6772_v37  ;;  %v3518_v17 = vmul.f32 %v3482_v63, %v5846_v7 }
 0x9b5   :  { %v3503_v51 = vmul.f32 %v3485_v28, %v5842_v4 }
 0x9b7   :  { %v3539_v56 = vpack.c.bf16 %v3503_v51, %v3502_v24 }
 0x9b9   :  { %v3455_v61 = vpop.permute.xlu0 %3454  ;;  %3632 = vrot.lane.b32.xlu1 %v3539_v56, %s5587_s17  ;;  %v3521_v56 = vmul.f32 %v3485_v28, %v5846_v7 }
 0x9ba   :  { %v6942_v13 = vsel %vm144_vm0, %v3455_v61, %v6783_v49 }
 0x9bb   :  { %v3457_v40 = vpop.permute.xlu1 %3456  ;;  %v3504_v37 = vmul.f32 %v6942_v13, %v5842_v4 }
 0x9bc   :  { %v6946_v32 = vsel %vm144_vm0, %v3457_v40, %v6785_v5  ;;  %v5520_v40 = vld [vmem:[%s7168_s8 + $0x4] ss:$8 sps:$4 sm:$0x1f]  }
 0x9bd   :  { %v3505_v59 = vmul.f32 %v6946_v32, %v5842_v4  ;;  %4676 = vmatprep.mubr.msk.bf16.mxu1 %vm2571_vm11, %v5520_v40  ;;  %v5532_v40 = vld [vmem:[%s5602_s9 + $0x8] sm:$0xff]  }
 0x9bf   :  { %v3540_v26 = vpack.c.bf16 %v3505_v59, %v3504_v37  ;;  %v3520_v37 = vmul.f32 %v3484_v29, %v5846_v7 }
 0x9c1   :  { %v3459_v36 = vpop.permute.xlu0 %3458  ;;  %3634 = vrot.lane.b32.xlu0 %v3540_v26, %s5587_s17  ;;  %v3705_v59 = vpack.c.bf16 %v3521_v56, %v3520_v37 }
 0x9c2   :  { %v3488_v23 = vsel %vm144_vm0, %v3459_v36, %v6796_v6 }
 0x9c3   :  { %v3461_v49 = vpop.permute.xlu1 %3460  ;;  %v3506_v5 = vmul.f32 %v3488_v23, %v5842_v4  ;;  %v3524_v28 = vmul.f32 %v3488_v23, %v5846_v7 }
 0x9c4   :  { %v3489_v53 = vsel %vm144_vm0, %v3461_v49, %v6798_v2 }
 0x9c5   :  { %v3507_v14 = vmul.f32 %v3489_v53, %v5842_v4 }
 0x9c7   :  { %v3541_v12 = vpack.c.bf16 %v3507_v14, %v3506_v5 }
 0x9c9   :  { %v3463_v46 = vpop.permute.xlu0 %3462  ;;  %3636 = vrot.lane.b32.xlu1 %v3541_v12, %s5587_s17 }
 0x9ca   :  { %v6962_v42 = vsel %vm144_vm0, %v3463_v46, %v6809_v1  ;;  %v3523_v46 = vmul.f32 %v6946_v32, %v5846_v7 }
 0x9cb   :  { %v3465_v19 = vpop.permute.xlu1 %3464  ;;  %v3508_v2 = vmul.f32 %v6962_v42, %v5842_v4  ;;  %v3526_v32 = vmul.f32 %v6962_v42, %v5846_v7 }
 0x9cc   :  { %v6966_v6 = vsel %vm144_vm0, %v3465_v19, %v6811_v41  ;;  %v5517_v41 = vld [vmem:[%s7168_s8 + $0x14] ss:$8 sps:$4 sm:$0x1f]  }
 0x9cd   :  { %v3509_v9 = vmul.f32 %v6966_v6, %v5842_v4  ;;  %4673 = vmatprep.mubr.msk.bf16.mxu0 %vm2571_vm11, %v5517_v41 }
 0x9ce   :  { %3604 = vmatmul.mubr.bf16.vlgmr.msra.gmra.mrb[220].mxu0 %v5515_v58 }
 0x9cf   :  { %v3542_v54 = vpack.c.bf16 %v3509_v9, %v3508_v2  ;;  %v3522_v9 = vmul.f32 %v6942_v13, %v5846_v7  ;;  %v4096_v13 = vld [vmem:[%s7169_s14] sm:$0xff] }
 0x9d1   :  { %v3467_v18 = vpop.permute.xlu0 %3466  ;;  %3638 = vrot.lane.b32.xlu0 %v3542_v54, %s5587_s17  ;;  %v3706_v54 = vpack.c.bf16 %v3523_v46, %v3522_v9 }
 0x9d2   :  { %v3492_v30 = vsel %vm144_vm0, %v3467_v18, %v6822_v34  ;;  %v3527_v18 = vmul.f32 %v6966_v6, %v5846_v7 }
 0x9d3   :  { %v3469_v1 = vpop.permute.xlu1 %3468  ;;  %v3510_v47 = vmul.f32 %v3492_v30, %v5842_v4 }
 0x9d4   :  { %v3493_v50 = vsel %vm144_vm0, %v3469_v1, %v6824_v55  ;;  %v3708_v1 = vpack.c.bf16 %v3527_v18, %v3526_v32 }
 0x9d5   :  { %v3511_v0 = vmul.f32 %v3493_v50, %v5842_v4  ;;  %v3529_v49 = vmul.f32 %v3493_v50, %v5846_v7 }
 0x9d7   :  { %v3543_v3 = vpack.c.bf16 %v3511_v0, %v3510_v47  ;;  %v5522_v0 = vld [vmem:[%s7168_s8 + $0x24] ss:$8 sps:$4 sm:$0x1f]  }
 0x9d8   :  { %4681 = vmatprep.mubr.msk.bf16.mxu0 %vm2571_vm11, %v5522_v0 }
 0x9d9   :  { %v3471_v16 = vpop.permute.xlu0 %3470  ;;  %3640 = vrot.lane.b32.xlu1 %v3543_v3, %s5587_s17  ;;  %v4097_v3 = vld [vmem:[%s7169_s14 + $0x8] sm:$0x1] }
 0x9da   :  { %v3494_v34 = vsel %vm144_vm0, %v3471_v16, %v6835_v15  ;;  %v3704_v15 = vpack.c.bf16 %v3519_v11, %v3518_v17 }
 0x9db   :  { %v3473_v10 = vpop.permute.xlu1 %3472  ;;  %v3512_v33 = vmul.f32 %v3494_v34, %v5842_v4  ;;  %v3530_v58 = vmul.f32 %v3494_v34, %v5846_v7 }
 0x9dc   :  { %v3495_v55 = vsel %vm144_vm0, %v3473_v10, %v6837_v22 }
 0x9dd   :  { %v3513_v35 = vmul.f32 %v3495_v55, %v5842_v4  ;;  %v3531_v50 = vmul.f32 %v3495_v55, %v5846_v7 }
 0x9df   :  { %v3544_v62 = vpack.c.bf16 %v3513_v35, %v3512_v33  ;;  %v3710_v6 = vpack.c.bf16 %v3531_v50, %v3530_v58 }
 0x9e1   :  { %v3475_v24 = vpop.permute.xlu0 %3474  ;;  %3642 = vrot.lane.b32.xlu0 %v3544_v62, %s5587_s17 }
 0x9e2   :  { %v3496_v51 = vsel %vm144_vm0, %v3475_v24, %v6848_v48  ;;  %v3525_v48 = vmul.f32 %v3489_v53, %v5846_v7  ;;  %v3528_v53 = vmul.f32 %v3492_v30, %v5846_v7 }
 0x9e3   :  { %v3477_v61 = vpop.permute.xlu1 %3476  ;;  %v3514_v20 = vmul.f32 %v3496_v51, %v5842_v4 }
 0x9e4   :  { %v3497_v22 = vsel %vm144_vm0, %v3477_v61, %v6850_v52  ;;  %v3707_v29 = vpack.c.bf16 %v3525_v48, %v3524_v28  ;;  %v5531_v61 = vld [vmem:[%s5602_s9] sm:$0xff]  }
 0x9e5   :  { %v3515_v63 = vmul.f32 %v3497_v22, %v5842_v4  ;;  %3731 = vrot.lane.b32.xlu0 %v3704_v15, %s5583_s0  ;;  %v3533_v19 = vmul.f32 %v3497_v22, %v5846_v7  ;;  %v7170_v15 = vmov 0.0  }
 0x9e7   :  { %v3545_v26 = vpack.c.bf16 %v3515_v63, %v3514_v20  ;;  %v5533_v20 = vld [vmem:[%s5602_s9 + $0x10] sm:$0xff]  }
 0x9e9   :  { %v3479_v36 = vpop.permute.xlu0 %3478  ;;  %3733 = vrot.lane.b32.xlu0 %v3705_v59, %s5583_s0  ;;  %3644 = vrot.lane.b32.xlu1 %v3545_v26, %s5587_s17  ;;  %v5534_v59 = vld [vmem:[%s5602_s9 + $0x18] sm:$0xff]   ;;  %v5521_v26 = vld [vmem:[%s7171_s19] sm:$0x1f]   ;;  %s7172_s9 = sld [smem:[#allocation10_spill]] }
 0x9ea   :  { %v3498_v52 = vsel %vm144_vm0, %v3479_v36, %v6861_v27  ;;  %v3709_v27 = vpack.c.bf16 %v3529_v49, %v3528_v53 }
 0x9eb   :  { %v3481_v5 = vpop.permute.xlu1 %3480  ;;  %v3516_v12 = vmul.f32 %v3498_v52, %v5842_v4  ;;  %v3534_v47 = vmul.f32 %v3498_v52, %v5846_v7  ;;  %v5524_v52 = vld [vmem:[%s7168_s8 + $0x20] ss:$8 sps:$4 sm:$0x1f]  }
 0x9ec   :  { %v3499_v14 = vsel %vm144_vm0, %v3481_v5, %v6863_v21  ;;  %v3532_v21 = vmul.f32 %v3496_v51, %v5846_v7  ;;  %v5518_v51 = vld [vmem:[%s7168_s8] ss:$8 sps:$4 sm:$0x1f]  }
 0x9ed   :  { %v3517_v23 = vmul.f32 %v3499_v14, %v5842_v4  ;;  %3737 = vrot.lane.b32.xlu0 %v3707_v29, %s5583_s0  ;;  %v3535_v41 = vmul.f32 %v3499_v14, %v5846_v7  ;;  %v5526_v29 = vld [vmem:[%s7173_s6] sm:$0x1f]  }
 0x9ee   :  { %v3711_v30 = vpack.c.bf16 %v3533_v19, %v3532_v21 }
 0x9ef   :  { %v3546_v2 = vpack.c.bf16 %v3517_v23, %v3516_v12  ;;  %v3712_v42 = vpack.c.bf16 %v3535_v41, %v3534_v47 }
 0x9f1   :  { %3741 = vrot.lane.b32.xlu0 %v3709_v27, %s5583_s0  ;;  %3646 = vrot.lane.b32.xlu1 %v3546_v2, %s5587_s17 }
 0x9f5   :  { %3745 = vrot.lane.b32.xlu0 %v3711_v30, %s5583_s0  ;;  %3735 = vrot.lane.b32.xlu1 %v3706_v54, %s5583_s0 }
 0x9f9   :  { %4100 = vperm.xlu0 %5370, %v4096_v13   ;;  %3739 = vrot.lane.b32.xlu1 %v3708_v1, %s5583_s0 }
 0x9fd   :  { %3743 = vrot.lane.b32.xlu1 %v3710_v6, %s5583_s0 }
 0xa01   :  { %3747 = vrot.lane.b32.xlu1 %v3712_v42, %s5583_s0 }
 0xa05   :  { %4105 = vperm.xlu1 %5369, %v4097_v3  }
 0xa23   :  { %v3631_v16 = vpop.permute.xlu0 %3630 }
 0xa24   :  { %3661 = vmatpush1.bf16.msra.mxu1 %v3631_v16 }
 0xa25   :  { %3662 = vmatprep.subr.bf16.mxu1 %v5588_v25 }
 0xa2b   :  { %v3633_v34 = vpop.permute.xlu1 %3632 }
 0xa2c   :  { %3663 = vmatpush1.bf16.msra.mxu1 %v3633_v34 }
 0xa2d   :  { %3664 = vmatprep.subr.bf16.mxu1 %v5588_v25 }
 0xa33   :  { %v3635_v10 = vpop.permute.xlu0 %3634 }
 0xa34   :  { %3665 = vmatpush1.bf16.msra.mxu1 %v3635_v10 }
 0xa35   :  { %3666 = vmatprep.subr.bf16.mxu1 %v5588_v25 }
 0xa3b   :  { %v3637_v7 = vpop.permute.xlu1 %3636 }
 0xa3c   :  { %3667 = vmatpush1.bf16.msra.mxu1 %v3637_v7 }
 0xa3d   :  { %3668 = vmatprep.subr.bf16.mxu1 %v5588_v25 }
 0xa43   :  { %v3639_v55 = vpop.permute.xlu0 %3638 }
 0xa44   :  { %3669 = vmatpush1.bf16.msra.mxu1 %v3639_v55 }
 0xa45   :  { %3670 = vmatprep.subr.bf16.mxu1 %v5588_v25 }
 0xa4b   :  { %v3641_v33 = vpop.permute.xlu1 %3640 }
 0xa4c   :  { %3671 = vmatpush1.bf16.msra.mxu1 %v3641_v33 }
 0xa4d   :  { %3672 = vmatprep.subr.bf16.mxu1 %v5588_v25 }
 0xa53   :  { %v3643_v35 = vpop.permute.xlu0 %3642 }
 0xa54   :  { %3673 = vmatpush1.bf16.msra.mxu1 %v3643_v35 }
 0xa55   :  { %3674 = vmatprep.subr.bf16.mxu1 %v5588_v25 }
 0xa57   :  { %v3732_v11 = vpop.permute.xlu0 %3731 }
 0xa58   :  { %3762 = vmatpush1.bf16.msra.mxu0 %v3732_v11 }
 0xa59   :  { %3763 = vmatprep.subr.bf16.mxu0 %v5588_v25 }
 0xa5b   :  { %v3734_v62 = vpop.permute.xlu0 %3733  ;;  %v3645_v17 = vpop.permute.xlu1 %3644 }
 0xa5c   :  { %3675 = vmatpush1.bf16.msra.mxu1 %v3645_v17  ;;  %3764 = vmatpush1.bf16.msra.mxu0 %v3734_v62 }
 0xa5d   :  { %3676 = vmatprep.subr.bf16.mxu1 %v5588_v25  ;;  %3765 = vmatprep.subr.bf16.mxu0 %v5588_v25 }
 0xa5f   :  { %v3738_v22 = vpop.permute.xlu0 %3737 }
 0xa63   :  { %v3647_v24 = vpop.permute.xlu1 %3646  ;;  %v3742_v63 = vpop.permute.xlu0 %3741 }
 0xa64   :  { %3677 = vmatpush1.bf16.msra.mxu1 %v3647_v24 }
 0xa65   :  { %5229 = vmatprep.subr.bf16.mxu1 %v7170_v15 }
 0xa67   :  { %v3736_v56 = vpop.permute.xlu1 %3735  ;;  %3693 = vmatmul.mubr.bf16.vlgmr.msra.gmra.mrb[220].mxu1 %v5518_v51  ;;  %v3746_v28 = vpop.permute.xlu0 %3745 }
 0xa68   :  { %3766 = vmatpush1.bf16.msra.mxu0 %v3736_v56  ;;  %5230 = vmatpush3.bf16.msra.mxu1 %v5531_v61 }
 0xa69   :  { %3767 = vmatprep.subr.bf16.mxu0 %v5588_v25  ;;  %5231 = vmatprep.subr.bf16.mxu1 %v7170_v15 }
 0xa6a   :  { %5239 = vmatprep.mubr.msk.bf16.mxu1 %vm5582_vm1, %v7170_v15 }
 0xa6b   :  { %v3740_v37 = vpop.permute.xlu1 %3739 }
 0xa6c   :  { %3768 = vmatpush1.bf16.msra.mxu0 %v3738_v22  ;;  %5232 = vmatpush3.bf16.msra.mxu1 %v5532_v40 }
 0xa6d   :  { %3769 = vmatprep.subr.bf16.mxu0 %v5588_v25  ;;  %5233 = vmatprep.subr.bf16.mxu1 %v7170_v15 }
 0xa6f   :  { %v3744_v48 = vpop.permute.xlu1 %3743 }
 0xa70   :  { %3770 = vmatpush1.bf16.msra.mxu0 %v3740_v37  ;;  %5234 = vmatpush3.bf16.msra.mxu1 %v5533_v20 }
 0xa71   :  { %3771 = vmatprep.subr.bf16.mxu0 %v5588_v25  ;;  %5235 = vmatprep.subr.bf16.mxu1 %v7170_v15 }
 0xa73   :  { %v3748_v36 = vpop.permute.xlu1 %3747 }
 0xa74   :  { %3772 = vmatpush1.bf16.msra.mxu0 %v3742_v63  ;;  %5236 = vmatpush3.bf16.msra.mxu1 %v5534_v59 }
 0xa75   :  { %3773 = vmatprep.subr.bf16.mxu0 %v5588_v25  ;;  %5237 = vmatprep.subr.bf16.mxu1 %v7170_v15 }
 0xa78   :  { %3774 = vmatpush1.bf16.msra.mxu0 %v3744_v48  ;;  %5238 = vmatpush3.bf16.msra.mxu1 %v5906_v31  ;;  %v4101_v63 = vpop.permute.xlu0 %4100 }
 0xa79   :  { %3775 = vmatprep.subr.bf16.mxu0 %v5588_v25  ;;  %5243 = vmatprep.subr.bf16.mxu1 %v7170_v15 }
 0xa7b   :  { %5240 = vmatmul.mubr.msk.bf16.vlgmr.msra.gmra.mrb[224].mxu1 %vm1148_vm8, %v5521_v26 }
 0xa7c   :  { %3776 = vmatpush1.bf16.msra.mxu0 %v3746_v28  ;;  %5244 = vmatpush3.bf16.msra.mxu1 %v5531_v61  ;;  %v4113_v28 = vstv %s4112_s12 }
 0xa7d   :  { %3777 = vmatprep.subr.bf16.mxu0 %v5588_v25  ;;  %5245 = vmatprep.subr.bf16.mxu1 %v7170_v15  ;;  %v5525_v25 = vld [vmem:[%s7172_s9] sm:$0x1f]  }
 0xa7e   :  { %5253 = vmatprep.mubr.msk.bf16.mxu1 %vm5582_vm1, %v7170_v15 }
 0xa80   :  { %3778 = vmatpush1.bf16.msra.mxu0 %v3748_v36  ;;  %5246 = vmatpush3.bf16.msra.mxu1 %v5532_v40 }
 0xa81   :  { %5247 = vmatprep.subr.bf16.mxu1 %v7170_v15  ;;  %5257 = vmatprep.subr.bf16.mxu0 %v7170_v15 }
 0xa83   :  { %3794 = vmatmul.mubr.bf16.vlgmr.msra.gmra.mrb[224].mxu0 %v5524_v52 }
 0xa84   :  { %5248 = vmatpush3.bf16.msra.mxu1 %v5533_v20  ;;  %5258 = vmatpush3.bf16.msra.mxu0 %v5531_v61  ;;  %v4106_v26 = vpop.permute.xlu1 %4105 }
 0xa85   :  { %5249 = vmatprep.subr.bf16.mxu1 %v7170_v15  ;;  %5259 = vmatprep.subr.bf16.mxu0 %v7170_v15 }
 0xa86   :  { %5267 = vmatprep.mubr.msk.bf16.mxu0 %vm5582_vm1, %v7170_v15 }
 0xa88   :  { %5250 = vmatpush3.bf16.msra.mxu1 %v5534_v59  ;;  %5260 = vmatpush3.bf16.msra.mxu0 %v5532_v40 }
 0xa89   :  { %5251 = vmatprep.subr.bf16.mxu1 %v7170_v15  ;;  %5261 = vmatprep.subr.bf16.mxu0 %v7170_v15 }
 0xa8c   :  { %5252 = vmatpush3.bf16.msra.mxu1 %v5906_v31  ;;  %5262 = vmatpush3.bf16.msra.mxu0 %v5533_v20 }
 0xa8d   :  { %5263 = vmatprep.subr.bf16.mxu0 %v7170_v15  ;;  %5271 = vmatprep.subr.bf16.mxu1 %v7170_v15 }
 0xa8f   :  { %5254 = vmatmul.mubr.msk.bf16.vlgmr.msra.gmra.mrb[228].mxu1 %vm1148_vm8, %v5525_v25  ;;  %v4117_v25 = vstv %s4691_s20 }
 0xa90   :  { %5264 = vmatpush3.bf16.msra.mxu0 %v5534_v59  ;;  %5272 = vmatpush3.bf16.msra.mxu1 %v6098_v60 }
 0xa91   :  { %5265 = vmatprep.subr.bf16.mxu0 %v7170_v15  ;;  %5273 = vmatprep.mubr.msk.bf16.mxu1 %vm5582_vm1, %v7170_v15 }
 0xa92   :  { %5277 = vmatprep.subr.bf16.mxu1 %v7170_v15 }
 0xa94   :  { %5266 = vmatpush3.bf16.msra.mxu0 %v5906_v31 }
 0xa95   :  { %5283 = vmatprep.subr.bf16.mxu0 %v7170_v15 }
 0xa97   :  { %5268 = vmatmul.mubr.msk.bf16.vlgmr.msra.gmra.mrb[228].mxu0 %vm1148_vm8, %v5526_v29 }
 0xa98   :  { %5284 = vmatpush3.bf16.msra.mxu0 %v6188_v8  ;;  %5285 = vmatprep.mubr.msk.bf16.mxu0 %vm5582_vm1, %v7170_v15 }
 0xa99   :  { %5301 = vmatprep.subr.bf16.mxu0 %v7170_v15 }
 0xaa1   :  { %v3605_v60 = vpop.f32.mrb[220].mxu0 }
 0xaa2   :  { %v3607_v49 = vpop.f32.mrb[221].mxu0 }
 0xaa3   :  { %v3608_v5 = vpop.f32.mrb[222].mxu0 }
 0xaa4   :  { %v3610_v14 = vpop.f32.mrb[223].mxu0 }
 0xb3a   :  { %v3694_v53 = vpop.f32.mrb[220].mxu1 }
 0xb3b   :  { %v3696_v12 = vpop.f32.mrb[221].mxu1  ;;  %v3695_v23 = vadd.f32 %v3694_v53, %v3605_v60 }
 0xb3c   :  { %v3697_v46 = vpop.f32.mrb[222].mxu1 }
 0xb3d   :  { %v3699_v31 = vpop.f32.mrb[223].mxu1  ;;  %v3698_v27 = vadd.f32 %v3697_v46, %v3608_v5 }
 0xb4e   :  { %v3848_v19 = vpop.f32.mrb[224].mxu1 }
 0xb4f   :  { %v5241_v2 = vpop.f32.mrb[225].mxu1 }
 0xb50   :  { %v3851_v9 = vpop.f32.mrb[226].mxu1  ;;  %v4221_v2 = vld [vmem:[%s7174_s4] sm:$0xf] }
 0xb51   :  { %v3855_v21 = vpack.c.bf16 %v3851_v9, %v3848_v19  ;;  %v5242_v8 = vpop.f32.mrb[227].mxu1  ;;  %v4127_v9 = vld [vmem:[%s7175_s23] sm:$0xf] }
 0xb56   :  { %v3795_v54 = vpop.f32.mrb[224].mxu0 }
 0xb57   :  { %v3802_v18 = vadd.f32 %v3795_v54, %v3695_v23  ;;  %v3797_v30 = vpop.f32.mrb[225].mxu0 }
 0xb58   :  { %v3798_v32 = vpop.f32.mrb[226].mxu0 }
 0xb59   :  { %v3803_v13 = vadd.f32 %v3798_v32, %v3698_v27  ;;  %v3800_v1 = vpop.f32.mrb[227].mxu0 }
 0xb62   :  { %v3900_v50 = vpop.f32.mrb[228].mxu1 }
 0xb63   :  { %v5255_v58 = vpop.f32.mrb[229].mxu1 }
 0xb64   :  { %v3903_v6 = vpop.f32.mrb[230].mxu1 }
 0xb65   :  { %v3907_v41 = vpack.c.bf16 %v3903_v6, %v3900_v50  ;;  %v5256_v47 = vpop.f32.mrb[231].mxu1  ;;  %v4696_v6 = vld [vmem:[%s5732_s30] ss:$0 sm:$0xff] }
 0xb66   :  { %v4327_v47 = vld [vmem:[%s5737_s24] sm:$0xff] }
 0xb67   :  { %5274 = vmatmul.mubr.msk.bf16.vlgmr.msra.gmra.mrb[232].mxu1 %vm1703_vm10, %v3907_v41 }
 0xb68   :  { %5278 = vmatpush3.bf16.msra.mxu1 %v6093_v57  ;;  %5279 = vmatprep.mubr.msk.bf16.mxu1 %vm5582_vm1, %v7170_v15 }
 0xb69   :  { %5289 = vmatprep.subr.bf16.mxu1 %v7170_v15 }
 0xb6a   :  { %v3952_v42 = vpop.f32.mrb[228].mxu0 }
 0xb6b   :  { %v5269_v0 = vpop.f32.mrb[229].mxu0 }
 0xb6c   :  { %v3955_v3 = vpop.f32.mrb[230].mxu0 }
 0xb6d   :  { %v3959_v16 = vpack.c.bf16 %v3955_v3, %v3952_v42  ;;  %v5270_v34 = vpop.f32.mrb[231].mxu0 }
 0xb6f   :  { %5280 = vmatmul.mubr.msk.bf16.vlgmr.msra.gmra.mrb[236].mxu1 %vm1703_vm10, %v3855_v21  ;;  %5286 = vmatmul.mubr.msk.bf16.vlgmr.msra.gmra.mrb[232].mxu0 %vm1703_vm10, %v3959_v16 }
 0xb70   :  { %5303 = vmatprep.mubr.msk.bf16.mxu0 %vm5582_vm1, %v7170_v15  ;;  %5291 = vmatprep.mubr.msk.bf16.mxu1 %vm5582_vm1, %v7170_v15 }
 0xc3a   :  { %v3997_v57 = vpop.f32.mrb[232].mxu1 }
 0xc3b   :  { %v5275_v10 = vpop.f32.mrb[233].mxu1 }
 0xc3c   :  { %v4000_v7 = vpop.f32.mrb[234].mxu1 }
 0xc3d   :  { %v5276_v55 = vpop.f32.mrb[235].mxu1 }
 0xc42   :  { %v4041_v33 = vpop.f32.mrb[236].mxu1  ;;  %v4085_v35 = vpop.f32.mrb[232].mxu0 }
 0xc43   :  { %v4042_v11 = vadd.f32 %v4041_v33, %v3997_v57  ;;  %v5281_v62 = vpop.f32.mrb[237].mxu1  ;;  %v5287_v17 = vpop.f32.mrb[233].mxu0 }
 0xc44   :  { %v4044_v24 = vpop.f32.mrb[238].mxu1  ;;  %v4088_v51 = vpop.f32.mrb[234].mxu0 }
 0xc45   :  { %v4045_v56 = vadd.f32 %v4044_v24, %v4000_v7  ;;  %v4092_v61 = vadd.f32 %v4085_v35, %v4042_v11  ;;  %v5282_v22 = vpop.f32.mrb[239].mxu1  ;;  %v5288_v40 = vpop.f32.mrb[235].mxu0 }
 0xc47   :  { %v4094_v37 = vadd.f32 %v4092_v61, %v3802_v18  ;;  %v4093_v20 = vadd.f32 %v4088_v51, %v4045_v56 }
 0xc49   :  { %v4108_v59 = vadd.f32 %v4101_v63, %v4094_v37  ;;  %v4095_v48 = vadd.f32 %v4093_v20, %v3803_v13 }
 0xc4b   :  { %v4110_v36 = vmax.f32 %v4108_v59, 0.0  ;;  %v4109_v52 = vadd.f32 %v4106_v26, %v4095_v48 }
 0xc4d   :  { %v4114_v29 = vmul.f32 %v4113_v28, %v4110_v36  ;;  %v4111_v60 = vmax.f32 %v4109_v52, 0.0 }
 0xc4f   :  { %v4118_v49 = vadd.f32 %v4117_v25, %v4114_v29  ;;  %v4115_v5 = vmul.f32 %v4113_v28, %v4111_v60 }
 0xc51   :  { %v4120_v14 = vmul.f32 %v4118_v49, %v5780_v38  ;;  %v4123_v53 = vmul.f32 %v4118_v49, %v5782_v39  ;;  %v4119_v12 = vadd.f32 %v4117_v25, %v4115_v5  ;;  %v4220_v39 = vld [vmem:[%s7176_s26] sm:$0xf] }
 0xc53   :  { %v4121_v23 = vmul.f32 %v4119_v12, %v5788_v44  ;;  %v4124_v46 = vmul.f32 %v4119_v12, %v5790_v45  ;;  %v4126_v44 = vld [vmem:[%s7177_s28] sm:$0xf] }
 0xc55   :  { %v4125_v31 = vpack.c.bf16 %v4124_v46, %v4123_v53  ;;  %v4122_v27 = vpack.c.bf16 %v4121_v23, %v4120_v14 }
 0xc57   :  { %v4132_v19 = vand.u32 %v4125_v31, %v5786_v43  ;;  %v4178_v38 = vand.u32 %v4122_v27, %v5786_v43 }
 0xc59   :  { %5290 = vmatpush3.bf16.msra.mxu1 %v4132_v19  ;;  %5302 = vmatpush3.bf16.msra.mxu0 %v4132_v19 }
 0xc5a   :  { %5295 = vmatprep.subr.bf16.mxu1 %v7170_v15  ;;  %5307 = vmatprep.subr.bf16.mxu0 %v7170_v15 }
 0xc5c   :  { %5304 = vmatmul.mubr.msk.bf16.vlgmr.msra.gmra.mrb[236].mxu0 %vm515_vm7, %v4221_v2  ;;  %5292 = vmatmul.mubr.msk.bf16.vlgmr.msra.gmra.mrb[240].mxu1 %vm515_vm7, %v4127_v9 }
 0xc5d   :  { %5296 = vmatpush3.bf16.msra.mxu1 %v4178_v38  ;;  %5308 = vmatpush3.bf16.msra.mxu0 %v4178_v38 }
 0xc5e   :  { %5309 = vmatprep.mubr.msk.bf16.mxu0 %vm5582_vm1, %v7170_v15  ;;  %5297 = vmatprep.mubr.msk.bf16.mxu1 %vm5582_vm1, %v7170_v15 }
 0xc68   :  { %5310 = vmatmul.mubr.msk.bf16.vlgmr.msra.gmra.mrb[236].mxu0 %vm515_vm7, %v4220_v39  ;;  %5298 = vmatmul.mubr.msk.bf16.vlgmr.msra.gmra.mrb[240].mxu1 %vm515_vm7, %v4126_v44 }
 0xd3b   :  { %v4302_v45 = vpop.f32.mrb[236].mxu0  ;;  %v4214_v15 = vpop.f32.mrb[240].mxu1 }
 0xd3c   :  { %4315 = vrot.lane.b32.xlu0 %v4302_v45, %s5580_s22  ;;  %v5311_v43 = vpop.f32.mrb[237].mxu0  ;;  %v5299_v30 = vpop.f32.mrb[241].mxu1  ;;  %v4314_v41 = vmul.f32 %v4696_v6, %v4214_v15 }
 0xd3d   :  { %v4305_v21 = vpop.f32.mrb[238].mxu0  ;;  %v4217_v32 = vpop.f32.mrb[242].mxu1 }
 0xd3e   :  { %v5312_v8 = vpop.f32.mrb[239].mxu0  ;;  %v5300_v13 = vpop.f32.mrb[243].mxu1 }
 0xdae   :  { %v4316_v54 = vpop.permute.xlu0 %4315 }
 0xdaf   :  { %v4317_v18 = vsel %vm144_vm0, %v4316_v54, %v4302_v45 }
 0xdb0   :  { %4318 = vrot.lane.b32.xlu1 %v4317_v18, %s5580_s22 }
 0xe22   :  { %v4319_v1 = vpop.permute.xlu1 %4318 }
 0xe23   :  { %v4320_v50 = vsel %vm144_vm0, %v4319_v1, %v4302_v45 }
 0xe24   :  { %v4321_v58 = vmul.f32 %v4320_v50, %v5842_v4 }
 0xe26   :  { %4323 = vrot.lane.b32.xlu0 %v4321_v58, %s5587_s17 }
 0xe98   :  { %v4324_v42 = vpop.permute.xlu0 %4323 }
 0xe99   :  { %v4326_v0 = vadd.f32 %v4324_v42, %v4314_v41 }
 0xe9b   :  { %v4328_v3 = vmul.f32 %v4327_v47, %v4326_v0 }
 0xe9d   :  { %4330 = vst.msk [vmem:[%s5745_s27] sm:$0xff] %vm4329_vm12, %v4328_v3 }
 0xe9e   :  { %4335 = vsyncpa [#allocation3], 1 }

</bundles_post_ra>
